<compile_context>
chip_gen: v6e
topology: v6e:2x2x1
jax: 0.10.0
libtpu: 0.0.40
codegen_flags: <defaults>
</compile_context>

<pallas_src>
import functools

import jax
import jax.numpy as jnp
from jax.experimental import pallas as pl
from jax.experimental.pallas import tpu as pltpu


VMEM_LIMIT = 32 * 1024 * 1024   # safe scoped-VMEM request on v5e/v6e/v7x
LN_EPS = 1e-5
IGNORE_INDEX = -100


def _pick_tile(dim, target, multiple):
    """Largest tile <= target that divides dim (dim itself if small)."""
    if dim <= target:
        return dim
    t = target
    while t > multiple and dim % t != 0:
        t -= multiple
    assert dim % t == 0, f"dim {dim} not tileable by multiples of {multiple}"
    return t


# --------------------------------------------------------------------------
# Kernel 1: tiled matmul  y = act(x @ w + b)       (bias/GELU fused epilogue)
# --------------------------------------------------------------------------
def _matmul_kernel(x_ref, w_ref, b_ref, o_ref, acc_ref, *, activation):
    k = pl.program_id(2)

    @pl.when(k == 0)
    def _():
        acc_ref[...] = jnp.zeros_like(acc_ref)

    acc_ref[...] += jnp.dot(x_ref[...], w_ref[...],
                            preferred_element_type=jnp.float32)

    @pl.when(k == pl.num_programs(2) - 1)
    def _():
        y = acc_ref[...] + b_ref[...]
        if activation == "gelu":
            y = jax.nn.gelu(y, approximate=True)
        o_ref[...] = y.astype(o_ref.dtype)


def dense(x, w, b, activation=None):
    M, K = x.shape
    _, N = w.shape
    tm = _pick_tile(M, 256, 8)
    tn = _pick_tile(N, 512, 128)
    tk = _pick_tile(K, 512, 128)
    kernel = functools.partial(_matmul_kernel, activation=activation)
    return pl.pallas_call(
        kernel,
        out_shape=jax.ShapeDtypeStruct((M, N), jnp.float32),
        grid_spec=pltpu.PrefetchScalarGridSpec(
            num_scalar_prefetch=0,
            grid=(M // tm, N // tn, K // tk),
            in_specs=[
                pl.BlockSpec((tm, tk), lambda i, j, k: (i, k)),
                pl.BlockSpec((tk, tn), lambda i, j, k: (k, j)),
                pl.BlockSpec((1, tn), lambda i, j, k: (0, j)),
            ],
            out_specs=pl.BlockSpec((tm, tn), lambda i, j, k: (i, j)),
            scratch_shapes=[pltpu.VMEM((tm, tn), jnp.float32)],
        ),
        compiler_params=pltpu.CompilerParams(
            dimension_semantics=("parallel", "parallel", "arbitrary"),
            vmem_limit_bytes=VMEM_LIMIT),
    )(x, w, b.reshape(1, N))


# --------------------------------------------------------------------------
# Kernel 2: tiled matmul + bias + residual + LayerNorm fused epilogue
#           y = LN(x @ w + b + residual) * gamma + beta
# --------------------------------------------------------------------------
def _matmul_res_ln_kernel(x_ref, w_ref, b_ref, r_ref, g_ref, be_ref,
                          o_ref, acc_ref, *, eps):
    k = pl.program_id(1)

    @pl.when(k == 0)
    def _():
        acc_ref[...] = jnp.zeros_like(acc_ref)

    acc_ref[...] += jnp.dot(x_ref[...], w_ref[...],
                            preferred_element_type=jnp.float32)

    @pl.when(k == pl.num_programs(1) - 1)
    def _():
        y = acc_ref[...] + b_ref[...] + r_ref[...]
        mu = jnp.mean(y, axis=-1, keepdims=True)
        var = jnp.mean(jnp.square(y - mu), axis=-1, keepdims=True)
        o_ref[...] = (((y - mu) * jax.lax.rsqrt(var + eps)) * g_ref[...]
                      + be_ref[...]).astype(o_ref.dtype)


def dense_res_ln(x, w, b, residual, gamma, beta, eps=LN_EPS):
    M, K = x.shape
    _, N = w.shape
    tm = _pick_tile(M, 256, 8)
    tk = _pick_tile(K, 512, 128)
    kernel = functools.partial(_matmul_res_ln_kernel, eps=eps)
    return pl.pallas_call(
        kernel,
        out_shape=jax.ShapeDtypeStruct((M, N), jnp.float32),
        grid_spec=pltpu.PrefetchScalarGridSpec(
            num_scalar_prefetch=0,
            grid=(M // tm, K // tk),
            in_specs=[
                pl.BlockSpec((tm, tk), lambda i, k: (i, k)),
                pl.BlockSpec((tk, N), lambda i, k: (k, 0)),
                pl.BlockSpec((1, N), lambda i, k: (0, 0)),
                pl.BlockSpec((tm, N), lambda i, k: (i, 0)),
                pl.BlockSpec((1, N), lambda i, k: (0, 0)),
                pl.BlockSpec((1, N), lambda i, k: (0, 0)),
            ],
            out_specs=pl.BlockSpec((tm, N), lambda i, k: (i, 0)),
            scratch_shapes=[pltpu.VMEM((tm, N), jnp.float32)],
        ),
        compiler_params=pltpu.CompilerParams(
            dimension_semantics=("parallel", "arbitrary"),
            vmem_limit_bytes=VMEM_LIMIT),
    )(x, w, b.reshape(1, N), residual, gamma.reshape(1, N), beta.reshape(1, N))


# --------------------------------------------------------------------------
# Kernel 3: fused multi-head attention (per batch element, all heads in VMEM)
#           softmax((q k^T) * scale + bias) @ v
# --------------------------------------------------------------------------
def _attn_kernel(q_ref, k_ref, v_ref, bias_ref, o_ref, *, num_heads, scale):
    bias = bias_ref[0]                                    # (Tq, Tk)
    for h in range(num_heads):                            # tiny, unrolled
        qh = q_ref[0, h]                                  # (Tq, Dh)
        kh = k_ref[0, h]                                  # (Tk, Dh)
        vh = v_ref[0, h]                                  # (Tk, Dh)
        s = jax.lax.dot_general(qh, kh, (((1,), (1,)), ((), ())),
                                preferred_element_type=jnp.float32)
        s = s * scale + bias
        s = s - jnp.max(s, axis=-1, keepdims=True)
        p = jnp.exp(s)
        p = p * pl.reciprocal(jnp.sum(p, axis=-1, keepdims=True), approx=True)
        o_ref[0, h] = jnp.dot(p, vh, preferred_element_type=jnp.float32)


def attention(q, k, v, bias):
    B, H, Tq, Dh = q.shape
    _, _, Tk, _ = k.shape
    scale = 1.0 / (Dh ** 0.5)
    kernel = functools.partial(_attn_kernel, num_heads=H, scale=scale)
    return pl.pallas_call(
        kernel,
        out_shape=jax.ShapeDtypeStruct((B, H, Tq, Dh), jnp.float32),
        grid_spec=pltpu.PrefetchScalarGridSpec(
            num_scalar_prefetch=0,
            grid=(B,),
            in_specs=[
                pl.BlockSpec((1, H, Tq, Dh), lambda b: (b, 0, 0, 0)),
                pl.BlockSpec((1, H, Tk, Dh), lambda b: (b, 0, 0, 0)),
                pl.BlockSpec((1, H, Tk, Dh), lambda b: (b, 0, 0, 0)),
                pl.BlockSpec((1, Tq, Tk), lambda b: (b, 0, 0)),
            ],
            out_specs=pl.BlockSpec((1, H, Tq, Dh), lambda b: (b, 0, 0, 0)),
        ),
        compiler_params=pltpu.CompilerParams(
            dimension_semantics=("parallel",),
            vmem_limit_bytes=VMEM_LIMIT),
    )(q, k, v, bias)


# --------------------------------------------------------------------------
# Kernel 4: fused embedding sum + LayerNorm   LN(word + pos + token_type)
# --------------------------------------------------------------------------
def _embed_ln_kernel(w_ref, p_ref, tt_ref, g_ref, b_ref, o_ref, *, eps):
    e = w_ref[...] + p_ref[...] + tt_ref[...]
    mu = jnp.mean(e, axis=-1, keepdims=True)
    var = jnp.mean(jnp.square(e - mu), axis=-1, keepdims=True)
    o_ref[...] = ((e - mu) * jax.lax.rsqrt(var + eps)) * g_ref[...] + b_ref[...]


def embed_layer_norm(w_rows, p_rows, tt, gamma, beta, eps=LN_EPS):
    M, D = w_rows.shape
    tm = _pick_tile(M, 512, 8)
    kernel = functools.partial(_embed_ln_kernel, eps=eps)
    return pl.pallas_call(
        kernel,
        out_shape=jax.ShapeDtypeStruct((M, D), jnp.float32),
        grid_spec=pltpu.PrefetchScalarGridSpec(
            num_scalar_prefetch=0,
            grid=(M // tm,),
            in_specs=[
                pl.BlockSpec((tm, D), lambda i: (i, 0)),
                pl.BlockSpec((tm, D), lambda i: (i, 0)),
                pl.BlockSpec((1, D), lambda i: (0, 0)),
                pl.BlockSpec((1, D), lambda i: (0, 0)),
                pl.BlockSpec((1, D), lambda i: (0, 0)),
            ],
            out_specs=pl.BlockSpec((tm, D), lambda i: (i, 0)),
        ),
        compiler_params=pltpu.CompilerParams(
            dimension_semantics=("parallel",),
            vmem_limit_bytes=VMEM_LIMIT),
    )(w_rows, p_rows, tt.reshape(1, D), gamma.reshape(1, D),
      beta.reshape(1, D))


# --------------------------------------------------------------------------
# Kernel 5: standalone row LayerNorm (LM head transform)
# --------------------------------------------------------------------------
def _ln_kernel(x_ref, g_ref, b_ref, o_ref, *, eps):
    x = x_ref[...]
    mu = jnp.mean(x, axis=-1, keepdims=True)
    var = jnp.mean(jnp.square(x - mu), axis=-1, keepdims=True)
    o_ref[...] = ((x - mu) * jax.lax.rsqrt(var + eps)) * g_ref[...] + b_ref[...]


def layer_norm(x, gamma, beta, eps=LN_EPS):
    M, D = x.shape
    tm = _pick_tile(M, 512, 8)
    kernel = functools.partial(_ln_kernel, eps=eps)
    return pl.pallas_call(
        kernel,
        out_shape=jax.ShapeDtypeStruct((M, D), jnp.float32),
        grid_spec=pltpu.PrefetchScalarGridSpec(
            num_scalar_prefetch=0,
            grid=(M // tm,),
            in_specs=[
                pl.BlockSpec((tm, D), lambda i: (i, 0)),
                pl.BlockSpec((1, D), lambda i: (0, 0)),
                pl.BlockSpec((1, D), lambda i: (0, 0)),
            ],
            out_specs=pl.BlockSpec((tm, D), lambda i: (i, 0)),
        ),
        compiler_params=pltpu.CompilerParams(
            dimension_semantics=("parallel",),
            vmem_limit_bytes=VMEM_LIMIT),
    )(x, gamma.reshape(1, D), beta.reshape(1, D))


# --------------------------------------------------------------------------
# Kernel 6: per-token softmax cross-entropy (masked via ignore_index)
# --------------------------------------------------------------------------
def _xent_kernel(lg_ref, lb_ref, loss_ref, *, ignore_index):
    x = lg_ref[...]                                       # (tm, V)
    lbl = lb_ref[...]                                     # (tm, 1) int32
    m = jnp.max(x, axis=-1, keepdims=True)
    lse = jnp.log(jnp.sum(jnp.exp(x - m), axis=-1, keepdims=True)) + m
    col = jax.lax.broadcasted_iota(jnp.int32, x.shape, 1)
    onehot = (col == lbl).astype(jnp.float32)
    picked = jnp.sum(x * onehot, axis=-1, keepdims=True)
    valid = (lbl != ignore_index).astype(jnp.float32)
    loss_ref[...] = (lse - picked) * valid


def token_cross_entropy(logits, labels_col):
    M, V = logits.shape
    tm = _pick_tile(M, 256, 8)
    kernel = functools.partial(_xent_kernel, ignore_index=IGNORE_INDEX)
    return pl.pallas_call(
        kernel,
        out_shape=jax.ShapeDtypeStruct((M, 1), jnp.float32),
        grid_spec=pltpu.PrefetchScalarGridSpec(
            num_scalar_prefetch=0,
            grid=(M // tm,),
            in_specs=[
                pl.BlockSpec((tm, V), lambda i: (i, 0)),
                pl.BlockSpec((tm, 1), lambda i: (i, 0)),
            ],
            out_specs=pl.BlockSpec((tm, 1), lambda i: (i, 0)),
        ),
        compiler_params=pltpu.CompilerParams(
            dimension_semantics=("parallel",),
            vmem_limit_bytes=VMEM_LIMIT),
    )(logits, labels_col)


# --------------------------------------------------------------------------
# glue: head split/merge (layout plumbing; tiny XLA transposes)
# --------------------------------------------------------------------------
def split_heads(x_flat, B, T, H, Dh):
    # (B*T, D) -> (B, H, T, Dh)
    return x_flat.reshape(B, T, H, Dh).transpose(0, 2, 1, 3)


def merge_heads(x, B, T, H, Dh):
    # (B, H, T, Dh) -> (B*T, D)
    return x.transpose(0, 2, 1, 3).reshape(B * T, H * Dh)


# --------------------------------------------------------------------------
# Synthetic Camembert-decoder parameters (checkpoint not available)
# --------------------------------------------------------------------------
def init_params(key, vocab, d_model, n_heads, d_ff, n_layers, max_pos):
    keys = iter(jax.random.split(key, 16 + 8 * n_layers))

    def w(shape, scale=0.02):
        return (scale * jax.random.normal(next(keys), shape)).astype(jnp.float32)

    def ones(n):
        return jnp.ones((n,), jnp.float32)

    def zeros(n):
        return jnp.zeros((n,), jnp.float32)

    params = {
        "word_emb": w((vocab, d_model)),
        "pos_emb": w((max_pos, d_model)),
        "tt_emb": w((1, d_model)),
        "emb_ln_g": ones(d_model), "emb_ln_b": zeros(d_model),
        "lm_dense_w": w((d_model, d_model)), "lm_dense_b": zeros(d_model),
        "lm_ln_g": ones(d_model), "lm_ln_b": zeros(d_model),
        "lm_dec_w": w((d_model, vocab)), "lm_dec_b": zeros(vocab),
        "layers": [],
    }
    for _ in range(n_layers):
        params["layers"].append({
            # self attention: fused QKV projection
            "w_qkv": w((d_model, 3 * d_model)), "b_qkv": zeros(3 * d_model),
            "w_ao": w((d_model, d_model)), "b_ao": zeros(d_model),
            "ln1_g": ones(d_model), "ln1_b": zeros(d_model),
            # cross attention: Q from decoder, fused KV from encoder states
            "w_q_c": w((d_model, d_model)), "b_q_c": zeros(d_model),
            "w_kv_c": w((d_model, 2 * d_model)), "b_kv_c": zeros(2 * d_model),
            "w_co": w((d_model, d_model)), "b_co": zeros(d_model),
            "ln2_g": ones(d_model), "ln2_b": zeros(d_model),
            # feed-forward
            "w_i": w((d_model, d_ff)), "b_i": zeros(d_ff),
            "w_o": w((d_ff, d_model)), "b_o": zeros(d_model),
            "ln3_g": ones(d_model), "ln3_b": zeros(d_model),
        })
    return params


# --------------------------------------------------------------------------
# one decoder layer (causal self-attn + cross-attn + FFN, post-LN RoBERTa)
# --------------------------------------------------------------------------
def decoder_layer(p, hidden, B, T, enc_kv, self_bias, cross_bias, H, Dh):
    D = hidden.shape[-1]

    # --- causal self attention ---
    qkv = dense(hidden, p["w_qkv"], p["b_qkv"])               # (B*T, 3D)
    q = split_heads(qkv[:, 0 * D:1 * D], B, T, H, Dh)
    k = split_heads(qkv[:, 1 * D:2 * D], B, T, H, Dh)
    v = split_heads(qkv[:, 2 * D:3 * D], B, T, H, Dh)
    a = merge_heads(attention(q, k, v, self_bias), B, T, H, Dh)
    hidden = dense_res_ln(a, p["w_ao"], p["b_ao"], hidden,
                          p["ln1_g"], p["ln1_b"])

    # --- cross attention over encoder hidden states ---
    qc = split_heads(dense(hidden, p["w_q_c"], p["b_q_c"]), B, T, H, Dh)
    kc, vc = enc_kv
    a = merge_heads(attention(qc, kc, vc, cross_bias), B, T, H, Dh)
    hidden = dense_res_ln(a, p["w_co"], p["b_co"], hidden,
                          p["ln2_g"], p["ln2_b"])

    # --- feed forward (GELU fused into the first matmul epilogue) ---
    inter = dense(hidden, p["w_i"], p["b_i"], activation="gelu")
    hidden = dense_res_ln(inter, p["w_o"], p["b_o"], hidden,
                          p["ln3_g"], p["ln3_b"])
    return hidden


# --------------------------------------------------------------------------
# TextDecoder.forward
# --------------------------------------------------------------------------
def text_decoder_forward(params, input_ids, attention_mask,
                         encoder_hidden_states, encoder_attention_mask,
                         labels=None, *, num_heads=2, pad_id=1):
    B, T = input_ids.shape
    _, Te, D = encoder_hidden_states.shape
    Dh = D // num_heads

    # --- embeddings (RoBERTa-style position ids from the pad mask) ---
    id_mask = (input_ids != pad_id).astype(jnp.int32)
    pos_ids = jnp.cumsum(id_mask, axis=-1) * id_mask + pad_id
    # TODO(synk): embedding-table gather stays in XLA (jnp.take); a generic
    # dynamic vocab gather has no clean rectangular BlockSpec equivalent.
    w_rows = jnp.take(params["word_emb"], input_ids.reshape(-1), axis=0)
    p_rows = jnp.take(params["pos_emb"], pos_ids.reshape(-1), axis=0)
    hidden = embed_layer_norm(w_rows, p_rows, params["tt_emb"],
                              params["emb_ln_g"], params["emb_ln_b"])  # (B*T,D)

    # --- additive attention biases (causal + padding; tiny glue) ---
    am = attention_mask.astype(jnp.float32)                   # (B, T)
    causal = jnp.tril(jnp.ones((T, T), jnp.float32))
    self_bias = (1.0 - causal[None, :, :] * am[:, None, :]) * jnp.float32(-1e9)
    em = encoder_attention_mask.astype(jnp.float32)           # (B, Te)
    cross_bias = jnp.broadcast_to(((1.0 - em) * jnp.float32(-1e9))[:, None, :],
                                  (B, T, Te))

    enc_flat = encoder_hidden_states.reshape(B * Te, D)
    for lp in params["layers"]:
        kv = dense(enc_flat, lp["w_kv_c"], lp["b_kv_c"])      # (B*Te, 2D)
        kc = split_heads(kv[:, :D], B, Te, num_heads, Dh)
        vc = split_heads(kv[:, D:], B, Te, num_heads, Dh)
        hidden = decoder_layer(lp, hidden, B, T, (kc, vc),
                               self_bias, cross_bias, num_heads, Dh)

    # --- LM head: dense + gelu + LN + vocab projection ---
    h = dense(hidden, params["lm_dense_w"], params["lm_dense_b"],
              activation="gelu")
    h = layer_norm(h, params["lm_ln_g"], params["lm_ln_b"])
    logits = dense(h, params["lm_dec_w"], params["lm_dec_b"])  # (B*T, V)

    out = {"logits": logits.reshape(B, T, -1)}
    if labels is not None:
        per_tok = token_cross_entropy(logits, labels.reshape(-1, 1))
        valid = (labels.reshape(-1) != IGNORE_INDEX).astype(jnp.float32)
        out["loss"] = jnp.sum(per_tok) / jnp.maximum(jnp.sum(valid), 1.0)
    return out


# --------------------------------------------------------------------------
if __name__ == "__main__":
    key = jax.random.PRNGKey(0)
    B, T_dec, T_enc = 2, 8, 16
    D, H, FF, V, L = 128, 2, 512, 512, 2
    PAD, MAX_POS = 1, 32
    ks = jax.random.split(key, 8)

    input_ids = jax.random.randint(ks[0], (B, T_dec), 2, V, dtype=jnp.int32)
    attention_mask = jnp.ones((B, T_dec), jnp.int32)
    attention_mask = attention_mask.at[1, -2:].set(0)          # some padding
    input_ids = input_ids.at[1, -2:].set(PAD)

    encoder_hidden_states = jax.random.normal(ks[1], (B, T_enc, D), jnp.float32)
    encoder_attention_mask = jnp.ones((B, T_enc), jnp.int32)
    encoder_attention_mask = encoder_attention_mask.at[0, -3:].set(0)

    labels = jax.random.randint(ks[2], (B, T_dec), 0, V, dtype=jnp.int32)
    labels = jnp.where(attention_mask == 1, labels, IGNORE_INDEX)

    params = init_params(ks[3], V, D, H, FF, L, MAX_POS)

    fwd = jax.jit(functools.partial(text_decoder_forward,
                                    num_heads=H, pad_id=PAD))
    out = fwd(params, input_ids, attention_mask,
              encoder_hidden_states, encoder_attention_mask, labels)
    jax.block_until_ready(out)

    assert out["logits"].shape == (B, T_dec, V)
    assert out["loss"].shape == ()
    assert bool(jnp.isfinite(out["loss"]))
    print("KERNEL_OK")
</pallas_src>

<mosaic_0001>
module attributes {stable_mosaic.version = 11 : i64} {
  func.func @_attn_kernel(%arg0: i32, %arg1: memref<1x2x8x64xf32, #tpu.memory_space<vmem>>, %arg2: memref<1x2x8x64xf32, #tpu.memory_space<vmem>>, %arg3: memref<1x2x8x64xf32, #tpu.memory_space<vmem>>, %arg4: memref<1x8x8xf32, #tpu.memory_space<vmem>>, %arg5: memref<1x2x8x64xf32, #tpu.memory_space<vmem>>) attributes {dimension_semantics = [#tpu.dimension_semantics<parallel>], iteration_bounds = array<i64: 2>, scalar_prefetch = 0 : i64, scratch_operands = 0 : i64, tpu.core_type = #tpu.core_type<tc>, window_params = [{transform_indices = @transform_0, window_bounds = array<i64: 1, 2, 8, 64>}, {transform_indices = @transform_1, window_bounds = array<i64: 1, 2, 8, 64>}, {transform_indices = @transform_2, window_bounds = array<i64: 1, 2, 8, 64>}, {transform_indices = @transform_3, window_bounds = array<i64: 1, 8, 8>}, {transform_indices = @transform_4, window_bounds = array<i64: 1, 2, 8, 64>}]} {
    %c0 = arith.constant 0 : index
    %c0_0 = arith.constant 0 : index
    %c0_1 = arith.constant 0 : index
    %0 = vector.load %arg4[%c0, %c0_0, %c0_1] : memref<1x8x8xf32, #tpu.memory_space<vmem>>, vector<1x8x8xf32>
    %1 = vector.shape_cast %0 : vector<1x8x8xf32> to vector<8x8xf32>
    %c0_2 = arith.constant 0 : index
    %c0_3 = arith.constant 0 : index
    %c0_4 = arith.constant 0 : index
    %c0_5 = arith.constant 0 : index
    %2 = vector.load %arg1[%c0_2, %c0_3, %c0_4, %c0_5] : memref<1x2x8x64xf32, #tpu.memory_space<vmem>>, vector<1x1x8x64xf32>
    %3 = vector.shape_cast %2 : vector<1x1x8x64xf32> to vector<8x64xf32>
    %c0_6 = arith.constant 0 : index
    %c0_7 = arith.constant 0 : index
    %c0_8 = arith.constant 0 : index
    %c0_9 = arith.constant 0 : index
    %4 = vector.load %arg2[%c0_6, %c0_7, %c0_8, %c0_9] : memref<1x2x8x64xf32, #tpu.memory_space<vmem>>, vector<1x1x8x64xf32>
    %5 = vector.shape_cast %4 : vector<1x1x8x64xf32> to vector<8x64xf32>
    %c0_10 = arith.constant 0 : index
    %c0_11 = arith.constant 0 : index
    %c0_12 = arith.constant 0 : index
    %c0_13 = arith.constant 0 : index
    %6 = vector.load %arg3[%c0_10, %c0_11, %c0_12, %c0_13] : memref<1x2x8x64xf32, #tpu.memory_space<vmem>>, vector<1x1x8x64xf32>
    %7 = vector.shape_cast %6 : vector<1x1x8x64xf32> to vector<8x64xf32>
    %cst = arith.constant dense<0.000000e+00> : vector<8x8xf32>
    %8 = tpu.matmul %3, %5, %cst {dimension_numbers = #tpu.dot_dimension_numbers<[1], [1], [0], [0], [0, 0, 1, 0], [], []>} : vector<8x64xf32>, vector<8x64xf32>, vector<8x8xf32> -> vector<8x8xf32>
    %cst_14 = arith.constant 1.250000e-01 : f32
    %9 = vector.broadcast %cst_14 : f32 to vector<8x8xf32>
    %10 = arith.mulf %8, %9 : vector<8x8xf32>
    %11 = arith.addf %10, %1 : vector<8x8xf32>
    %cst_15 = arith.constant dense<0xFF800000> : vector<8xf32>
    %12 = vector.multi_reduction <maximumf>, %11, %cst_15 [1] : vector<8x8xf32> to vector<8xf32>
    %13 = vector.shape_cast %12 : vector<8xf32> to vector<8x1xf32>
    %14 = vector.broadcast %13 : vector<8x1xf32> to vector<8x8xf32>
    %15 = arith.subf %11, %14 : vector<8x8xf32>
    %16 = math.exp %15 : vector<8x8xf32>
    %cst_16 = arith.constant dense<0.000000e+00> : vector<8xf32>
    %17 = vector.multi_reduction <add>, %16, %cst_16 [1] : vector<8x8xf32> to vector<8xf32>
    %18 = vector.shape_cast %17 : vector<8xf32> to vector<8x1xf32>
    %19 = tpu.reciprocal %18 {approx = true} : vector<8x1xf32> -> vector<8x1xf32>
    %20 = vector.broadcast %19 : vector<8x1xf32> to vector<8x8xf32>
    %21 = arith.mulf %16, %20 : vector<8x8xf32>
    %cst_17 = arith.constant dense<0.000000e+00> : vector<8x64xf32>
    %22 = tpu.matmul %21, %7, %cst_17 {dimension_numbers = #tpu.dot_dimension_numbers<[1], [0], [0], [1], [0, 0, 1, 1], [], []>} : vector<8x8xf32>, vector<8x64xf32>, vector<8x64xf32> -> vector<8x64xf32>
    %c0_18 = arith.constant 0 : index
    %c0_19 = arith.constant 0 : index
    %c0_20 = arith.constant 0 : index
    %c0_21 = arith.constant 0 : index
    %23 = vector.load %arg5[%c0_18, %c0_19, %c0_20, %c0_21] : memref<1x2x8x64xf32, #tpu.memory_space<vmem>>, vector<1x1x8x64xf32>
    %24 = vector.shape_cast %23 : vector<1x1x8x64xf32> to vector<8x64xf32>
    %25 = vector.shape_cast %22 : vector<8x64xf32> to vector<1x1x8x64xf32>
    tpu.vector_store %arg5[%c0_18, %c0_19, %c0_20, %c0_21], %25 {strides = array<i32>} : memref<1x2x8x64xf32, #tpu.memory_space<vmem>>, vector<1x1x8x64xf32>,
    %c0_22 = arith.constant 0 : index
    %c1 = arith.constant 1 : index
    %c0_23 = arith.constant 0 : index
    %c0_24 = arith.constant 0 : index
    %26 = vector.load %arg1[%c0_22, %c1, %c0_23, %c0_24] : memref<1x2x8x64xf32, #tpu.memory_space<vmem>>, vector<1x1x8x64xf32>
    %27 = vector.shape_cast %26 : vector<1x1x8x64xf32> to vector<8x64xf32>
    %c0_25 = arith.constant 0 : index
    %c1_26 = arith.constant 1 : index
    %c0_27 = arith.constant 0 : index
    %c0_28 = arith.constant 0 : index
    %28 = vector.load %arg2[%c0_25, %c1_26, %c0_27, %c0_28] : memref<1x2x8x64xf32, #tpu.memory_space<vmem>>, vector<1x1x8x64xf32>
    %29 = vector.shape_cast %28 : vector<1x1x8x64xf32> to vector<8x64xf32>
    %c0_29 = arith.constant 0 : index
    %c1_30 = arith.constant 1 : index
    %c0_31 = arith.constant 0 : index
    %c0_32 = arith.constant 0 : index
    %30 = vector.load %arg3[%c0_29, %c1_30, %c0_31, %c0_32] : memref<1x2x8x64xf32, #tpu.memory_space<vmem>>, vector<1x1x8x64xf32>
    %31 = vector.shape_cast %30 : vector<1x1x8x64xf32> to vector<8x64xf32>
    %cst_33 = arith.constant dense<0.000000e+00> : vector<8x8xf32>
    %32 = tpu.matmul %27, %29, %cst_33 {dimension_numbers = #tpu.dot_dimension_numbers<[1], [1], [0], [0], [0, 0, 1, 0], [], []>} : vector<8x64xf32>, vector<8x64xf32>, vector<8x8xf32> -> vector<8x8xf32>
    %cst_34 = arith.constant 1.250000e-01 : f32
    %33 = vector.broadcast %cst_34 : f32 to vector<8x8xf32>
    %34 = arith.mulf %32, %33 : vector<8x8xf32>
    %35 = arith.addf %34, %1 : vector<8x8xf32>
    %cst_35 = arith.constant dense<0xFF800000> : vector<8xf32>
    %36 = vector.multi_reduction <maximumf>, %35, %cst_35 [1] : vector<8x8xf32> to vector<8xf32>
    %37 = vector.shape_cast %36 : vector<8xf32> to vector<8x1xf32>
    %38 = vector.broadcast %37 : vector<8x1xf32> to vector<8x8xf32>
    %39 = arith.subf %35, %38 : vector<8x8xf32>
    %40 = math.exp %39 : vector<8x8xf32>
    %cst_36 = arith.constant dense<0.000000e+00> : vector<8xf32>
    %41 = vector.multi_reduction <add>, %40, %cst_36 [1] : vector<8x8xf32> to vector<8xf32>
    %42 = vector.shape_cast %41 : vector<8xf32> to vector<8x1xf32>
    %43 = tpu.reciprocal %42 {approx = true} : vector<8x1xf32> -> vector<8x1xf32>
    %44 = vector.broadcast %43 : vector<8x1xf32> to vector<8x8xf32>
    %45 = arith.mulf %40, %44 : vector<8x8xf32>
    %cst_37 = arith.constant dense<0.000000e+00> : vector<8x64xf32>
    %46 = tpu.matmul %45, %31, %cst_37 {dimension_numbers = #tpu.dot_dimension_numbers<[1], [0], [0], [1], [0, 0, 1, 1], [], []>} : vector<8x8xf32>, vector<8x64xf32>, vector<8x64xf32> -> vector<8x64xf32>
    %c0_38 = arith.constant 0 : index
    %c1_39 = arith.constant 1 : index
    %c0_40 = arith.constant 0 : index
    %c0_41 = arith.constant 0 : index
    %47 = vector.load %arg5[%c0_38, %c1_39, %c0_40, %c0_41] : memref<1x2x8x64xf32, #tpu.memory_space<vmem>>, vector<1x1x8x64xf32>
    %48 = vector.shape_cast %47 : vector<1x1x8x64xf32> to vector<8x64xf32>
    %49 = vector.shape_cast %46 : vector<8x64xf32> to vector<1x1x8x64xf32>
    tpu.vector_store %arg5[%c0_38, %c1_39, %c0_40, %c0_41], %49 {strides = array<i32>} : memref<1x2x8x64xf32, #tpu.memory_space<vmem>>, vector<1x1x8x64xf32>,
    return
  }
  func.func @transform_0(%arg0: i32) -> (i32, i32, i32, i32) {
    %c0_i32 = arith.constant 0 : i32
    %c0_i32_0 = arith.constant 0 : i32
    %c0_i32_1 = arith.constant 0 : i32
    %c0_i32_2 = arith.constant 0 : i32
    return %arg0, %c0_i32, %c0_i32_0, %c0_i32_1 : i32, i32, i32, i32
  }
  func.func @transform_1(%arg0: i32) -> (i32, i32, i32, i32) {
    %c0_i32 = arith.constant 0 : i32
    %c0_i32_0 = arith.constant 0 : i32
    %c0_i32_1 = arith.constant 0 : i32
    %c0_i32_2 = arith.constant 0 : i32
    return %arg0, %c0_i32, %c0_i32_0, %c0_i32_1 : i32, i32, i32, i32
  }
  func.func @transform_2(%arg0: i32) -> (i32, i32, i32, i32) {
    %c0_i32 = arith.constant 0 : i32
    %c0_i32_0 = arith.constant 0 : i32
    %c0_i32_1 = arith.constant 0 : i32
    %c0_i32_2 = arith.constant 0 : i32
    return %arg0, %c0_i32, %c0_i32_0, %c0_i32_1 : i32, i32, i32, i32
  }
  func.func @transform_3(%arg0: i32) -> (i32, i32, i32) {
    %c0_i32 = arith.constant 0 : i32
    %c0_i32_0 = arith.constant 0 : i32
    %c0_i32_1 = arith.constant 0 : i32
    return %arg0, %c0_i32, %c0_i32_0 : i32, i32, i32
  }
  func.func @transform_4(%arg0: i32) -> (i32, i32, i32, i32) {
    %c0_i32 = arith.constant 0 : i32
    %c0_i32_0 = arith.constant 0 : i32
    %c0_i32_1 = arith.constant 0 : i32
    %c0_i32_2 = arith.constant 0 : i32
    return %arg0, %c0_i32, %c0_i32_0, %c0_i32_1 : i32, i32, i32, i32
  }
}

module attributes {stable_mosaic.version = 11 : i64} {
  func.func @_matmul_kernel(%arg0: i32, %arg1: i32, %arg2: i32, %arg3: memref<16x128xf32, #tpu.memory_space<vmem>>, %arg4: memref<128x384xf32, #tpu.memory_space<vmem>>, %arg5: memref<1x384xf32, #tpu.memory_space<vmem>>, %arg6: memref<16x384xf32, #tpu.memory_space<vmem>>, %arg7: memref<16x384xf32, #tpu.memory_space<vmem>>) attributes {dimension_semantics = [#tpu.dimension_semantics<parallel>, #tpu.dimension_semantics<parallel>, #tpu.dimension_semantics<arbitrary>], iteration_bounds = array<i64: 1, 1, 1>, scalar_prefetch = 0 : i64, scratch_operands = 1 : i64, tpu.core_type = #tpu.core_type<tc>, window_params = [{transform_indices = @transform_0, window_bounds = array<i64: 16, 128>}, {transform_indices = @transform_1, window_bounds = array<i64: 128, 384>}, {transform_indices = @transform_2, window_bounds = array<i64: 1, 384>}, {transform_indices = @transform_3, window_bounds = array<i64: 16, 384>}]} {
    %c0_i32 = arith.constant 0 : i32
    %0 = arith.cmpi eq, %arg2, %c0_i32 : i32
    %1 = arith.extui %0 : i1 to i32
    %c0_i32_0 = arith.constant 0 : i32
    %2 = arith.cmpi ne, %1, %c0_i32_0 : i32
    scf.if %2 {
      %cst_10 = arith.constant 0.000000e+00 : f32
      %12 = vector.broadcast %cst_10 : f32 to vector<16x384xf32>
      %c0_11 = arith.constant 0 : index
      %c0_12 = arith.constant 0 : index
      %13 = vector.load %arg7[%c0_11, %c0_12] : memref<16x384xf32, #tpu.memory_space<vmem>>, vector<16x384xf32>
      tpu.vector_store %arg7[%c0_11, %c0_12], %12 {strides = array<i32>} : memref<16x384xf32, #tpu.memory_space<vmem>>, vector<16x384xf32>,
    } else {
    }
    %c0 = arith.constant 0 : index
    %c0_1 = arith.constant 0 : index
    %3 = vector.load %arg7[%c0, %c0_1] : memref<16x384xf32, #tpu.memory_space<vmem>>, vector<16x384xf32>
    %c0_2 = arith.constant 0 : index
    %c0_3 = arith.constant 0 : index
    %4 = vector.load %arg3[%c0_2, %c0_3] : memref<16x128xf32, #tpu.memory_space<vmem>>, vector<16x128xf32>
    %c0_4 = arith.constant 0 : index
    %c0_5 = arith.constant 0 : index
    %5 = vector.load %arg4[%c0_4, %c0_5] : memref<128x384xf32, #tpu.memory_space<vmem>>, vector<128x384xf32>
    %cst = arith.constant dense<0.000000e+00> : vector<16x384xf32>
    %6 = tpu.matmul %4, %5, %cst {dimension_numbers = #tpu.dot_dimension_numbers<[1], [0], [0], [1], [0, 0, 1, 1], [], []>} : vector<16x128xf32>, vector<128x384xf32>, vector<16x384xf32> -> vector<16x384xf32>
    %7 = arith.addf %3, %6 : vector<16x384xf32>
    %c0_6 = arith.constant 0 : index
    %c0_7 = arith.constant 0 : index
    %8 = vector.load %arg7[%c0_6, %c0_7] : memref<16x384xf32, #tpu.memory_space<vmem>>, vector<16x384xf32>
    tpu.vector_store %arg7[%c0_6, %c0_7], %7 {strides = array<i32>} : memref<16x384xf32, #tpu.memory_space<vmem>>, vector<16x384xf32>,
    %c0_i32_8 = arith.constant 0 : i32
    %9 = arith.cmpi eq, %arg2, %c0_i32_8 : i32
    %10 = arith.extui %9 : i1 to i32
    %c0_i32_9 = arith.constant 0 : i32
    %11 = arith.cmpi ne, %10, %c0_i32_9 : i32
    scf.if %11 {
      %c0_10 = arith.constant 0 : index
      %c0_11 = arith.constant 0 : index
      %12 = vector.load %arg7[%c0_10, %c0_11] : memref<16x384xf32, #tpu.memory_space<vmem>>, vector<16x384xf32>
      %c0_12 = arith.constant 0 : index
      %c0_13 = arith.constant 0 : index
      %13 = vector.load %arg5[%c0_12, %c0_13] : memref<1x384xf32, #tpu.memory_space<vmem>>, vector<1x384xf32>
      %14 = vector.broadcast %13 : vector<1x384xf32> to vector<16x384xf32>
      %15 = arith.addf %12, %14 : vector<16x384xf32>
      %c0_14 = arith.constant 0 : index
      %c0_15 = arith.constant 0 : index
      %16 = vector.load %arg6[%c0_14, %c0_15] : memref<16x384xf32, #tpu.memory_space<vmem>>, vector<16x384xf32>
      tpu.vector_store %arg6[%c0_14, %c0_15], %15 {strides = array<i32>} : memref<16x384xf32, #tpu.memory_space<vmem>>, vector<16x384xf32>,
    } else {
    }
    return
  }
  func.func @transform_0(%arg0: i32, %arg1: i32, %arg2: i32) -> (i32, i32) {
    %c0_i32 = arith.constant 0 : i32
    return %arg0, %arg2 : i32, i32
  }
  func.func @transform_1(%arg0: i32, %arg1: i32, %arg2: i32) -> (i32, i32) {
    %c0_i32 = arith.constant 0 : i32
    return %arg2, %arg1 : i32, i32
  }
  func.func @transform_2(%arg0: i32, %arg1: i32, %arg2: i32) -> (i32, i32) {
    %c0_i32 = arith.constant 0 : i32
    %c0_i32_0 = arith.constant 0 : i32
    return %c0_i32, %arg1 : i32, i32
  }
  func.func @transform_3(%arg0: i32, %arg1: i32, %arg2: i32) -> (i32, i32) {
    %c0_i32 = arith.constant 0 : i32
    return %arg0, %arg1 : i32, i32
  }
}

module attributes {stable_mosaic.version = 11 : i64} {
  func.func @_embed_ln_kernel(%arg0: i32, %arg1: memref<16x128xf32, #tpu.memory_space<vmem>>, %arg2: memref<16x128xf32, #tpu.memory_space<vmem>>, %arg3: memref<1x128xf32, #tpu.memory_space<vmem>>, %arg4: memref<1x128xf32, #tpu.memory_space<vmem>>, %arg5: memref<1x128xf32, #tpu.memory_space<vmem>>, %arg6: memref<16x128xf32, #tpu.memory_space<vmem>>) attributes {dimension_semantics = [#tpu.dimension_semantics<parallel>], iteration_bounds = array<i64: 1>, scalar_prefetch = 0 : i64, scratch_operands = 0 : i64, tpu.core_type = #tpu.core_type<tc>, window_params = [{transform_indices = @transform_0, window_bounds = array<i64: 16, 128>}, {transform_indices = @transform_1, window_bounds = array<i64: 16, 128>}, {pipeline_mode = #tpu.pipeline_mode<synchronous>, transform_indices = @transform_2, window_bounds = array<i64: 1, 128>}, {pipeline_mode = #tpu.pipeline_mode<synchronous>, transform_indices = @transform_3, window_bounds = array<i64: 1, 128>}, {pipeline_mode = #tpu.pipeline_mode<synchronous>, transform_indices = @transform_4, window_bounds = array<i64: 1, 128>}, {transform_indices = @transform_5, window_bounds = array<i64: 16, 128>}]} {
    %c0 = arith.constant 0 : index
    %c0_0 = arith.constant 0 : index
    %0 = vector.load %arg1[%c0, %c0_0] : memref<16x128xf32, #tpu.memory_space<vmem>>, vector<16x128xf32>
    %c0_1 = arith.constant 0 : index
    %c0_2 = arith.constant 0 : index
    %1 = vector.load %arg2[%c0_1, %c0_2] : memref<16x128xf32, #tpu.memory_space<vmem>>, vector<16x128xf32>
    %2 = arith.addf %0, %1 : vector<16x128xf32>
    %c0_3 = arith.constant 0 : index
    %c0_4 = arith.constant 0 : index
    %3 = vector.load %arg3[%c0_3, %c0_4] : memref<1x128xf32, #tpu.memory_space<vmem>>, vector<1x128xf32>
    %4 = vector.broadcast %3 : vector<1x128xf32> to vector<16x128xf32>
    %5 = arith.addf %2, %4 : vector<16x128xf32>
    %cst = arith.constant dense<0.000000e+00> : vector<16xf32>
    %6 = vector.multi_reduction <add>, %5, %cst [1] : vector<16x128xf32> to vector<16xf32>
    %7 = vector.shape_cast %6 : vector<16xf32> to vector<16x1xf32>
    %cst_5 = arith.constant 1.280000e+02 : f32
    %8 = vector.broadcast %cst_5 : f32 to vector<16x1xf32>
    %9 = arith.divf %7, %8 : vector<16x1xf32>
    %10 = vector.broadcast %9 : vector<16x1xf32> to vector<16x128xf32>
    %11 = arith.subf %5, %10 : vector<16x128xf32>
    %12 = arith.mulf %11, %11 : vector<16x128xf32>
    %cst_6 = arith.constant dense<0.000000e+00> : vector<16xf32>
    %13 = vector.multi_reduction <add>, %12, %cst_6 [1] : vector<16x128xf32> to vector<16xf32>
    %14 = vector.shape_cast %13 : vector<16xf32> to vector<16x1xf32>
    %cst_7 = arith.constant 1.280000e+02 : f32
    %15 = vector.broadcast %cst_7 : f32 to vector<16x1xf32>
    %16 = arith.divf %14, %15 : vector<16x1xf32>
    %17 = vector.broadcast %9 : vector<16x1xf32> to vector<16x128xf32>
    %18 = arith.subf %5, %17 : vector<16x128xf32>
    %cst_8 = arith.constant 9.99999974E-6 : f32
    %19 = vector.broadcast %cst_8 : f32 to vector<16x1xf32>
    %20 = arith.addf %16, %19 : vector<16x1xf32>
    %21 = math.rsqrt %20 : vector<16x1xf32>
    %22 = vector.broadcast %21 : vector<16x1xf32> to vector<16x128xf32>
    %23 = arith.mulf %18, %22 : vector<16x128xf32>
    %c0_9 = arith.constant 0 : index
    %c0_10 = arith.constant 0 : index
    %24 = vector.load %arg4[%c0_9, %c0_10] : memref<1x128xf32, #tpu.memory_space<vmem>>, vector<1x128xf32>
    %25 = vector.broadcast %24 : vector<1x128xf32> to vector<16x128xf32>
    %26 = arith.mulf %23, %25 : vector<16x128xf32>
    %c0_11 = arith.constant 0 : index
    %c0_12 = arith.constant 0 : index
    %27 = vector.load %arg5[%c0_11, %c0_12] : memref<1x128xf32, #tpu.memory_space<vmem>>, vector<1x128xf32>
    %28 = vector.broadcast %27 : vector<1x128xf32> to vector<16x128xf32>
    %29 = arith.addf %26, %28 : vector<16x128xf32>
    %c0_13 = arith.constant 0 : index
    %c0_14 = arith.constant 0 : index
    %30 = vector.load %arg6[%c0_13, %c0_14] : memref<16x128xf32, #tpu.memory_space<vmem>>, vector<16x128xf32>
    tpu.vector_store %arg6[%c0_13, %c0_14], %29 {strides = array<i32>} : memref<16x128xf32, #tpu.memory_space<vmem>>, vector<16x128xf32>,
    return
  }
  func.func @transform_0(%arg0: i32) -> (i32, i32) {
    %c0_i32 = arith.constant 0 : i32
    %c0_i32_0 = arith.constant 0 : i32
    return %arg0, %c0_i32 : i32, i32
  }
  func.func @transform_1(%arg0: i32) -> (i32, i32) {
    %c0_i32 = arith.constant 0 : i32
    %c0_i32_0 = arith.constant 0 : i32
    return %arg0, %c0_i32 : i32, i32
  }
  func.func @transform_2(%arg0: i32) -> (i32, i32) {
    %c0_i32 = arith.constant 0 : i32
    %c0_i32_0 = arith.constant 0 : i32
    %c0_i32_1 = arith.constant 0 : i32
    return %c0_i32, %c0_i32_0 : i32, i32
  }
  func.func @transform_3(%arg0: i32) -> (i32, i32) {
    %c0_i32 = arith.constant 0 : i32
    %c0_i32_0 = arith.constant 0 : i32
    %c0_i32_1 = arith.constant 0 : i32
    return %c0_i32, %c0_i32_0 : i32, i32
  }
  func.func @transform_4(%arg0: i32) -> (i32, i32) {
    %c0_i32 = arith.constant 0 : i32
    %c0_i32_0 = arith.constant 0 : i32
    %c0_i32_1 = arith.constant 0 : i32
    return %c0_i32, %c0_i32_0 : i32, i32
  }
  func.func @transform_5(%arg0: i32) -> (i32, i32) {
    %c0_i32 = arith.constant 0 : i32
    %c0_i32_0 = arith.constant 0 : i32
    return %arg0, %c0_i32 : i32, i32
  }
}

module attributes {stable_mosaic.version = 11 : i64} {
  func.func @_matmul_res_ln_kernel(%arg0: i32, %arg1: i32, %arg2: memref<16x128xf32, #tpu.memory_space<vmem>>, %arg3: memref<128x128xf32, #tpu.memory_space<vmem>>, %arg4: memref<1x128xf32, #tpu.memory_space<vmem>>, %arg5: memref<16x128xf32, #tpu.memory_space<vmem>>, %arg6: memref<1x128xf32, #tpu.memory_space<vmem>>, %arg7: memref<1x128xf32, #tpu.memory_space<vmem>>, %arg8: memref<16x128xf32, #tpu.memory_space<vmem>>, %arg9: memref<16x128xf32, #tpu.memory_space<vmem>>) attributes {dimension_semantics = [#tpu.dimension_semantics<parallel>, #tpu.dimension_semantics<arbitrary>], iteration_bounds = array<i64: 1, 1>, scalar_prefetch = 0 : i64, scratch_operands = 1 : i64, tpu.core_type = #tpu.core_type<tc>, window_params = [{transform_indices = @transform_0, window_bounds = array<i64: 16, 128>}, {transform_indices = @transform_1, window_bounds = array<i64: 128, 128>}, {pipeline_mode = #tpu.pipeline_mode<synchronous>, transform_indices = @transform_2, window_bounds = array<i64: 1, 128>}, {transform_indices = @transform_3, window_bounds = array<i64: 16, 128>}, {pipeline_mode = #tpu.pipeline_mode<synchronous>, transform_indices = @transform_4, window_bounds = array<i64: 1, 128>}, {pipeline_mode = #tpu.pipeline_mode<synchronous>, transform_indices = @transform_5, window_bounds = array<i64: 1, 128>}, {transform_indices = @transform_6, window_bounds = array<i64: 16, 128>}]} {
    %c0_i32 = arith.constant 0 : i32
    %0 = arith.cmpi eq, %arg1, %c0_i32 : i32
    %1 = arith.extui %0 : i1 to i32
    %c0_i32_0 = arith.constant 0 : i32
    %2 = arith.cmpi ne, %1, %c0_i32_0 : i32
    scf.if %2 {
      %cst_10 = arith.constant 0.000000e+00 : f32
      %12 = vector.broadcast %cst_10 : f32 to vector<16x128xf32>
      %c0_11 = arith.constant 0 : index
      %c0_12 = arith.constant 0 : index
      %13 = vector.load %arg9[%c0_11, %c0_12] : memref<16x128xf32, #tpu.memory_space<vmem>>, vector<16x128xf32>
      tpu.vector_store %arg9[%c0_11, %c0_12], %12 {strides = array<i32>} : memref<16x128xf32, #tpu.memory_space<vmem>>, vector<16x128xf32>,
    } else {
    }
    %c0 = arith.constant 0 : index
    %c0_1 = arith.constant 0 : index
    %3 = vector.load %arg9[%c0, %c0_1] : memref<16x128xf32, #tpu.memory_space<vmem>>, vector<16x128xf32>
    %c0_2 = arith.constant 0 : index
    %c0_3 = arith.constant 0 : index
    %4 = vector.load %arg2[%c0_2, %c0_3] : memref<16x128xf32, #tpu.memory_space<vmem>>, vector<16x128xf32>
    %c0_4 = arith.constant 0 : index
    %c0_5 = arith.constant 0 : index
    %5 = vector.load %arg3[%c0_4, %c0_5] : memref<128x128xf32, #tpu.memory_space<vmem>>, vector<128x128xf32>
    %cst = arith.constant dense<0.000000e+00> : vector<16x128xf32>
    %6 = tpu.matmul %4, %5, %cst {dimension_numbers = #tpu.dot_dimension_numbers<[1], [0], [0], [1], [0, 0, 1, 1], [], []>} : vector<16x128xf32>, vector<128x128xf32>, vector<16x128xf32> -> vector<16x128xf32>
    %7 = arith.addf %3, %6 : vector<16x128xf32>
    %c0_6 = arith.constant 0 : index
    %c0_7 = arith.constant 0 : index
    %8 = vector.load %arg9[%c0_6, %c0_7] : memref<16x128xf32, #tpu.memory_space<vmem>>, vector<16x128xf32>
    tpu.vector_store %arg9[%c0_6, %c0_7], %7 {strides = array<i32>} : memref<16x128xf32, #tpu.memory_space<vmem>>, vector<16x128xf32>,
    %c0_i32_8 = arith.constant 0 : i32
    %9 = arith.cmpi eq, %arg1, %c0_i32_8 : i32
    %10 = arith.extui %9 : i1 to i32
    %c0_i32_9 = arith.constant 0 : i32
    %11 = arith.cmpi ne, %10, %c0_i32_9 : i32
    scf.if %11 {
      %c0_10 = arith.constant 0 : index
      %c0_11 = arith.constant 0 : index
      %12 = vector.load %arg9[%c0_10, %c0_11] : memref<16x128xf32, #tpu.memory_space<vmem>>, vector<16x128xf32>
      %c0_12 = arith.constant 0 : index
      %c0_13 = arith.constant 0 : index
      %13 = vector.load %arg4[%c0_12, %c0_13] : memref<1x128xf32, #tpu.memory_space<vmem>>, vector<1x128xf32>
      %14 = vector.broadcast %13 : vector<1x128xf32> to vector<16x128xf32>
      %15 = arith.addf %12, %14 : vector<16x128xf32>
      %c0_14 = arith.constant 0 : index
      %c0_15 = arith.constant 0 : index
      %16 = vector.load %arg5[%c0_14, %c0_15] : memref<16x128xf32, #tpu.memory_space<vmem>>, vector<16x128xf32>
      %17 = arith.addf %15, %16 : vector<16x128xf32>
      %cst_16 = arith.constant dense<0.000000e+00> : vector<16xf32>
      %18 = vector.multi_reduction <add>, %17, %cst_16 [1] : vector<16x128xf32> to vector<16xf32>
      %19 = vector.shape_cast %18 : vector<16xf32> to vector<16x1xf32>
      %cst_17 = arith.constant 1.280000e+02 : f32
      %20 = vector.broadcast %cst_17 : f32 to vector<16x1xf32>
      %21 = arith.divf %19, %20 : vector<16x1xf32>
      %22 = vector.broadcast %21 : vector<16x1xf32> to vector<16x128xf32>
      %23 = arith.subf %17, %22 : vector<16x128xf32>
      %24 = arith.mulf %23, %23 : vector<16x128xf32>
      %cst_18 = arith.constant dense<0.000000e+00> : vector<16xf32>
      %25 = vector.multi_reduction <add>, %24, %cst_18 [1] : vector<16x128xf32> to vector<16xf32>
      %26 = vector.shape_cast %25 : vector<16xf32> to vector<16x1xf32>
      %cst_19 = arith.constant 1.280000e+02 : f32
      %27 = vector.broadcast %cst_19 : f32 to vector<16x1xf32>
      %28 = arith.divf %26, %27 : vector<16x1xf32>
      %29 = vector.broadcast %21 : vector<16x1xf32> to vector<16x128xf32>
      %30 = arith.subf %17, %29 : vector<16x128xf32>
      %cst_20 = arith.constant 9.99999974E-6 : f32
      %31 = vector.broadcast %cst_20 : f32 to vector<16x1xf32>
      %32 = arith.addf %28, %31 : vector<16x1xf32>
      %33 = math.rsqrt %32 : vector<16x1xf32>
      %34 = vector.broadcast %33 : vector<16x1xf32> to vector<16x128xf32>
      %35 = arith.mulf %30, %34 : vector<16x128xf32>
      %c0_21 = arith.constant 0 : index
      %c0_22 = arith.constant 0 : index
      %36 = vector.load %arg6[%c0_21, %c0_22] : memref<1x128xf32, #tpu.memory_space<vmem>>, vector<1x128xf32>
      %37 = vector.broadcast %36 : vector<1x128xf32> to vector<16x128xf32>
      %38 = arith.mulf %35, %37 : vector<16x128xf32>
      %c0_23 = arith.constant 0 : index
      %c0_24 = arith.constant 0 : index
      %39 = vector.load %arg7[%c0_23, %c0_24] : memref<1x128xf32, #tpu.memory_space<vmem>>, vector<1x128xf32>
      %40 = vector.broadcast %39 : vector<1x128xf32> to vector<16x128xf32>
      %41 = arith.addf %38, %40 : vector<16x128xf32>
      %c0_25 = arith.constant 0 : index
      %c0_26 = arith.constant 0 : index
      %42 = vector.load %arg8[%c0_25, %c0_26] : memref<16x128xf32, #tpu.memory_space<vmem>>, vector<16x128xf32>
      tpu.vector_store %arg8[%c0_25, %c0_26], %41 {strides = array<i32>} : memref<16x128xf32, #tpu.memory_space<vmem>>, vector<16x128xf32>,
    } else {
    }
    return
  }
  func.func @transform_0(%arg0: i32, %arg1: i32) -> (i32, i32) {
    %c0_i32 = arith.constant 0 : i32
    return %arg0, %arg1 : i32, i32
  }
  func.func @transform_1(%arg0: i32, %arg1: i32) -> (i32, i32) {
    %c0_i32 = arith.constant 0 : i32
    %c0_i32_0 = arith.constant 0 : i32
    return %arg1, %c0_i32 : i32, i32
  }
  func.func @transform_2(%arg0: i32, %arg1: i32) -> (i32, i32) {
    %c0_i32 = arith.constant 0 : i32
    %c0_i32_0 = arith.constant 0 : i32
    %c0_i32_1 = arith.constant 0 : i32
    return %c0_i32, %c0_i32_0 : i32, i32
  }
  func.func @transform_3(%arg0: i32, %arg1: i32) -> (i32, i32) {
    %c0_i32 = arith.constant 0 : i32
    %c0_i32_0 = arith.constant 0 : i32
    return %arg0, %c0_i32 : i32, i32
  }
  func.func @transform_4(%arg0: i32, %arg1: i32) -> (i32, i32) {
    %c0_i32 = arith.constant 0 : i32
    %c0_i32_0 = arith.constant 0 : i32
    %c0_i32_1 = arith.constant 0 : i32
    return %c0_i32, %c0_i32_0 : i32, i32
  }
  func.func @transform_5(%arg0: i32, %arg1: i32) -> (i32, i32) {
    %c0_i32 = arith.constant 0 : i32
    %c0_i32_0 = arith.constant 0 : i32
    %c0_i32_1 = arith.constant 0 : i32
    return %c0_i32, %c0_i32_0 : i32, i32
  }
  func.func @transform_6(%arg0: i32, %arg1: i32) -> (i32, i32) {
    %c0_i32 = arith.constant 0 : i32
    %c0_i32_0 = arith.constant 0 : i32
    return %arg0, %c0_i32 : i32, i32
  }
}

module attributes {stable_mosaic.version = 11 : i64} {
  func.func @_matmul_kernel(%arg0: i32, %arg1: i32, %arg2: i32, %arg3: memref<32x128xf32, #tpu.memory_space<vmem>>, %arg4: memref<128x256xf32, #tpu.memory_space<vmem>>, %arg5: memref<1x256xf32, #tpu.memory_space<vmem>>, %arg6: memref<32x256xf32, #tpu.memory_space<vmem>>, %arg7: memref<32x256xf32, #tpu.memory_space<vmem>>) attributes {dimension_semantics = [#tpu.dimension_semantics<parallel>, #tpu.dimension_semantics<parallel>, #tpu.dimension_semantics<arbitrary>], iteration_bounds = array<i64: 1, 1, 1>, scalar_prefetch = 0 : i64, scratch_operands = 1 : i64, tpu.core_type = #tpu.core_type<tc>, window_params = [{transform_indices = @transform_0, window_bounds = array<i64: 32, 128>}, {transform_indices = @transform_1, window_bounds = array<i64: 128, 256>}, {transform_indices = @transform_2, window_bounds = array<i64: 1, 256>}, {transform_indices = @transform_3, window_bounds = array<i64: 32, 256>}]} {
    %c0_i32 = arith.constant 0 : i32
    %0 = arith.cmpi eq, %arg2, %c0_i32 : i32
    %1 = arith.extui %0 : i1 to i32
    %c0_i32_0 = arith.constant 0 : i32
    %2 = arith.cmpi ne, %1, %c0_i32_0 : i32
    scf.if %2 {
      %cst_10 = arith.constant 0.000000e+00 : f32
      %12 = vector.broadcast %cst_10 : f32 to vector<32x256xf32>
      %c0_11 = arith.constant 0 : index
      %c0_12 = arith.constant 0 : index
      %13 = vector.load %arg7[%c0_11, %c0_12] : memref<32x256xf32, #tpu.memory_space<vmem>>, vector<32x256xf32>
      tpu.vector_store %arg7[%c0_11, %c0_12], %12 {strides = array<i32>} : memref<32x256xf32, #tpu.memory_space<vmem>>, vector<32x256xf32>,
    } else {
    }
    %c0 = arith.constant 0 : index
    %c0_1 = arith.constant 0 : index
    %3 = vector.load %arg7[%c0, %c0_1] : memref<32x256xf32, #tpu.memory_space<vmem>>, vector<32x256xf32>
    %c0_2 = arith.constant 0 : index
    %c0_3 = arith.constant 0 : index
    %4 = vector.load %arg3[%c0_2, %c0_3] : memref<32x128xf32, #tpu.memory_space<vmem>>, vector<32x128xf32>
    %c0_4 = arith.constant 0 : index
    %c0_5 = arith.constant 0 : index
    %5 = vector.load %arg4[%c0_4, %c0_5] : memref<128x256xf32, #tpu.memory_space<vmem>>, vector<128x256xf32>
    %cst = arith.constant dense<0.000000e+00> : vector<32x256xf32>
    %6 = tpu.matmul %4, %5, %cst {dimension_numbers = #tpu.dot_dimension_numbers<[1], [0], [0], [1], [0, 0, 1, 1], [], []>} : vector<32x128xf32>, vector<128x256xf32>, vector<32x256xf32> -> vector<32x256xf32>
    %7 = arith.addf %3, %6 : vector<32x256xf32>
    %c0_6 = arith.constant 0 : index
    %c0_7 = arith.constant 0 : index
    %8 = vector.load %arg7[%c0_6, %c0_7] : memref<32x256xf32, #tpu.memory_space<vmem>>, vector<32x256xf32>
    tpu.vector_store %arg7[%c0_6, %c0_7], %7 {strides = array<i32>} : memref<32x256xf32, #tpu.memory_space<vmem>>, vector<32x256xf32>,
    %c0_i32_8 = arith.constant 0 : i32
    %9 = arith.cmpi eq, %arg2, %c0_i32_8 : i32
    %10 = arith.extui %9 : i1 to i32
    %c0_i32_9 = arith.constant 0 : i32
    %11 = arith.cmpi ne, %10, %c0_i32_9 : i32
    scf.if %11 {
      %c0_10 = arith.constant 0 : index
      %c0_11 = arith.constant 0 : index
      %12 = vector.load %arg7[%c0_10, %c0_11] : memref<32x256xf32, #tpu.memory_space<vmem>>, vector<32x256xf32>
      %c0_12 = arith.constant 0 : index
      %c0_13 = arith.constant 0 : index
      %13 = vector.load %arg5[%c0_12, %c0_13] : memref<1x256xf32, #tpu.memory_space<vmem>>, vector<1x256xf32>
      %14 = vector.broadcast %13 : vector<1x256xf32> to vector<32x256xf32>
      %15 = arith.addf %12, %14 : vector<32x256xf32>
      %c0_14 = arith.constant 0 : index
      %c0_15 = arith.constant 0 : index
      %16 = vector.load %arg6[%c0_14, %c0_15] : memref<32x256xf32, #tpu.memory_space<vmem>>, vector<32x256xf32>
      tpu.vector_store %arg6[%c0_14, %c0_15], %15 {strides = array<i32>} : memref<32x256xf32, #tpu.memory_space<vmem>>, vector<32x256xf32>,
    } else {
    }
    return
  }
  func.func @transform_0(%arg0: i32, %arg1: i32, %arg2: i32) -> (i32, i32) {
    %c0_i32 = arith.constant 0 : i32
    return %arg0, %arg2 : i32, i32
  }
  func.func @transform_1(%arg0: i32, %arg1: i32, %arg2: i32) -> (i32, i32) {
    %c0_i32 = arith.constant 0 : i32
    return %arg2, %arg1 : i32, i32
  }
  func.func @transform_2(%arg0: i32, %arg1: i32, %arg2: i32) -> (i32, i32) {
    %c0_i32 = arith.constant 0 : i32
    %c0_i32_0 = arith.constant 0 : i32
    return %c0_i32, %arg1 : i32, i32
  }
  func.func @transform_3(%arg0: i32, %arg1: i32, %arg2: i32) -> (i32, i32) {
    %c0_i32 = arith.constant 0 : i32
    return %arg0, %arg1 : i32, i32
  }
}

module attributes {stable_mosaic.version = 11 : i64} {
  func.func @_matmul_kernel(%arg0: i32, %arg1: i32, %arg2: i32, %arg3: memref<16x128xf32, #tpu.memory_space<vmem>>, %arg4: memref<128x512xf32, #tpu.memory_space<vmem>>, %arg5: memref<1x512xf32, #tpu.memory_space<vmem>>, %arg6: memref<16x512xf32, #tpu.memory_space<vmem>>, %arg7: memref<16x512xf32, #tpu.memory_space<vmem>>) attributes {dimension_semantics = [#tpu.dimension_semantics<parallel>, #tpu.dimension_semantics<parallel>, #tpu.dimension_semantics<arbitrary>], iteration_bounds = array<i64: 1, 1, 1>, scalar_prefetch = 0 : i64, scratch_operands = 1 : i64, tpu.core_type = #tpu.core_type<tc>, window_params = [{transform_indices = @transform_0, window_bounds = array<i64: 16, 128>}, {transform_indices = @transform_1, window_bounds = array<i64: 128, 512>}, {transform_indices = @transform_2, window_bounds = array<i64: 1, 512>}, {transform_indices = @transform_3, window_bounds = array<i64: 16, 512>}]} {
    %c0_i32 = arith.constant 0 : i32
    %0 = arith.cmpi eq, %arg2, %c0_i32 : i32
    %1 = arith.extui %0 : i1 to i32
    %c0_i32_0 = arith.constant 0 : i32
    %2 = arith.cmpi ne, %1, %c0_i32_0 : i32
    scf.if %2 {
      %cst_10 = arith.constant 0.000000e+00 : f32
      %12 = vector.broadcast %cst_10 : f32 to vector<16x512xf32>
      %c0_11 = arith.constant 0 : index
      %c0_12 = arith.constant 0 : index
      %13 = vector.load %arg7[%c0_11, %c0_12] : memref<16x512xf32, #tpu.memory_space<vmem>>, vector<16x512xf32>
      tpu.vector_store %arg7[%c0_11, %c0_12], %12 {strides = array<i32>} : memref<16x512xf32, #tpu.memory_space<vmem>>, vector<16x512xf32>,
    } else {
    }
    %c0 = arith.constant 0 : index
    %c0_1 = arith.constant 0 : index
    %3 = vector.load %arg7[%c0, %c0_1] : memref<16x512xf32, #tpu.memory_space<vmem>>, vector<16x512xf32>
    %c0_2 = arith.constant 0 : index
    %c0_3 = arith.constant 0 : index
    %4 = vector.load %arg3[%c0_2, %c0_3] : memref<16x128xf32, #tpu.memory_space<vmem>>, vector<16x128xf32>
    %c0_4 = arith.constant 0 : index
    %c0_5 = arith.constant 0 : index
    %5 = vector.load %arg4[%c0_4, %c0_5] : memref<128x512xf32, #tpu.memory_space<vmem>>, vector<128x512xf32>
    %cst = arith.constant dense<0.000000e+00> : vector<16x512xf32>
    %6 = tpu.matmul %4, %5, %cst {dimension_numbers = #tpu.dot_dimension_numbers<[1], [0], [0], [1], [0, 0, 1, 1], [], []>} : vector<16x128xf32>, vector<128x512xf32>, vector<16x512xf32> -> vector<16x512xf32>
    %7 = arith.addf %3, %6 : vector<16x512xf32>
    %c0_6 = arith.constant 0 : index
    %c0_7 = arith.constant 0 : index
    %8 = vector.load %arg7[%c0_6, %c0_7] : memref<16x512xf32, #tpu.memory_space<vmem>>, vector<16x512xf32>
    tpu.vector_store %arg7[%c0_6, %c0_7], %7 {strides = array<i32>} : memref<16x512xf32, #tpu.memory_space<vmem>>, vector<16x512xf32>,
    %c0_i32_8 = arith.constant 0 : i32
    %9 = arith.cmpi eq, %arg2, %c0_i32_8 : i32
    %10 = arith.extui %9 : i1 to i32
    %c0_i32_9 = arith.constant 0 : i32
    %11 = arith.cmpi ne, %10, %c0_i32_9 : i32
    scf.if %11 {
      %c0_10 = arith.constant 0 : index
      %c0_11 = arith.constant 0 : index
      %12 = vector.load %arg7[%c0_10, %c0_11] : memref<16x512xf32, #tpu.memory_space<vmem>>, vector<16x512xf32>
      %c0_12 = arith.constant 0 : index
      %c0_13 = arith.constant 0 : index
      %13 = vector.load %arg5[%c0_12, %c0_13] : memref<1x512xf32, #tpu.memory_space<vmem>>, vector<1x512xf32>
      %14 = vector.broadcast %13 : vector<1x512xf32> to vector<16x512xf32>
      %15 = arith.addf %12, %14 : vector<16x512xf32>
      %16 = arith.mulf %15, %15 : vector<16x512xf32>
      %17 = arith.mulf %15, %16 : vector<16x512xf32>
      %cst_14 = arith.constant 4.471500e-02 : f32
      %18 = vector.broadcast %cst_14 : f32 to vector<16x512xf32>
      %19 = arith.mulf %18, %17 : vector<16x512xf32>
      %20 = arith.addf %15, %19 : vector<16x512xf32>
      %cst_15 = arith.constant 0.797884583 : f32
      %21 = vector.broadcast %cst_15 : f32 to vector<16x512xf32>
      %22 = arith.mulf %21, %20 : vector<16x512xf32>
      %23 = math.tanh %22 : vector<16x512xf32>
      %cst_16 = arith.constant 1.000000e+00 : f32
      %24 = vector.broadcast %cst_16 : f32 to vector<16x512xf32>
      %25 = arith.addf %24, %23 : vector<16x512xf32>
      %cst_17 = arith.constant 5.000000e-01 : f32
      %26 = vector.broadcast %cst_17 : f32 to vector<16x512xf32>
      %27 = arith.mulf %26, %25 : vector<16x512xf32>
      %28 = arith.mulf %15, %27 : vector<16x512xf32>
      %c0_18 = arith.constant 0 : index
      %c0_19 = arith.constant 0 : index
      %29 = vector.load %arg6[%c0_18, %c0_19] : memref<16x512xf32, #tpu.memory_space<vmem>>, vector<16x512xf32>
      tpu.vector_store %arg6[%c0_18, %c0_19], %28 {strides = array<i32>} : memref<16x512xf32, #tpu.memory_space<vmem>>, vector<16x512xf32>,
    } else {
    }
    return
  }
  func.func @transform_0(%arg0: i32, %arg1: i32, %arg2: i32) -> (i32, i32) {
    %c0_i32 = arith.constant 0 : i32
    return %arg0, %arg2 : i32, i32
  }
  func.func @transform_1(%arg0: i32, %arg1: i32, %arg2: i32) -> (i32, i32) {
    %c0_i32 = arith.constant 0 : i32
    return %arg2, %arg1 : i32, i32
  }
  func.func @transform_2(%arg0: i32, %arg1: i32, %arg2: i32) -> (i32, i32) {
    %c0_i32 = arith.constant 0 : i32
    %c0_i32_0 = arith.constant 0 : i32
    return %c0_i32, %arg1 : i32, i32
  }
  func.func @transform_3(%arg0: i32, %arg1: i32, %arg2: i32) -> (i32, i32) {
    %c0_i32 = arith.constant 0 : i32
    return %arg0, %arg1 : i32, i32
  }
}

module attributes {stable_mosaic.version = 11 : i64} {
  func.func @_attn_kernel(%arg0: i32, %arg1: memref<1x2x8x64xf32, #tpu.memory_space<vmem>>, %arg2: memref<1x2x16x64xf32, #tpu.memory_space<vmem>>, %arg3: memref<1x2x16x64xf32, #tpu.memory_space<vmem>>, %arg4: memref<1x8x16xf32, #tpu.memory_space<vmem>>, %arg5: memref<1x2x8x64xf32, #tpu.memory_space<vmem>>) attributes {dimension_semantics = [#tpu.dimension_semantics<parallel>], iteration_bounds = array<i64: 2>, scalar_prefetch = 0 : i64, scratch_operands = 0 : i64, tpu.core_type = #tpu.core_type<tc>, window_params = [{transform_indices = @transform_0, window_bounds = array<i64: 1, 2, 8, 64>}, {transform_indices = @transform_1, window_bounds = array<i64: 1, 2, 16, 64>}, {transform_indices = @transform_2, window_bounds = array<i64: 1, 2, 16, 64>}, {transform_indices = @transform_3, window_bounds = array<i64: 1, 8, 16>}, {transform_indices = @transform_4, window_bounds = array<i64: 1, 2, 8, 64>}]} {
    %c0 = arith.constant 0 : index
    %c0_0 = arith.constant 0 : index
    %c0_1 = arith.constant 0 : index
    %0 = vector.load %arg4[%c0, %c0_0, %c0_1] : memref<1x8x16xf32, #tpu.memory_space<vmem>>, vector<1x8x16xf32>
    %1 = vector.shape_cast %0 : vector<1x8x16xf32> to vector<8x16xf32>
    %c0_2 = arith.constant 0 : index
    %c0_3 = arith.constant 0 : index
    %c0_4 = arith.constant 0 : index
    %c0_5 = arith.constant 0 : index
    %2 = vector.load %arg1[%c0_2, %c0_3, %c0_4, %c0_5] : memref<1x2x8x64xf32, #tpu.memory_space<vmem>>, vector<1x1x8x64xf32>
    %3 = vector.shape_cast %2 : vector<1x1x8x64xf32> to vector<8x64xf32>
    %c0_6 = arith.constant 0 : index
    %c0_7 = arith.constant 0 : index
    %c0_8 = arith.constant 0 : index
    %c0_9 = arith.constant 0 : index
    %4 = vector.load %arg2[%c0_6, %c0_7, %c0_8, %c0_9] : memref<1x2x16x64xf32, #tpu.memory_space<vmem>>, vector<1x1x16x64xf32>
    %5 = vector.shape_cast %4 : vector<1x1x16x64xf32> to vector<16x64xf32>
    %c0_10 = arith.constant 0 : index
    %c0_11 = arith.constant 0 : index
    %c0_12 = arith.constant 0 : index
    %c0_13 = arith.constant 0 : index
    %6 = vector.load %arg3[%c0_10, %c0_11, %c0_12, %c0_13] : memref<1x2x16x64xf32, #tpu.memory_space<vmem>>, vector<1x1x16x64xf32>
    %7 = vector.shape_cast %6 : vector<1x1x16x64xf32> to vector<16x64xf32>
    %cst = arith.constant dense<0.000000e+00> : vector<8x16xf32>
    %8 = tpu.matmul %3, %5, %cst {dimension_numbers = #tpu.dot_dimension_numbers<[1], [1], [0], [0], [0, 0, 1, 0], [], []>} : vector<8x64xf32>, vector<16x64xf32>, vector<8x16xf32> -> vector<8x16xf32>
    %cst_14 = arith.constant 1.250000e-01 : f32
    %9 = vector.broadcast %cst_14 : f32 to vector<8x16xf32>
    %10 = arith.mulf %8, %9 : vector<8x16xf32>
    %11 = arith.addf %10, %1 : vector<8x16xf32>
    %cst_15 = arith.constant dense<0xFF800000> : vector<8xf32>
    %12 = vector.multi_reduction <maximumf>, %11, %cst_15 [1] : vector<8x16xf32> to vector<8xf32>
    %13 = vector.shape_cast %12 : vector<8xf32> to vector<8x1xf32>
    %14 = vector.broadcast %13 : vector<8x1xf32> to vector<8x16xf32>
    %15 = arith.subf %11, %14 : vector<8x16xf32>
    %16 = math.exp %15 : vector<8x16xf32>
    %cst_16 = arith.constant dense<0.000000e+00> : vector<8xf32>
    %17 = vector.multi_reduction <add>, %16, %cst_16 [1] : vector<8x16xf32> to vector<8xf32>
    %18 = vector.shape_cast %17 : vector<8xf32> to vector<8x1xf32>
    %19 = tpu.reciprocal %18 {approx = true} : vector<8x1xf32> -> vector<8x1xf32>
    %20 = vector.broadcast %19 : vector<8x1xf32> to vector<8x16xf32>
    %21 = arith.mulf %16, %20 : vector<8x16xf32>
    %cst_17 = arith.constant dense<0.000000e+00> : vector<8x64xf32>
    %22 = tpu.matmul %21, %7, %cst_17 {dimension_numbers = #tpu.dot_dimension_numbers<[1], [0], [0], [1], [0, 0, 1, 1], [], []>} : vector<8x16xf32>, vector<16x64xf32>, vector<8x64xf32> -> vector<8x64xf32>
    %c0_18 = arith.constant 0 : index
    %c0_19 = arith.constant 0 : index
    %c0_20 = arith.constant 0 : index
    %c0_21 = arith.constant 0 : index
    %23 = vector.load %arg5[%c0_18, %c0_19, %c0_20, %c0_21] : memref<1x2x8x64xf32, #tpu.memory_space<vmem>>, vector<1x1x8x64xf32>
    %24 = vector.shape_cast %23 : vector<1x1x8x64xf32> to vector<8x64xf32>
    %25 = vector.shape_cast %22 : vector<8x64xf32> to vector<1x1x8x64xf32>
    tpu.vector_store %arg5[%c0_18, %c0_19, %c0_20, %c0_21], %25 {strides = array<i32>} : memref<1x2x8x64xf32, #tpu.memory_space<vmem>>, vector<1x1x8x64xf32>,
    %c0_22 = arith.constant 0 : index
    %c1 = arith.constant 1 : index
    %c0_23 = arith.constant 0 : index
    %c0_24 = arith.constant 0 : index
    %26 = vector.load %arg1[%c0_22, %c1, %c0_23, %c0_24] : memref<1x2x8x64xf32, #tpu.memory_space<vmem>>, vector<1x1x8x64xf32>
    %27 = vector.shape_cast %26 : vector<1x1x8x64xf32> to vector<8x64xf32>
    %c0_25 = arith.constant 0 : index
    %c1_26 = arith.constant 1 : index
    %c0_27 = arith.constant 0 : index
    %c0_28 = arith.constant 0 : index
    %28 = vector.load %arg2[%c0_25, %c1_26, %c0_27, %c0_28] : memref<1x2x16x64xf32, #tpu.memory_space<vmem>>, vector<1x1x16x64xf32>
    %29 = vector.shape_cast %28 : vector<1x1x16x64xf32> to vector<16x64xf32>
    %c0_29 = arith.constant 0 : index
    %c1_30 = arith.constant 1 : index
    %c0_31 = arith.constant 0 : index
    %c0_32 = arith.constant 0 : index
    %30 = vector.load %arg3[%c0_29, %c1_30, %c0_31, %c0_32] : memref<1x2x16x64xf32, #tpu.memory_space<vmem>>, vector<1x1x16x64xf32>
    %31 = vector.shape_cast %30 : vector<1x1x16x64xf32> to vector<16x64xf32>
    %cst_33 = arith.constant dense<0.000000e+00> : vector<8x16xf32>
    %32 = tpu.matmul %27, %29, %cst_33 {dimension_numbers = #tpu.dot_dimension_numbers<[1], [1], [0], [0], [0, 0, 1, 0], [], []>} : vector<8x64xf32>, vector<16x64xf32>, vector<8x16xf32> -> vector<8x16xf32>
    %cst_34 = arith.constant 1.250000e-01 : f32
    %33 = vector.broadcast %cst_34 : f32 to vector<8x16xf32>
    %34 = arith.mulf %32, %33 : vector<8x16xf32>
    %35 = arith.addf %34, %1 : vector<8x16xf32>
    %cst_35 = arith.constant dense<0xFF800000> : vector<8xf32>
    %36 = vector.multi_reduction <maximumf>, %35, %cst_35 [1] : vector<8x16xf32> to vector<8xf32>
    %37 = vector.shape_cast %36 : vector<8xf32> to vector<8x1xf32>
    %38 = vector.broadcast %37 : vector<8x1xf32> to vector<8x16xf32>
    %39 = arith.subf %35, %38 : vector<8x16xf32>
    %40 = math.exp %39 : vector<8x16xf32>
    %cst_36 = arith.constant dense<0.000000e+00> : vector<8xf32>
    %41 = vector.multi_reduction <add>, %40, %cst_36 [1] : vector<8x16xf32> to vector<8xf32>
    %42 = vector.shape_cast %41 : vector<8xf32> to vector<8x1xf32>
    %43 = tpu.reciprocal %42 {approx = true} : vector<8x1xf32> -> vector<8x1xf32>
    %44 = vector.broadcast %43 : vector<8x1xf32> to vector<8x16xf32>
    %45 = arith.mulf %40, %44 : vector<8x16xf32>
    %cst_37 = arith.constant dense<0.000000e+00> : vector<8x64xf32>
    %46 = tpu.matmul %45, %31, %cst_37 {dimension_numbers = #tpu.dot_dimension_numbers<[1], [0], [0], [1], [0, 0, 1, 1], [], []>} : vector<8x16xf32>, vector<16x64xf32>, vector<8x64xf32> -> vector<8x64xf32>
    %c0_38 = arith.constant 0 : index
    %c1_39 = arith.constant 1 : index
    %c0_40 = arith.constant 0 : index
    %c0_41 = arith.constant 0 : index
    %47 = vector.load %arg5[%c0_38, %c1_39, %c0_40, %c0_41] : memref<1x2x8x64xf32, #tpu.memory_space<vmem>>, vector<1x1x8x64xf32>
    %48 = vector.shape_cast %47 : vector<1x1x8x64xf32> to vector<8x64xf32>
    %49 = vector.shape_cast %46 : vector<8x64xf32> to vector<1x1x8x64xf32>
    tpu.vector_store %arg5[%c0_38, %c1_39, %c0_40, %c0_41], %49 {strides = array<i32>} : memref<1x2x8x64xf32, #tpu.memory_space<vmem>>, vector<1x1x8x64xf32>,
    return
  }
  func.func @transform_0(%arg0: i32) -> (i32, i32, i32, i32) {
    %c0_i32 = arith.constant 0 : i32
    %c0_i32_0 = arith.constant 0 : i32
    %c0_i32_1 = arith.constant 0 : i32
    %c0_i32_2 = arith.constant 0 : i32
    return %arg0, %c0_i32, %c0_i32_0, %c0_i32_1 : i32, i32, i32, i32
  }
  func.func @transform_1(%arg0: i32) -> (i32, i32, i32, i32) {
    %c0_i32 = arith.constant 0 : i32
    %c0_i32_0 = arith.constant 0 : i32
    %c0_i32_1 = arith.constant 0 : i32
    %c0_i32_2 = arith.constant 0 : i32
    return %arg0, %c0_i32, %c0_i32_0, %c0_i32_1 : i32, i32, i32, i32
  }
  func.func @transform_2(%arg0: i32) -> (i32, i32, i32, i32) {
    %c0_i32 = arith.constant 0 : i32
    %c0_i32_0 = arith.constant 0 : i32
    %c0_i32_1 = arith.constant 0 : i32
    %c0_i32_2 = arith.constant 0 : i32
    return %arg0, %c0_i32, %c0_i32_0, %c0_i32_1 : i32, i32, i32, i32
  }
  func.func @transform_3(%arg0: i32) -> (i32, i32, i32) {
    %c0_i32 = arith.constant 0 : i32
    %c0_i32_0 = arith.constant 0 : i32
    %c0_i32_1 = arith.constant 0 : i32
    return %arg0, %c0_i32, %c0_i32_0 : i32, i32, i32
  }
  func.func @transform_4(%arg0: i32) -> (i32, i32, i32, i32) {
    %c0_i32 = arith.constant 0 : i32
    %c0_i32_0 = arith.constant 0 : i32
    %c0_i32_1 = arith.constant 0 : i32
    %c0_i32_2 = arith.constant 0 : i32
    return %arg0, %c0_i32, %c0_i32_0, %c0_i32_1 : i32, i32, i32, i32
  }
}

module attributes {stable_mosaic.version = 11 : i64} {
  func.func @_matmul_kernel(%arg0: i32, %arg1: i32, %arg2: i32, %arg3: memref<16x128xf32, #tpu.memory_space<vmem>>, %arg4: memref<128x128xf32, #tpu.memory_space<vmem>>, %arg5: memref<1x128xf32, #tpu.memory_space<vmem>>, %arg6: memref<16x128xf32, #tpu.memory_space<vmem>>, %arg7: memref<16x128xf32, #tpu.memory_space<vmem>>) attributes {dimension_semantics = [#tpu.dimension_semantics<parallel>, #tpu.dimension_semantics<parallel>, #tpu.dimension_semantics<arbitrary>], iteration_bounds = array<i64: 1, 1, 1>, scalar_prefetch = 0 : i64, scratch_operands = 1 : i64, tpu.core_type = #tpu.core_type<tc>, window_params = [{transform_indices = @transform_0, window_bounds = array<i64: 16, 128>}, {transform_indices = @transform_1, window_bounds = array<i64: 128, 128>}, {transform_indices = @transform_2, window_bounds = array<i64: 1, 128>}, {transform_indices = @transform_3, window_bounds = array<i64: 16, 128>}]} {
    %c0_i32 = arith.constant 0 : i32
    %0 = arith.cmpi eq, %arg2, %c0_i32 : i32
    %1 = arith.extui %0 : i1 to i32
    %c0_i32_0 = arith.constant 0 : i32
    %2 = arith.cmpi ne, %1, %c0_i32_0 : i32
    scf.if %2 {
      %cst_10 = arith.constant 0.000000e+00 : f32
      %12 = vector.broadcast %cst_10 : f32 to vector<16x128xf32>
      %c0_11 = arith.constant 0 : index
      %c0_12 = arith.constant 0 : index
      %13 = vector.load %arg7[%c0_11, %c0_12] : memref<16x128xf32, #tpu.memory_space<vmem>>, vector<16x128xf32>
      tpu.vector_store %arg7[%c0_11, %c0_12], %12 {strides = array<i32>} : memref<16x128xf32, #tpu.memory_space<vmem>>, vector<16x128xf32>,
    } else {
    }
    %c0 = arith.constant 0 : index
    %c0_1 = arith.constant 0 : index
    %3 = vector.load %arg7[%c0, %c0_1] : memref<16x128xf32, #tpu.memory_space<vmem>>, vector<16x128xf32>
    %c0_2 = arith.constant 0 : index
    %c0_3 = arith.constant 0 : index
    %4 = vector.load %arg3[%c0_2, %c0_3] : memref<16x128xf32, #tpu.memory_space<vmem>>, vector<16x128xf32>
    %c0_4 = arith.constant 0 : index
    %c0_5 = arith.constant 0 : index
    %5 = vector.load %arg4[%c0_4, %c0_5] : memref<128x128xf32, #tpu.memory_space<vmem>>, vector<128x128xf32>
    %cst = arith.constant dense<0.000000e+00> : vector<16x128xf32>
    %6 = tpu.matmul %4, %5, %cst {dimension_numbers = #tpu.dot_dimension_numbers<[1], [0], [0], [1], [0, 0, 1, 1], [], []>} : vector<16x128xf32>, vector<128x128xf32>, vector<16x128xf32> -> vector<16x128xf32>
    %7 = arith.addf %3, %6 : vector<16x128xf32>
    %c0_6 = arith.constant 0 : index
    %c0_7 = arith.constant 0 : index
    %8 = vector.load %arg7[%c0_6, %c0_7] : memref<16x128xf32, #tpu.memory_space<vmem>>, vector<16x128xf32>
    tpu.vector_store %arg7[%c0_6, %c0_7], %7 {strides = array<i32>} : memref<16x128xf32, #tpu.memory_space<vmem>>, vector<16x128xf32>,
    %c0_i32_8 = arith.constant 0 : i32
    %9 = arith.cmpi eq, %arg2, %c0_i32_8 : i32
    %10 = arith.extui %9 : i1 to i32
    %c0_i32_9 = arith.constant 0 : i32
    %11 = arith.cmpi ne, %10, %c0_i32_9 : i32
    scf.if %11 {
      %c0_10 = arith.constant 0 : index
      %c0_11 = arith.constant 0 : index
      %12 = vector.load %arg7[%c0_10, %c0_11] : memref<16x128xf32, #tpu.memory_space<vmem>>, vector<16x128xf32>
      %c0_12 = arith.constant 0 : index
      %c0_13 = arith.constant 0 : index
      %13 = vector.load %arg5[%c0_12, %c0_13] : memref<1x128xf32, #tpu.memory_space<vmem>>, vector<1x128xf32>
      %14 = vector.broadcast %13 : vector<1x128xf32> to vector<16x128xf32>
      %15 = arith.addf %12, %14 : vector<16x128xf32>
      %c0_14 = arith.constant 0 : index
      %c0_15 = arith.constant 0 : index
      %16 = vector.load %arg6[%c0_14, %c0_15] : memref<16x128xf32, #tpu.memory_space<vmem>>, vector<16x128xf32>
      tpu.vector_store %arg6[%c0_14, %c0_15], %15 {strides = array<i32>} : memref<16x128xf32, #tpu.memory_space<vmem>>, vector<16x128xf32>,
    } else {
    }
    return
  }
  func.func @transform_0(%arg0: i32, %arg1: i32, %arg2: i32) -> (i32, i32) {
    %c0_i32 = arith.constant 0 : i32
    return %arg0, %arg2 : i32, i32
  }
  func.func @transform_1(%arg0: i32, %arg1: i32, %arg2: i32) -> (i32, i32) {
    %c0_i32 = arith.constant 0 : i32
    return %arg2, %arg1 : i32, i32
  }
  func.func @transform_2(%arg0: i32, %arg1: i32, %arg2: i32) -> (i32, i32) {
    %c0_i32 = arith.constant 0 : i32
    %c0_i32_0 = arith.constant 0 : i32
    return %c0_i32, %arg1 : i32, i32
  }
  func.func @transform_3(%arg0: i32, %arg1: i32, %arg2: i32) -> (i32, i32) {
    %c0_i32 = arith.constant 0 : i32
    return %arg0, %arg1 : i32, i32
  }
}

module attributes {stable_mosaic.version = 11 : i64} {
  func.func @_matmul_res_ln_kernel(%arg0: i32, %arg1: i32, %arg2: memref<16x512xf32, #tpu.memory_space<vmem>>, %arg3: memref<512x128xf32, #tpu.memory_space<vmem>>, %arg4: memref<1x128xf32, #tpu.memory_space<vmem>>, %arg5: memref<16x128xf32, #tpu.memory_space<vmem>>, %arg6: memref<1x128xf32, #tpu.memory_space<vmem>>, %arg7: memref<1x128xf32, #tpu.memory_space<vmem>>, %arg8: memref<16x128xf32, #tpu.memory_space<vmem>>, %arg9: memref<16x128xf32, #tpu.memory_space<vmem>>) attributes {dimension_semantics = [#tpu.dimension_semantics<parallel>, #tpu.dimension_semantics<arbitrary>], iteration_bounds = array<i64: 1, 1>, scalar_prefetch = 0 : i64, scratch_operands = 1 : i64, tpu.core_type = #tpu.core_type<tc>, window_params = [{transform_indices = @transform_0, window_bounds = array<i64: 16, 512>}, {transform_indices = @transform_1, window_bounds = array<i64: 512, 128>}, {pipeline_mode = #tpu.pipeline_mode<synchronous>, transform_indices = @transform_2, window_bounds = array<i64: 1, 128>}, {transform_indices = @transform_3, window_bounds = array<i64: 16, 128>}, {pipeline_mode = #tpu.pipeline_mode<synchronous>, transform_indices = @transform_4, window_bounds = array<i64: 1, 128>}, {pipeline_mode = #tpu.pipeline_mode<synchronous>, transform_indices = @transform_5, window_bounds = array<i64: 1, 128>}, {transform_indices = @transform_6, window_bounds = array<i64: 16, 128>}]} {
    %c0_i32 = arith.constant 0 : i32
    %0 = arith.cmpi eq, %arg1, %c0_i32 : i32
    %1 = arith.extui %0 : i1 to i32
    %c0_i32_0 = arith.constant 0 : i32
    %2 = arith.cmpi ne, %1, %c0_i32_0 : i32
    scf.if %2 {
      %cst_10 = arith.constant 0.000000e+00 : f32
      %12 = vector.broadcast %cst_10 : f32 to vector<16x128xf32>
      %c0_11 = arith.constant 0 : index
      %c0_12 = arith.constant 0 : index
      %13 = vector.load %arg9[%c0_11, %c0_12] : memref<16x128xf32, #tpu.memory_space<vmem>>, vector<16x128xf32>
      tpu.vector_store %arg9[%c0_11, %c0_12], %12 {strides = array<i32>} : memref<16x128xf32, #tpu.memory_space<vmem>>, vector<16x128xf32>,
    } else {
    }
    %c0 = arith.constant 0 : index
    %c0_1 = arith.constant 0 : index
    %3 = vector.load %arg9[%c0, %c0_1] : memref<16x128xf32, #tpu.memory_space<vmem>>, vector<16x128xf32>
    %c0_2 = arith.constant 0 : index
    %c0_3 = arith.constant 0 : index
    %4 = vector.load %arg2[%c0_2, %c0_3] : memref<16x512xf32, #tpu.memory_space<vmem>>, vector<16x512xf32>
    %c0_4 = arith.constant 0 : index
    %c0_5 = arith.constant 0 : index
    %5 = vector.load %arg3[%c0_4, %c0_5] : memref<512x128xf32, #tpu.memory_space<vmem>>, vector<512x128xf32>
    %cst = arith.constant dense<0.000000e+00> : vector<16x128xf32>
    %6 = tpu.matmul %4, %5, %cst {dimension_numbers = #tpu.dot_dimension_numbers<[1], [0], [0], [1], [0, 0, 1, 1], [], []>} : vector<16x512xf32>, vector<512x128xf32>, vector<16x128xf32> -> vector<16x128xf32>
    %7 = arith.addf %3, %6 : vector<16x128xf32>
    %c0_6 = arith.constant 0 : index
    %c0_7 = arith.constant 0 : index
    %8 = vector.load %arg9[%c0_6, %c0_7] : memref<16x128xf32, #tpu.memory_space<vmem>>, vector<16x128xf32>
    tpu.vector_store %arg9[%c0_6, %c0_7], %7 {strides = array<i32>} : memref<16x128xf32, #tpu.memory_space<vmem>>, vector<16x128xf32>,
    %c0_i32_8 = arith.constant 0 : i32
    %9 = arith.cmpi eq, %arg1, %c0_i32_8 : i32
    %10 = arith.extui %9 : i1 to i32
    %c0_i32_9 = arith.constant 0 : i32
    %11 = arith.cmpi ne, %10, %c0_i32_9 : i32
    scf.if %11 {
      %c0_10 = arith.constant 0 : index
      %c0_11 = arith.constant 0 : index
      %12 = vector.load %arg9[%c0_10, %c0_11] : memref<16x128xf32, #tpu.memory_space<vmem>>, vector<16x128xf32>
      %c0_12 = arith.constant 0 : index
      %c0_13 = arith.constant 0 : index
      %13 = vector.load %arg4[%c0_12, %c0_13] : memref<1x128xf32, #tpu.memory_space<vmem>>, vector<1x128xf32>
      %14 = vector.broadcast %13 : vector<1x128xf32> to vector<16x128xf32>
      %15 = arith.addf %12, %14 : vector<16x128xf32>
      %c0_14 = arith.constant 0 : index
      %c0_15 = arith.constant 0 : index
      %16 = vector.load %arg5[%c0_14, %c0_15] : memref<16x128xf32, #tpu.memory_space<vmem>>, vector<16x128xf32>
      %17 = arith.addf %15, %16 : vector<16x128xf32>
      %cst_16 = arith.constant dense<0.000000e+00> : vector<16xf32>
      %18 = vector.multi_reduction <add>, %17, %cst_16 [1] : vector<16x128xf32> to vector<16xf32>
      %19 = vector.shape_cast %18 : vector<16xf32> to vector<16x1xf32>
      %cst_17 = arith.constant 1.280000e+02 : f32
      %20 = vector.broadcast %cst_17 : f32 to vector<16x1xf32>
      %21 = arith.divf %19, %20 : vector<16x1xf32>
      %22 = vector.broadcast %21 : vector<16x1xf32> to vector<16x128xf32>
      %23 = arith.subf %17, %22 : vector<16x128xf32>
      %24 = arith.mulf %23, %23 : vector<16x128xf32>
      %cst_18 = arith.constant dense<0.000000e+00> : vector<16xf32>
      %25 = vector.multi_reduction <add>, %24, %cst_18 [1] : vector<16x128xf32> to vector<16xf32>
      %26 = vector.shape_cast %25 : vector<16xf32> to vector<16x1xf32>
      %cst_19 = arith.constant 1.280000e+02 : f32
      %27 = vector.broadcast %cst_19 : f32 to vector<16x1xf32>
      %28 = arith.divf %26, %27 : vector<16x1xf32>
      %29 = vector.broadcast %21 : vector<16x1xf32> to vector<16x128xf32>
      %30 = arith.subf %17, %29 : vector<16x128xf32>
      %cst_20 = arith.constant 9.99999974E-6 : f32
      %31 = vector.broadcast %cst_20 : f32 to vector<16x1xf32>
      %32 = arith.addf %28, %31 : vector<16x1xf32>
      %33 = math.rsqrt %32 : vector<16x1xf32>
      %34 = vector.broadcast %33 : vector<16x1xf32> to vector<16x128xf32>
      %35 = arith.mulf %30, %34 : vector<16x128xf32>
      %c0_21 = arith.constant 0 : index
      %c0_22 = arith.constant 0 : index
      %36 = vector.load %arg6[%c0_21, %c0_22] : memref<1x128xf32, #tpu.memory_space<vmem>>, vector<1x128xf32>
      %37 = vector.broadcast %36 : vector<1x128xf32> to vector<16x128xf32>
      %38 = arith.mulf %35, %37 : vector<16x128xf32>
      %c0_23 = arith.constant 0 : index
      %c0_24 = arith.constant 0 : index
      %39 = vector.load %arg7[%c0_23, %c0_24] : memref<1x128xf32, #tpu.memory_space<vmem>>, vector<1x128xf32>
      %40 = vector.broadcast %39 : vector<1x128xf32> to vector<16x128xf32>
      %41 = arith.addf %38, %40 : vector<16x128xf32>
      %c0_25 = arith.constant 0 : index
      %c0_26 = arith.constant 0 : index
      %42 = vector.load %arg8[%c0_25, %c0_26] : memref<16x128xf32, #tpu.memory_space<vmem>>, vector<16x128xf32>
      tpu.vector_store %arg8[%c0_25, %c0_26], %41 {strides = array<i32>} : memref<16x128xf32, #tpu.memory_space<vmem>>, vector<16x128xf32>,
    } else {
    }
    return
  }
  func.func @transform_0(%arg0: i32, %arg1: i32) -> (i32, i32) {
    %c0_i32 = arith.constant 0 : i32
    return %arg0, %arg1 : i32, i32
  }
  func.func @transform_1(%arg0: i32, %arg1: i32) -> (i32, i32) {
    %c0_i32 = arith.constant 0 : i32
    %c0_i32_0 = arith.constant 0 : i32
    return %arg1, %c0_i32 : i32, i32
  }
  func.func @transform_2(%arg0: i32, %arg1: i32) -> (i32, i32) {
    %c0_i32 = arith.constant 0 : i32
    %c0_i32_0 = arith.constant 0 : i32
    %c0_i32_1 = arith.constant 0 : i32
    return %c0_i32, %c0_i32_0 : i32, i32
  }
  func.func @transform_3(%arg0: i32, %arg1: i32) -> (i32, i32) {
    %c0_i32 = arith.constant 0 : i32
    %c0_i32_0 = arith.constant 0 : i32
    return %arg0, %c0_i32 : i32, i32
  }
  func.func @transform_4(%arg0: i32, %arg1: i32) -> (i32, i32) {
    %c0_i32 = arith.constant 0 : i32
    %c0_i32_0 = arith.constant 0 : i32
    %c0_i32_1 = arith.constant 0 : i32
    return %c0_i32, %c0_i32_0 : i32, i32
  }
  func.func @transform_5(%arg0: i32, %arg1: i32) -> (i32, i32) {
    %c0_i32 = arith.constant 0 : i32
    %c0_i32_0 = arith.constant 0 : i32
    %c0_i32_1 = arith.constant 0 : i32
    return %c0_i32, %c0_i32_0 : i32, i32
  }
  func.func @transform_6(%arg0: i32, %arg1: i32) -> (i32, i32) {
    %c0_i32 = arith.constant 0 : i32
    %c0_i32_0 = arith.constant 0 : i32
    return %arg0, %c0_i32 : i32, i32
  }
}

module attributes {stable_mosaic.version = 11 : i64} {
  func.func @_ln_kernel(%arg0: i32, %arg1: memref<16x128xf32, #tpu.memory_space<vmem>>, %arg2: memref<1x128xf32, #tpu.memory_space<vmem>>, %arg3: memref<1x128xf32, #tpu.memory_space<vmem>>, %arg4: memref<16x128xf32, #tpu.memory_space<vmem>>) attributes {dimension_semantics = [#tpu.dimension_semantics<parallel>], iteration_bounds = array<i64: 1>, scalar_prefetch = 0 : i64, scratch_operands = 0 : i64, tpu.core_type = #tpu.core_type<tc>, window_params = [{transform_indices = @transform_0, window_bounds = array<i64: 16, 128>}, {pipeline_mode = #tpu.pipeline_mode<synchronous>, transform_indices = @transform_1, window_bounds = array<i64: 1, 128>}, {pipeline_mode = #tpu.pipeline_mode<synchronous>, transform_indices = @transform_2, window_bounds = array<i64: 1, 128>}, {transform_indices = @transform_3, window_bounds = array<i64: 16, 128>}]} {
    %c0 = arith.constant 0 : index
    %c0_0 = arith.constant 0 : index
    %0 = vector.load %arg1[%c0, %c0_0] : memref<16x128xf32, #tpu.memory_space<vmem>>, vector<16x128xf32>
    %cst = arith.constant dense<0.000000e+00> : vector<16xf32>
    %1 = vector.multi_reduction <add>, %0, %cst [1] : vector<16x128xf32> to vector<16xf32>
    %2 = vector.shape_cast %1 : vector<16xf32> to vector<16x1xf32>
    %cst_1 = arith.constant 1.280000e+02 : f32
    %3 = vector.broadcast %cst_1 : f32 to vector<16x1xf32>
    %4 = arith.divf %2, %3 : vector<16x1xf32>
    %5 = vector.broadcast %4 : vector<16x1xf32> to vector<16x128xf32>
    %6 = arith.subf %0, %5 : vector<16x128xf32>
    %7 = arith.mulf %6, %6 : vector<16x128xf32>
    %cst_2 = arith.constant dense<0.000000e+00> : vector<16xf32>
    %8 = vector.multi_reduction <add>, %7, %cst_2 [1] : vector<16x128xf32> to vector<16xf32>
    %9 = vector.shape_cast %8 : vector<16xf32> to vector<16x1xf32>
    %cst_3 = arith.constant 1.280000e+02 : f32
    %10 = vector.broadcast %cst_3 : f32 to vector<16x1xf32>
    %11 = arith.divf %9, %10 : vector<16x1xf32>
    %12 = vector.broadcast %4 : vector<16x1xf32> to vector<16x128xf32>
    %13 = arith.subf %0, %12 : vector<16x128xf32>
    %cst_4 = arith.constant 9.99999974E-6 : f32
    %14 = vector.broadcast %cst_4 : f32 to vector<16x1xf32>
    %15 = arith.addf %11, %14 : vector<16x1xf32>
    %16 = math.rsqrt %15 : vector<16x1xf32>
    %17 = vector.broadcast %16 : vector<16x1xf32> to vector<16x128xf32>
    %18 = arith.mulf %13, %17 : vector<16x128xf32>
    %c0_5 = arith.constant 0 : index
    %c0_6 = arith.constant 0 : index
    %19 = vector.load %arg2[%c0_5, %c0_6] : memref<1x128xf32, #tpu.memory_space<vmem>>, vector<1x128xf32>
    %20 = vector.broadcast %19 : vector<1x128xf32> to vector<16x128xf32>
    %21 = arith.mulf %18, %20 : vector<16x128xf32>
    %c0_7 = arith.constant 0 : index
    %c0_8 = arith.constant 0 : index
    %22 = vector.load %arg3[%c0_7, %c0_8] : memref<1x128xf32, #tpu.memory_space<vmem>>, vector<1x128xf32>
    %23 = vector.broadcast %22 : vector<1x128xf32> to vector<16x128xf32>
    %24 = arith.addf %21, %23 : vector<16x128xf32>
    %c0_9 = arith.constant 0 : index
    %c0_10 = arith.constant 0 : index
    %25 = vector.load %arg4[%c0_9, %c0_10] : memref<16x128xf32, #tpu.memory_space<vmem>>, vector<16x128xf32>
    tpu.vector_store %arg4[%c0_9, %c0_10], %24 {strides = array<i32>} : memref<16x128xf32, #tpu.memory_space<vmem>>, vector<16x128xf32>,
    return
  }
  func.func @transform_0(%arg0: i32) -> (i32, i32) {
    %c0_i32 = arith.constant 0 : i32
    %c0_i32_0 = arith.constant 0 : i32
    return %arg0, %c0_i32 : i32, i32
  }
  func.func @transform_1(%arg0: i32) -> (i32, i32) {
    %c0_i32 = arith.constant 0 : i32
    %c0_i32_0 = arith.constant 0 : i32
    %c0_i32_1 = arith.constant 0 : i32
    return %c0_i32, %c0_i32_0 : i32, i32
  }
  func.func @transform_2(%arg0: i32) -> (i32, i32) {
    %c0_i32 = arith.constant 0 : i32
    %c0_i32_0 = arith.constant 0 : i32
    %c0_i32_1 = arith.constant 0 : i32
    return %c0_i32, %c0_i32_0 : i32, i32
  }
  func.func @transform_3(%arg0: i32) -> (i32, i32) {
    %c0_i32 = arith.constant 0 : i32
    %c0_i32_0 = arith.constant 0 : i32
    return %arg0, %c0_i32 : i32, i32
  }
}

module attributes {stable_mosaic.version = 11 : i64} {
  func.func @_matmul_kernel(%arg0: i32, %arg1: i32, %arg2: i32, %arg3: memref<16x128xf32, #tpu.memory_space<vmem>>, %arg4: memref<128x128xf32, #tpu.memory_space<vmem>>, %arg5: memref<1x128xf32, #tpu.memory_space<vmem>>, %arg6: memref<16x128xf32, #tpu.memory_space<vmem>>, %arg7: memref<16x128xf32, #tpu.memory_space<vmem>>) attributes {dimension_semantics = [#tpu.dimension_semantics<parallel>, #tpu.dimension_semantics<parallel>, #tpu.dimension_semantics<arbitrary>], iteration_bounds = array<i64: 1, 1, 1>, scalar_prefetch = 0 : i64, scratch_operands = 1 : i64, tpu.core_type = #tpu.core_type<tc>, window_params = [{transform_indices = @transform_0, window_bounds = array<i64: 16, 128>}, {transform_indices = @transform_1, window_bounds = array<i64: 128, 128>}, {transform_indices = @transform_2, window_bounds = array<i64: 1, 128>}, {transform_indices = @transform_3, window_bounds = array<i64: 16, 128>}]} {
    %c0_i32 = arith.constant 0 : i32
    %0 = arith.cmpi eq, %arg2, %c0_i32 : i32
    %1 = arith.extui %0 : i1 to i32
    %c0_i32_0 = arith.constant 0 : i32
    %2 = arith.cmpi ne, %1, %c0_i32_0 : i32
    scf.if %2 {
      %cst_10 = arith.constant 0.000000e+00 : f32
      %12 = vector.broadcast %cst_10 : f32 to vector<16x128xf32>
      %c0_11 = arith.constant 0 : index
      %c0_12 = arith.constant 0 : index
      %13 = vector.load %arg7[%c0_11, %c0_12] : memref<16x128xf32, #tpu.memory_space<vmem>>, vector<16x128xf32>
      tpu.vector_store %arg7[%c0_11, %c0_12], %12 {strides = array<i32>} : memref<16x128xf32, #tpu.memory_space<vmem>>, vector<16x128xf32>,
    } else {
    }
    %c0 = arith.constant 0 : index
    %c0_1 = arith.constant 0 : index
    %3 = vector.load %arg7[%c0, %c0_1] : memref<16x128xf32, #tpu.memory_space<vmem>>, vector<16x128xf32>
    %c0_2 = arith.constant 0 : index
    %c0_3 = arith.constant 0 : index
    %4 = vector.load %arg3[%c0_2, %c0_3] : memref<16x128xf32, #tpu.memory_space<vmem>>, vector<16x128xf32>
    %c0_4 = arith.constant 0 : index
    %c0_5 = arith.constant 0 : index
    %5 = vector.load %arg4[%c0_4, %c0_5] : memref<128x128xf32, #tpu.memory_space<vmem>>, vector<128x128xf32>
    %cst = arith.constant dense<0.000000e+00> : vector<16x128xf32>
    %6 = tpu.matmul %4, %5, %cst {dimension_numbers = #tpu.dot_dimension_numbers<[1], [0], [0], [1], [0, 0, 1, 1], [], []>} : vector<16x128xf32>, vector<128x128xf32>, vector<16x128xf32> -> vector<16x128xf32>
    %7 = arith.addf %3, %6 : vector<16x128xf32>
    %c0_6 = arith.constant 0 : index
    %c0_7 = arith.constant 0 : index
    %8 = vector.load %arg7[%c0_6, %c0_7] : memref<16x128xf32, #tpu.memory_space<vmem>>, vector<16x128xf32>
    tpu.vector_store %arg7[%c0_6, %c0_7], %7 {strides = array<i32>} : memref<16x128xf32, #tpu.memory_space<vmem>>, vector<16x128xf32>,
    %c0_i32_8 = arith.constant 0 : i32
    %9 = arith.cmpi eq, %arg2, %c0_i32_8 : i32
    %10 = arith.extui %9 : i1 to i32
    %c0_i32_9 = arith.constant 0 : i32
    %11 = arith.cmpi ne, %10, %c0_i32_9 : i32
    scf.if %11 {
      %c0_10 = arith.constant 0 : index
      %c0_11 = arith.constant 0 : index
      %12 = vector.load %arg7[%c0_10, %c0_11] : memref<16x128xf32, #tpu.memory_space<vmem>>, vector<16x128xf32>
      %c0_12 = arith.constant 0 : index
      %c0_13 = arith.constant 0 : index
      %13 = vector.load %arg5[%c0_12, %c0_13] : memref<1x128xf32, #tpu.memory_space<vmem>>, vector<1x128xf32>
      %14 = vector.broadcast %13 : vector<1x128xf32> to vector<16x128xf32>
      %15 = arith.addf %12, %14 : vector<16x128xf32>
      %16 = arith.mulf %15, %15 : vector<16x128xf32>
      %17 = arith.mulf %15, %16 : vector<16x128xf32>
      %cst_14 = arith.constant 4.471500e-02 : f32
      %18 = vector.broadcast %cst_14 : f32 to vector<16x128xf32>
      %19 = arith.mulf %18, %17 : vector<16x128xf32>
      %20 = arith.addf %15, %19 : vector<16x128xf32>
      %cst_15 = arith.constant 0.797884583 : f32
      %21 = vector.broadcast %cst_15 : f32 to vector<16x128xf32>
      %22 = arith.mulf %21, %20 : vector<16x128xf32>
      %23 = math.tanh %22 : vector<16x128xf32>
      %cst_16 = arith.constant 1.000000e+00 : f32
      %24 = vector.broadcast %cst_16 : f32 to vector<16x128xf32>
      %25 = arith.addf %24, %23 : vector<16x128xf32>
      %cst_17 = arith.constant 5.000000e-01 : f32
      %26 = vector.broadcast %cst_17 : f32 to vector<16x128xf32>
      %27 = arith.mulf %26, %25 : vector<16x128xf32>
      %28 = arith.mulf %15, %27 : vector<16x128xf32>
      %c0_18 = arith.constant 0 : index
      %c0_19 = arith.constant 0 : index
      %29 = vector.load %arg6[%c0_18, %c0_19] : memref<16x128xf32, #tpu.memory_space<vmem>>, vector<16x128xf32>
      tpu.vector_store %arg6[%c0_18, %c0_19], %28 {strides = array<i32>} : memref<16x128xf32, #tpu.memory_space<vmem>>, vector<16x128xf32>,
    } else {
    }
    return
  }
  func.func @transform_0(%arg0: i32, %arg1: i32, %arg2: i32) -> (i32, i32) {
    %c0_i32 = arith.constant 0 : i32
    return %arg0, %arg2 : i32, i32
  }
  func.func @transform_1(%arg0: i32, %arg1: i32, %arg2: i32) -> (i32, i32) {
    %c0_i32 = arith.constant 0 : i32
    return %arg2, %arg1 : i32, i32
  }
  func.func @transform_2(%arg0: i32, %arg1: i32, %arg2: i32) -> (i32, i32) {
    %c0_i32 = arith.constant 0 : i32
    %c0_i32_0 = arith.constant 0 : i32
    return %c0_i32, %arg1 : i32, i32
  }
  func.func @transform_3(%arg0: i32, %arg1: i32, %arg2: i32) -> (i32, i32) {
    %c0_i32 = arith.constant 0 : i32
    return %arg0, %arg1 : i32, i32
  }
}

module attributes {stable_mosaic.version = 11 : i64} {
  func.func @_matmul_kernel(%arg0: i32, %arg1: i32, %arg2: i32, %arg3: memref<16x128xf32, #tpu.memory_space<vmem>>, %arg4: memref<128x512xf32, #tpu.memory_space<vmem>>, %arg5: memref<1x512xf32, #tpu.memory_space<vmem>>, %arg6: memref<16x512xf32, #tpu.memory_space<vmem>>, %arg7: memref<16x512xf32, #tpu.memory_space<vmem>>) attributes {dimension_semantics = [#tpu.dimension_semantics<parallel>, #tpu.dimension_semantics<parallel>, #tpu.dimension_semantics<arbitrary>], iteration_bounds = array<i64: 1, 1, 1>, scalar_prefetch = 0 : i64, scratch_operands = 1 : i64, tpu.core_type = #tpu.core_type<tc>, window_params = [{transform_indices = @transform_0, window_bounds = array<i64: 16, 128>}, {transform_indices = @transform_1, window_bounds = array<i64: 128, 512>}, {transform_indices = @transform_2, window_bounds = array<i64: 1, 512>}, {transform_indices = @transform_3, window_bounds = array<i64: 16, 512>}]} {
    %c0_i32 = arith.constant 0 : i32
    %0 = arith.cmpi eq, %arg2, %c0_i32 : i32
    %1 = arith.extui %0 : i1 to i32
    %c0_i32_0 = arith.constant 0 : i32
    %2 = arith.cmpi ne, %1, %c0_i32_0 : i32
    scf.if %2 {
      %cst_10 = arith.constant 0.000000e+00 : f32
      %12 = vector.broadcast %cst_10 : f32 to vector<16x512xf32>
      %c0_11 = arith.constant 0 : index
      %c0_12 = arith.constant 0 : index
      %13 = vector.load %arg7[%c0_11, %c0_12] : memref<16x512xf32, #tpu.memory_space<vmem>>, vector<16x512xf32>
      tpu.vector_store %arg7[%c0_11, %c0_12], %12 {strides = array<i32>} : memref<16x512xf32, #tpu.memory_space<vmem>>, vector<16x512xf32>,
    } else {
    }
    %c0 = arith.constant 0 : index
    %c0_1 = arith.constant 0 : index
    %3 = vector.load %arg7[%c0, %c0_1] : memref<16x512xf32, #tpu.memory_space<vmem>>, vector<16x512xf32>
    %c0_2 = arith.constant 0 : index
    %c0_3 = arith.constant 0 : index
    %4 = vector.load %arg3[%c0_2, %c0_3] : memref<16x128xf32, #tpu.memory_space<vmem>>, vector<16x128xf32>
    %c0_4 = arith.constant 0 : index
    %c0_5 = arith.constant 0 : index
    %5 = vector.load %arg4[%c0_4, %c0_5] : memref<128x512xf32, #tpu.memory_space<vmem>>, vector<128x512xf32>
    %cst = arith.constant dense<0.000000e+00> : vector<16x512xf32>
    %6 = tpu.matmul %4, %5, %cst {dimension_numbers = #tpu.dot_dimension_numbers<[1], [0], [0], [1], [0, 0, 1, 1], [], []>} : vector<16x128xf32>, vector<128x512xf32>, vector<16x512xf32> -> vector<16x512xf32>
    %7 = arith.addf %3, %6 : vector<16x512xf32>
    %c0_6 = arith.constant 0 : index
    %c0_7 = arith.constant 0 : index
    %8 = vector.load %arg7[%c0_6, %c0_7] : memref<16x512xf32, #tpu.memory_space<vmem>>, vector<16x512xf32>
    tpu.vector_store %arg7[%c0_6, %c0_7], %7 {strides = array<i32>} : memref<16x512xf32, #tpu.memory_space<vmem>>, vector<16x512xf32>,
    %c0_i32_8 = arith.constant 0 : i32
    %9 = arith.cmpi eq, %arg2, %c0_i32_8 : i32
    %10 = arith.extui %9 : i1 to i32
    %c0_i32_9 = arith.constant 0 : i32
    %11 = arith.cmpi ne, %10, %c0_i32_9 : i32
    scf.if %11 {
      %c0_10 = arith.constant 0 : index
      %c0_11 = arith.constant 0 : index
      %12 = vector.load %arg7[%c0_10, %c0_11] : memref<16x512xf32, #tpu.memory_space<vmem>>, vector<16x512xf32>
      %c0_12 = arith.constant 0 : index
      %c0_13 = arith.constant 0 : index
      %13 = vector.load %arg5[%c0_12, %c0_13] : memref<1x512xf32, #tpu.memory_space<vmem>>, vector<1x512xf32>
      %14 = vector.broadcast %13 : vector<1x512xf32> to vector<16x512xf32>
      %15 = arith.addf %12, %14 : vector<16x512xf32>
      %c0_14 = arith.constant 0 : index
      %c0_15 = arith.constant 0 : index
      %16 = vector.load %arg6[%c0_14, %c0_15] : memref<16x512xf32, #tpu.memory_space<vmem>>, vector<16x512xf32>
      tpu.vector_store %arg6[%c0_14, %c0_15], %15 {strides = array<i32>} : memref<16x512xf32, #tpu.memory_space<vmem>>, vector<16x512xf32>,
    } else {
    }
    return
  }
  func.func @transform_0(%arg0: i32, %arg1: i32, %arg2: i32) -> (i32, i32) {
    %c0_i32 = arith.constant 0 : i32
    return %arg0, %arg2 : i32, i32
  }
  func.func @transform_1(%arg0: i32, %arg1: i32, %arg2: i32) -> (i32, i32) {
    %c0_i32 = arith.constant 0 : i32
    return %arg2, %arg1 : i32, i32
  }
  func.func @transform_2(%arg0: i32, %arg1: i32, %arg2: i32) -> (i32, i32) {
    %c0_i32 = arith.constant 0 : i32
    %c0_i32_0 = arith.constant 0 : i32
    return %c0_i32, %arg1 : i32, i32
  }
  func.func @transform_3(%arg0: i32, %arg1: i32, %arg2: i32) -> (i32, i32) {
    %c0_i32 = arith.constant 0 : i32
    return %arg0, %arg1 : i32, i32
  }
}

module attributes {stable_mosaic.version = 11 : i64} {
  func.func @_xent_kernel(%arg0: i32, %arg1: memref<16x512xf32, #tpu.memory_space<vmem>>, %arg2: memref<16x1xi32, #tpu.memory_space<vmem>>, %arg3: memref<16x1xf32, #tpu.memory_space<vmem>>) attributes {dimension_semantics = [#tpu.dimension_semantics<parallel>], iteration_bounds = array<i64: 1>, scalar_prefetch = 0 : i64, scratch_operands = 0 : i64, tpu.core_type = #tpu.core_type<tc>, window_params = [{transform_indices = @transform_0, window_bounds = array<i64: 16, 512>}, {transform_indices = @transform_1, window_bounds = array<i64: 16, 1>}, {transform_indices = @transform_2, window_bounds = array<i64: 16, 1>}]} {
    %c0 = arith.constant 0 : index
    %c0_0 = arith.constant 0 : index
    %0 = vector.load %arg1[%c0, %c0_0] : memref<16x512xf32, #tpu.memory_space<vmem>>, vector<16x512xf32>
    %c0_1 = arith.constant 0 : index
    %c0_2 = arith.constant 0 : index
    %1 = vector.load %arg2[%c0_1, %c0_2] : memref<16x1xi32, #tpu.memory_space<vmem>>, vector<16x1xi32>
    %cst = arith.constant dense<0xFF800000> : vector<16xf32>
    %2 = vector.multi_reduction <maximumf>, %0, %cst [1] : vector<16x512xf32> to vector<16xf32>
    %3 = vector.shape_cast %2 : vector<16xf32> to vector<16x1xf32>
    %4 = vector.broadcast %3 : vector<16x1xf32> to vector<16x512xf32>
    %5 = arith.subf %0, %4 : vector<16x512xf32>
    %6 = math.exp %5 : vector<16x512xf32>
    %cst_3 = arith.constant dense<0.000000e+00> : vector<16xf32>
    %7 = vector.multi_reduction <add>, %6, %cst_3 [1] : vector<16x512xf32> to vector<16xf32>
    %8 = vector.shape_cast %7 : vector<16xf32> to vector<16x1xf32>
    %9 = math.log %8 : vector<16x1xf32>
    %10 = arith.addf %9, %3 : vector<16x1xf32>
    %11 = tpu.iota {dimensions = array<i32: 1>} : vector<16x512xi32>
    %12 = vector.broadcast %1 : vector<16x1xi32> to vector<16x512xi32>
    %13 = arith.cmpi eq, %11, %12 : vector<16x512xi32>
    %14 = arith.extui %13 : vector<16x512xi1> to vector<16x512xi32>
    %15 = arith.sitofp %14 : vector<16x512xi32> to vector<16x512xf32>
    %16 = arith.mulf %0, %15 : vector<16x512xf32>
    %cst_4 = arith.constant dense<0.000000e+00> : vector<16xf32>
    %17 = vector.multi_reduction <add>, %16, %cst_4 [1] : vector<16x512xf32> to vector<16xf32>
    %18 = vector.shape_cast %17 : vector<16xf32> to vector<16x1xf32>
    %c-100_i32 = arith.constant -100 : i32
    %19 = vector.broadcast %c-100_i32 : i32 to vector<16x1xi32>
    %20 = arith.cmpi ne, %1, %19 : vector<16x1xi32>
    %21 = arith.extui %20 : vector<16x1xi1> to vector<16x1xi32>
    %22 = arith.sitofp %21 : vector<16x1xi32> to vector<16x1xf32>
    %23 = arith.subf %10, %18 : vector<16x1xf32>
    %24 = arith.mulf %23, %22 : vector<16x1xf32>
    %c0_5 = arith.constant 0 : index
    %c0_6 = arith.constant 0 : index
    %25 = vector.load %arg3[%c0_5, %c0_6] : memref<16x1xf32, #tpu.memory_space<vmem>>, vector<16x1xf32>
    tpu.vector_store %arg3[%c0_5, %c0_6], %24 {strides = array<i32>} : memref<16x1xf32, #tpu.memory_space<vmem>>, vector<16x1xf32>,
    return
  }
  func.func @transform_0(%arg0: i32) -> (i32, i32) {
    %c0_i32 = arith.constant 0 : i32
    %c0_i32_0 = arith.constant 0 : i32
    return %arg0, %c0_i32 : i32, i32
  }
  func.func @transform_1(%arg0: i32) -> (i32, i32) {
    %c0_i32 = arith.constant 0 : i32
    %c0_i32_0 = arith.constant 0 : i32
    return %arg0, %c0_i32 : i32, i32
  }
  func.func @transform_2(%arg0: i32) -> (i32, i32) {
    %c0_i32 = arith.constant 0 : i32
    %c0_i32_0 = arith.constant 0 : i32
    return %arg0, %c0_i32 : i32, i32
  }
}

</mosaic_0001>

<bundles_post_ra>
// kernel: text_decoder_forward.26
= control target key start
LH: loop header
LB: loop body
LE: loop exit
PB: predicated region body
PF: predicated region fallthrough
CT: control target
= control target key end

     0   :  { %s796_s15 = smov 0   ;;  %s852_s0 = inlined_call_operand.vmem [shape: f32[2,2,8,64], index: 0, kind: input, shape index: {}]   ;;  %s853_s1 = inlined_call_operand.vmem [shape: f32[2,2,8,64], index: 1, kind: input, shape index: {}]   ;;  %s854_s2 = inlined_call_operand.vmem [shape: f32[2,2,8,64], index: 2, kind: input, shape index: {}]   ;;  %s855_s3 = inlined_call_operand.vmem [shape: f32[2,8,8], index: 3, kind: input, shape index: {}]   ;;  %s856_s4 = inlined_call_operand.vmem [shape: f32[2,2,8,64], index: 4, kind: output, shape index: {}]  }
   0x1 LB: > { %s685_s16 = sadd.s32 4294967295, %s767_s15   ;;  %p689_p0 = scmp.ge.s32.totalorder %s767_s15, 1  ;;  %s767_s15 = sphi %s796_s15, %s14_s15  }
   0x2   : > { %p191_p1 = scmp.lt.s32.totalorder %s767_s15, 3 }
   0x4   : > { %p192_p2 = pnand %p689_p0, %p191_p1 }
   0x5   : > { %p231_p3 = scmp.lt.s32.totalorder (!%p192_p2), %s685_s16, 1 }
   0x6   : > { %195 = sbr.rel (%p192_p2) target bundleno = 1235 (0x4d3), region = 36 }
   0xb   : > { %v769_v0 = vmov 0.0   ;;  %vm770_vm0 = vmmov 0   ;;  %s858_s16 = smov (!%p231_p3, %s685_s16), 1  ;;  %vm259_vm1 = vcmask 523264   ;;  %vm338_vm2 = vcmask 64512  }
   0xc   : > { %723 = vmatprep.subr.mxu0 %v769_v0  ;;  %725 = vmatprep.mubr.msk.f32.mxu0 %vm770_vm0, %v769_v0  ;;  %s806_s17 = sshll.u32 %s858_s16, 4  ;;  %s696_s24 = sshll.u32 %s858_s16, 3 }
   0xd   : > { %728 = vmatprep.subr.mxu1 %v769_v0  ;;  %730 = vmatprep.mubr.msk.f32.mxu1 %vm770_vm0, %v769_v0  ;;  %s812_s20 = scalar_lea.vmem %s853_s1, %s806_s17  ;;  %s818_s23 = scalar_lea.vmem %s852_s0, %s806_s17 }
   0xe   : > { %v257_v1 = vld [vmem:[%s812_s20] sm:$0xff]  ;;  %s249_s27 = scalar_lea.vmem %s855_s3, %s696_s24  ;;  %s245_s30 = scalar_lea.vmem %s854_s2, %s806_s17  ;;  %v703_v18 = vld [vmem:[%s812_s20 + $0x8] sm:$0xff] }
   0xf   : > { %724 = vmatpush3.xpose.msk.msra.mxu0 %vm259_vm1, %v257_v1  ;;  %v256_v2 = vld [vmem:[%s818_s23] sm:$0xff]  ;;  %v704_v15 = vld [vmem:[%s245_s30 + $0x8] sm:$0xff]  ;;  %s254_s7 = scalar_lea.vmem %s856_s4, %s806_s17 }
  0x10   : > { %738 = vmatprep.subr.mxu0 %v769_v0  ;;  %v255_v4 = vld [vmem:[%s249_s27] sm:$0xff]  ;;  %v702_v20 = vld [vmem:[%s818_s23 + $0x8] sm:$0xff] }
  0x11   : > { %v258_v14 = vld [vmem:[%s245_s30] sm:$0xff] }
  0x12   : > { %726 = vmatmul.mubr.msk.f32.vlgmr.msra.gmra.mxu0 %vm259_vm1, %v256_v2  ;;  %729 = vmatpush3.msra.mxu1 %v258_v14 }
  0x13   : > { %740 = vmatprep.mubr.msk.f32.mxu0 %vm770_vm0, %v769_v0  ;;  %739 = vmatpush3.msra.mxu0 %v704_v15 }
  0x14   : > { %733 = vmatprep.subr.mxu1 %v769_v0 }
  0xd2   : > { %v332_v3 = vpop.f32.mrf.mxu0 }
  0xd3   : > { %v336_v5 = vmul.f32 0.125, %v332_v3 }
  0xd4   : > { %v727_v6 = vpop.f32.mrf.mxu0 }
  0xd5   : > { %v337_v7 = vadd.f32 %v336_v5, %v255_v4 }
  0xd7   : > { %v339_v8 = vsel %vm338_vm2, %v337_v7, -inf }
  0xd8   : > { %340 = vmax.xlane.f32.xlu0 %v339_v8 }
 0x161   : > { %v341_v9 = vpop.xlane.xlu0 %340 }
 0x162   : > { %v342_v10 = vsub.f32 %v337_v7, %v341_v9 }
 0x164   : > { %v343_v11 = vmul.f32 1.442695, %v342_v10 }
 0x166   : > { %753 = vpow2.f32 %v343_v11 }
 0x173   : > { %v754_v12 = vpop.eup %753 }
 0x174   : > { %v345_v13 = vsel %vm338_vm2, %v754_v12, 0.0 }
 0x175   : > { %346 = vadd.xlane.f32.xlu0 %v345_v13 }
 0x1fe   : > { %v347_v16 = vpop.xlane.xlu0 %346 }
 0x1ff   : > { %755 = vrcp.f32 %v347_v16 }
 0x20c   : > { %v756_v17 = vpop.eup %755 }
 0x20d   : > { %v349_v19 = vmul.f32 %v756_v17, %v754_v12 }
 0x20f   : > { %731 = vmatmul.mubr.msk.f32.vlgmr.msra.gmra.mxu1 %vm338_vm2, %v349_v19 }
 0x210   : > { %734 = vmatpush3.xpose.msk.msra.mxu1 %vm259_vm1, %v703_v18  ;;  %735 = vmatprep.mubr.msk.f32.mxu1 %vm770_vm0, %v769_v0 }
 0x213   : > { %736 = vmatmul.mubr.msk.f32.vlgmr.msra.gmra.mxu1 %vm259_vm1, %v702_v20 }
 0x2cf   : > { %v419_v21 = vpop.f32.mrf.mxu1 }
 0x2d0   : > { %423 = vst.msk [vmem:[%s254_s7] sm:$0xff] %vm259_vm1, %v419_v21 }
 0x2d1   : > { %v732_v22 = vpop.f32.mrf.mxu1 }
 0x2d3   : > { %v502_v23 = vpop.f32.mrf.mxu1 }
 0x2d4   : > { %v506_v24 = vmul.f32 0.125, %v502_v23 }
 0x2d5   : > { %v737_v25 = vpop.f32.mrf.mxu1 }
 0x2d6   : > { %v507_v26 = vadd.f32 %v506_v24, %v255_v4 }
 0x2d8   : > { %v508_v27 = vsel %vm338_vm2, %v507_v26, -inf }
 0x2d9   : > { %509 = vmax.xlane.f32.xlu1 %v508_v27 }
 0x362   : > { %v510_v28 = vpop.xlane.xlu1 %509 }
 0x363   : > { %v511_v29 = vsub.f32 %v507_v26, %v510_v28 }
 0x365   : > { %v512_v30 = vmul.f32 1.442695, %v511_v29 }
 0x367   : > { %757 = vpow2.f32 %v512_v30 }
 0x374   : > { %v758_v31 = vpop.eup %757 }
 0x375   : > { %v514_v32 = vsel %vm338_vm2, %v758_v31, 0.0 }
 0x376   : > { %515 = vadd.xlane.f32.xlu1 %v514_v32 }
 0x3ff   : > { %v516_v33 = vpop.xlane.xlu1 %515 }
 0x400   : > { %759 = vrcp.f32 %v516_v33 }
 0x40d   : > { %v760_v34 = vpop.eup %759 }
 0x40e   : > { %v518_v35 = vmul.f32 %v760_v34, %v758_v31 }
 0x410   : > { %741 = vmatmul.mubr.msk.f32.vlgmr.msra.gmra.mxu0 %vm338_vm2, %v518_v35 }
 0x4d0   : > { %v588_v36 = vpop.f32.mrf.mxu0 }
 0x4d1   : > { %708 = vst.msk [vmem:[%s254_s7 + $0x8] sm:$0xff] %vm259_vm1, %v588_v36 }
 0x4d2   : > { %v742_v37 = vpop.f32.mrf.mxu0 }
 0x4d3 PF: > { %s14_s15 = sadd.s32 1, %s767_s15  }
 0x4d4   : > { %p11_p4 = scmp.ge.s32.totalorder %s14_s15, 4  }
 0x4d6   :  { %13 = sbr.rel (!%p11_p4) target bundleno = 1 (0x1), region = 79 }

// kernel: text_decoder_forward.25
= control target key start
LH: loop header
LB: loop body
LE: loop exit
PB: predicated region body
PF: predicated region fallthrough
CT: control target
= control target key end

     0   :  { %v340_v3 = vmov 0.0   ;;  %v255_v51 = vlaneseq  ;;  %s534_s1 = inlined_call_operand.vmem [shape: f32[128,384], index: 1, kind: input, shape index: {}]   ;;  %s535_s0 = inlined_call_operand.vmem [shape: f32[16,128], index: 0, kind: input, shape index: {}]   ;;  %s536_s2 = inlined_call_operand.vmem [shape: f32[1,384], index: 2, kind: input, shape index: {}]   ;;  %s537_s3 = inlined_call_operand.vmem [shape: f32[16,384], index: 3, kind: output, shape index: {}]  }
   0x1   :  { %v78_v0 = vld [vmem:[%s534_s1 + $0x170] sm:$0xff]  ;;  %v77_v1 = vld [vmem:[%s534_s1 + $0x168] sm:$0xff]  ;;  %v75_v2 = vld [vmem:[%s534_s1 + $0x158] sm:$0xff]  ;;  %144 = vmatprep.mubr.f32.mxu0 %v340_v3 }
   0x2   :  { %80 = vmatprep.subr.mxu0 %v78_v0  ;;  %v79_v4 = vld [vmem:[%s534_s1 + $0x178] sm:$0xff]  ;;  %v74_v5 = vld [vmem:[%s534_s1 + $0x150] sm:$0xff]  ;;  %v72_v6 = vld [vmem:[%s534_s1 + $0x140] sm:$0xff]  ;;  %v256_v52 = vshrl.u32 %v255_v51, 7 }
   0x3   :  { %81 = vmatpush1.msra.mxu0 %v77_v1  ;;  %304 = vmatprep.subr.mxu1 %v79_v4  ;;  %v76_v7 = vld [vmem:[%s534_s1 + $0x160] sm:$0xff]  ;;  %v71_v8 = vld [vmem:[%s534_s1 + $0x138] sm:$0xff]  ;;  %v73_v9 = vld [vmem:[%s534_s1 + $0x148] sm:$0xff] }
   0x4   :  { %82 = vmatprep.subr.mxu0 %v75_v2  ;;  %305 = vmatpush3.msra.mxu1 %v79_v4  ;;  %v69_v10 = vld [vmem:[%s534_s1 + $0x128] sm:$0xff]  ;;  %v68_v11 = vld [vmem:[%s534_s1 + $0x120] sm:$0xff]  ;;  %v70_v12 = vld [vmem:[%s534_s1 + $0x130] sm:$0xff]  ;;  %v257_v53 = vsub.s32 0, %v256_v52  ;;  %v261_v55 = vsub.s32 1, %v256_v52  ;;  %v265_v56 = vsub.s32 2, %v256_v52 }
   0x5   :  { %83 = vmatpush1.msra.mxu0 %v74_v5  ;;  %306 = vmatprep.subr.mxu1 %v76_v7  ;;  %v66_v13 = vld [vmem:[%s534_s1 + $0x110] sm:$0xff]  ;;  %v65_v14 = vld [vmem:[%s534_s1 + $0x108] sm:$0xff]  ;;  %v67_v15 = vld [vmem:[%s534_s1 + $0x118] sm:$0xff] }
   0x6   :  { %84 = vmatprep.subr.mxu0 %v72_v6  ;;  %307 = vmatpush3.msra.mxu1 %v76_v7  ;;  %v63_v16 = vld [vmem:[%s534_s1 + $0xf8] sm:$0xff]  ;;  %v62_v17 = vld [vmem:[%s534_s1 + $0xf0] sm:$0xff]  ;;  %v64_v18 = vld [vmem:[%s534_s1 + $0x100] sm:$0xff] }
   0x7   :  { %85 = vmatpush1.msra.mxu0 %v71_v8  ;;  %308 = vmatprep.subr.mxu1 %v73_v9  ;;  %v60_v19 = vld [vmem:[%s534_s1 + $0xe0] sm:$0xff]  ;;  %v59_v20 = vld [vmem:[%s534_s1 + $0xd8] sm:$0xff]  ;;  %v61_v21 = vld [vmem:[%s534_s1 + $0xe8] sm:$0xff] }
   0x8   :  { %86 = vmatprep.subr.mxu0 %v69_v10  ;;  %309 = vmatpush3.msra.mxu1 %v73_v9  ;;  %v57_v22 = vld [vmem:[%s534_s1 + $0xc8] sm:$0xff]  ;;  %v56_v23 = vld [vmem:[%s534_s1 + $0xc0] sm:$0xff]  ;;  %v58_v24 = vld [vmem:[%s534_s1 + $0xd0] sm:$0xff] }
   0x9   :  { %87 = vmatpush1.msra.mxu0 %v68_v11  ;;  %310 = vmatprep.subr.mxu1 %v70_v12  ;;  %v54_v25 = vld [vmem:[%s534_s1 + $0xb0] sm:$0xff]  ;;  %v53_v26 = vld [vmem:[%s534_s1 + $0xa8] sm:$0xff]  ;;  %v55_v27 = vld [vmem:[%s534_s1 + $0xb8] sm:$0xff] }
   0xa   :  { %88 = vmatprep.subr.mxu0 %v66_v13  ;;  %311 = vmatpush3.msra.mxu1 %v70_v12  ;;  %v51_v28 = vld [vmem:[%s534_s1 + $0x98] sm:$0xff]  ;;  %v50_v29 = vld [vmem:[%s534_s1 + $0x90] sm:$0xff]  ;;  %v52_v30 = vld [vmem:[%s534_s1 + $0xa0] sm:$0xff] }
   0xb   :  { %89 = vmatpush1.msra.mxu0 %v65_v14  ;;  %312 = vmatprep.subr.mxu1 %v67_v15  ;;  %v48_v31 = vld [vmem:[%s534_s1 + $0x80] sm:$0xff]  ;;  %v47_v32 = vld [vmem:[%s534_s1 + $0x78] sm:$0xff]  ;;  %v49_v33 = vld [vmem:[%s534_s1 + $0x88] sm:$0xff] }
   0xc   :  { %90 = vmatprep.subr.mxu0 %v63_v16  ;;  %313 = vmatpush3.msra.mxu1 %v67_v15  ;;  %v45_v34 = vld [vmem:[%s534_s1 + $0x68] sm:$0xff]  ;;  %v44_v35 = vld [vmem:[%s534_s1 + $0x60] sm:$0xff]  ;;  %v46_v36 = vld [vmem:[%s534_s1 + $0x70] sm:$0xff] }
   0xd   :  { %91 = vmatpush1.msra.mxu0 %v62_v17  ;;  %314 = vmatprep.subr.mxu1 %v64_v18  ;;  %v42_v37 = vld [vmem:[%s534_s1 + $0x50] sm:$0xff]  ;;  %v41_v38 = vld [vmem:[%s534_s1 + $0x48] sm:$0xff]  ;;  %v43_v39 = vld [vmem:[%s534_s1 + $0x58] sm:$0xff] }
   0xe   :  { %92 = vmatprep.subr.mxu0 %v60_v19  ;;  %315 = vmatpush3.msra.mxu1 %v64_v18  ;;  %v39_v40 = vld [vmem:[%s534_s1 + $0x38] sm:$0xff]  ;;  %v38_v41 = vld [vmem:[%s534_s1 + $0x30] sm:$0xff]  ;;  %v40_v42 = vld [vmem:[%s534_s1 + $0x40] sm:$0xff] }
   0xf   :  { %93 = vmatpush1.msra.mxu0 %v59_v20  ;;  %316 = vmatprep.subr.mxu1 %v61_v21  ;;  %v36_v43 = vld [vmem:[%s534_s1 + $0x20] sm:$0xff]  ;;  %v35_v44 = vld [vmem:[%s534_s1 + $0x18] sm:$0xff]  ;;  %v37_v45 = vld [vmem:[%s534_s1 + $0x28] sm:$0xff] }
  0x10   :  { %94 = vmatprep.subr.mxu0 %v57_v22  ;;  %317 = vmatpush3.msra.mxu1 %v61_v21  ;;  %v33_v46 = vld [vmem:[%s534_s1 + $0x8] sm:$0xff]  ;;  %v32_v47 = vld [vmem:[%s534_s1] sm:$0xff]  ;;  %v34_v48 = vld [vmem:[%s534_s1 + $0x10] sm:$0xff] }
  0x11   :  { %95 = vmatpush1.msra.mxu0 %v56_v23  ;;  %318 = vmatprep.subr.mxu1 %v58_v24  ;;  %v30_v49 = vld [vmem:[%s535_s0] sm:$0xff]  ;;  %v31_v50 = vld [vmem:[%s535_s0 + $0x8] sm:$0xff] }
  0x12   :  { %96 = vmatprep.subr.mxu0 %v54_v25  ;;  %319 = vmatpush3.msra.mxu1 %v58_v24  ;;  %v253_v54 = vld [vmem:[%s536_s2] sm:$0x7] }
  0x13   :  { %97 = vmatpush1.msra.mxu0 %v53_v26  ;;  %320 = vmatprep.subr.mxu1 %v55_v27  ;;  %v258_v57 = vrot.slane %v253_v54, %v257_v53  ;;  %v262_v58 = vrot.slane %v253_v54, %v261_v55  ;;  %v266_v59 = vrot.slane %v253_v54, %v265_v56 }
  0x14   :  { %98 = vmatprep.subr.mxu0 %v51_v28  ;;  %321 = vmatpush3.msra.mxu1 %v55_v27 }
  0x15   :  { %99 = vmatpush1.msra.mxu0 %v50_v29  ;;  %322 = vmatprep.subr.mxu1 %v52_v30 }
  0x16   :  { %100 = vmatprep.subr.mxu0 %v48_v31  ;;  %323 = vmatpush3.msra.mxu1 %v52_v30 }
  0x17   :  { %101 = vmatpush1.msra.mxu0 %v47_v32  ;;  %324 = vmatprep.subr.mxu1 %v49_v33 }
  0x18   :  { %102 = vmatprep.subr.mxu0 %v45_v34  ;;  %325 = vmatpush3.msra.mxu1 %v49_v33 }
  0x19   :  { %103 = vmatpush1.msra.mxu0 %v44_v35  ;;  %326 = vmatprep.subr.mxu1 %v46_v36 }
  0x1a   :  { %104 = vmatprep.subr.mxu0 %v42_v37  ;;  %327 = vmatpush3.msra.mxu1 %v46_v36 }
  0x1b   :  { %105 = vmatpush1.msra.mxu0 %v41_v38  ;;  %328 = vmatprep.subr.mxu1 %v43_v39 }
  0x1c   :  { %106 = vmatprep.subr.mxu0 %v39_v40  ;;  %329 = vmatpush3.msra.mxu1 %v43_v39 }
  0x1d   :  { %107 = vmatpush1.msra.mxu0 %v38_v41  ;;  %330 = vmatprep.subr.mxu1 %v40_v42 }
  0x1e   :  { %108 = vmatprep.subr.mxu0 %v36_v43  ;;  %331 = vmatpush3.msra.mxu1 %v40_v42 }
  0x1f   :  { %109 = vmatpush1.msra.mxu0 %v35_v44  ;;  %332 = vmatprep.subr.mxu1 %v37_v45 }
  0x20   :  { %110 = vmatprep.subr.mxu0 %v33_v46  ;;  %333 = vmatpush3.msra.mxu1 %v37_v45 }
  0x21   :  { %111 = vmatpush1.msra.mxu0 %v32_v47  ;;  %334 = vmatprep.subr.mxu1 %v34_v48 }
  0x22   :  { %145 = vmatmul.mubr.f32.vlgmr.msra.gmra.mxu0 %v30_v49  ;;  %335 = vmatpush3.msra.mxu1 %v34_v48 }
  0x23   :  { %336 = vmatprep.mubr.f32.mxu1 %v30_v49  ;;  %150 = vmatprep.mubr.f32.mxu0 %v340_v3 }
  0x24   :  { %337 = vmatmul.mubr.f32.vlgmr.msra.gmra.mxu1 %v31_v50 }
  0x26   :  { %151 = vmatmul.mubr.f32.gmra.mxu0 %v31_v50 }
  0xe2   :  { %v146_v60 = vpop.f32.mrf.mxu0 }
  0xe3   :  { %v270_v61 = vadd.f32 %v258_v57, %v146_v60 }
  0xe4   :  { %v148_v62 = vpop.f32.mrf.mxu0  ;;  %v338_v63 = vpop.f32.mrf.mxu1 }
  0xe5   :  { %276 = vst [vmem:[%s537_s3] sm:$0xff] %v270_v61  ;;  %v271_v0 = vadd.f32 %v262_v58, %v148_v62  ;;  %v275_v1 = vadd.f32 %v338_v63, %v266_v59 }
  0xe6   :  { %v152_v2 = vpop.f32.mrf.mxu0  ;;  %v223_v3 = vpop.f32.mrf.mxu1 }
  0xe7   :  { %277 = vst [vmem:[%s537_s3 + $0x8] sm:$0xff] %v271_v0  ;;  %281 = vst [vmem:[%s537_s3 + $0x28] sm:$0xff] %v275_v1  ;;  %v273_v4 = vadd.f32 %v258_v57, %v152_v2  ;;  %v272_v5 = vadd.f32 %v266_v59, %v223_v3 }
  0xe8   :  { %v154_v6 = vpop.f32.mrf.mxu0 }
  0xe9   :  { %279 = vst [vmem:[%s537_s3 + $0x18] sm:$0xff] %v273_v4  ;;  %278 = vst [vmem:[%s537_s3 + $0x10] sm:$0xff] %v272_v5  ;;  %v274_v7 = vadd.f32 %v262_v58, %v154_v6 }
  0xeb   :  { %280 = vst [vmem:[%s537_s3 + $0x20] sm:$0xff] %v274_v7 }

// kernel: text_decoder_forward.23
= control target key start
LH: loop header
LB: loop body
LE: loop exit
PB: predicated region body
PF: predicated region fallthrough
CT: control target
= control target key end

     0   :  { %s146_s0 = inlined_call_operand.vmem [shape: f32[16,128], index: 0, kind: input, shape index: {}]   ;;  %s147_s1 = inlined_call_operand.vmem [shape: f32[16,128], index: 1, kind: input, shape index: {}]   ;;  %s148_s2 = inlined_call_operand.vmem [shape: f32[1,128], index: 2, kind: input, shape index: {}]   ;;  %s149_s3 = inlined_call_operand.vmem [shape: f32[1,128], index: 3, kind: input, shape index: {}]   ;;  %s150_s4 = inlined_call_operand.vmem [shape: f32[1,128], index: 4, kind: input, shape index: {}]   ;;  %s151_s5 = inlined_call_operand.vmem [shape: f32[16,128], index: 5, kind: output, shape index: {}]  }
   0x1   :  { %v20_v0 = vld [vmem:[%s146_s0] sm:$0xff]  ;;  %v21_v4 = vld [vmem:[%s146_s0 + $0x8] sm:$0xff] }
   0x2   :  { %v22_v1 = vld [vmem:[%s147_s1] sm:$0xff]  ;;  %v23_v5 = vld [vmem:[%s147_s1 + $0x8] sm:$0xff] }
   0x3   :  { %v82_v2 = vld [vmem:[%s148_s2] ss:$0 sm:$0xff]  ;;  %v24_v3 = vadd.f32 %v22_v1, %v20_v0  ;;  %v25_v6 = vadd.f32 %v23_v5, %v21_v4 }
   0x4   :  { %v83_v24 = vld [vmem:[%s149_s3] ss:$0 sm:$0xff] }
   0x5   :  { %v33_v7 = vadd.f32 %v82_v2, %v24_v3  ;;  %v34_v8 = vadd.f32 %v82_v2, %v25_v6  ;;  %v84_v26 = vld [vmem:[%s150_s4] ss:$0 sm:$0xff] }
   0x7   :  { %35 = vadd.xlane.f32.xlu0 %v33_v7 }
   0xb   :  { %37 = vadd.xlane.f32.xlu0 %v34_v8 }
  0x90   :  { %v36_v9 = vpop.xlane.xlu0 %35 }
  0x91   :  { %v40_v10 = vmul.f32 0.0078125, %v36_v9 }
  0x93   :  { %v42_v11 = vsub.f32 %v33_v7, %v40_v10 }
  0x94   :  { %v38_v12 = vpop.xlane.xlu0 %37 }
  0x95   :  { %v41_v13 = vmul.f32 0.0078125, %v38_v12  ;;  %v44_v14 = vmul.f32 %v42_v11, %v42_v11 }
  0x97   :  { %v43_v15 = vsub.f32 %v34_v8, %v41_v13  ;;  %46 = vadd.xlane.f32.xlu1 %v44_v14 }
  0x99   :  { %v45_v16 = vmul.f32 %v43_v15, %v43_v15 }
  0x9b   :  { %48 = vadd.xlane.f32.xlu1 %v45_v16 }
 0x120   :  { %v47_v17 = vpop.xlane.xlu1 %46 }
 0x121   :  { %v50_v18 = vmul.f32 0.0078125, %v47_v17 }
 0x123   :  { %v52_v19 = vadd.f32 1e-05, %v50_v18 }
 0x124   :  { %v49_v20 = vpop.xlane.xlu1 %48 }
 0x125   :  { %85 = vrsqrt.f32 %v52_v19  ;;  %v51_v21 = vmul.f32 0.0078125, %v49_v20 }
 0x127   :  { %v53_v22 = vadd.f32 1e-05, %v51_v21 }
 0x129   :  { %87 = vrsqrt.f32 %v53_v22 }
 0x132   :  { %v86_v23 = vpop.eup %85 }
 0x133   :  { %v56_v25 = vmul.f32 %v86_v23, %v42_v11 }
 0x135   :  { %v65_v27 = vmul.f32 %v83_v24, %v56_v25 }
 0x136   :  { %v88_v28 = vpop.eup %87 }
 0x137   :  { %v74_v29 = vadd.f32 %v84_v26, %v65_v27  ;;  %v57_v30 = vmul.f32 %v88_v28, %v43_v15 }
 0x139   :  { %76 = vst [vmem:[%s151_s5] sm:$0xff] %v74_v29  ;;  %v66_v31 = vmul.f32 %v83_v24, %v57_v30 }
 0x13b   :  { %v75_v32 = vadd.f32 %v84_v26, %v66_v31 }
 0x13d   :  { %77 = vst [vmem:[%s151_s5 + $0x8] sm:$0xff] %v75_v32 }

// kernel: text_decoder_forward.27
= control target key start
LH: loop header
LB: loop body
LE: loop exit
PB: predicated region body
PF: predicated region fallthrough
CT: control target
= control target key end

     0   :  { %s363_s1 = inlined_call_operand.vmem [shape: f32[128,128], index: 1, kind: input, shape index: {}]   ;;  %s364_s0 = inlined_call_operand.vmem [shape: f32[16,128], index: 0, kind: input, shape index: {}]   ;;  %s365_s2 = inlined_call_operand.vmem [shape: f32[1,128], index: 2, kind: input, shape index: {}]   ;;  %s366_s3 = inlined_call_operand.vmem [shape: f32[16,128], index: 3, kind: input, shape index: {}]   ;;  %s367_s4 = inlined_call_operand.vmem [shape: f32[1,128], index: 4, kind: input, shape index: {}]   ;;  %s368_s5 = inlined_call_operand.vmem [shape: f32[1,128], index: 5, kind: input, shape index: {}]   ;;  %s369_s6 = inlined_call_operand.vmem [shape: f32[16,128], index: 6, kind: output, shape index: {}]  }
   0x1   :  { %v48_v0 = vld [vmem:[%s363_s1 + $0x78] sm:$0xff]  ;;  %v47_v1 = vld [vmem:[%s363_s1 + $0x70] sm:$0xff]  ;;  %v46_v2 = vld [vmem:[%s363_s1 + $0x68] sm:$0xff] }
   0x2   :  { %214 = vmatprep.subr.mxu0 %v48_v0  ;;  %v45_v3 = vld [vmem:[%s363_s1 + $0x60] sm:$0xff]  ;;  %v44_v5 = vld [vmem:[%s363_s1 + $0x58] sm:$0xff]  ;;  %v43_v6 = vld [vmem:[%s363_s1 + $0x50] sm:$0xff] }
   0x3   :  { %215 = vmatpush3.msra.mxu0 %v48_v0  ;;  %v31_v4 = vld [vmem:[%s364_s0] sm:$0xff]  ;;  %v42_v7 = vld [vmem:[%s363_s1 + $0x48] sm:$0xff]  ;;  %v40_v9 = vld [vmem:[%s363_s1 + $0x38] sm:$0xff] }
   0x4   :  { %216 = vmatprep.subr.mxu0 %v47_v1  ;;  %246 = vmatprep.mubr.f32.mxu0 %v31_v4  ;;  %v41_v8 = vld [vmem:[%s363_s1 + $0x40] sm:$0xff]  ;;  %v39_v10 = vld [vmem:[%s363_s1 + $0x30] sm:$0xff]  ;;  %v38_v11 = vld [vmem:[%s363_s1 + $0x28] sm:$0xff] }
   0x5   :  { %217 = vmatpush3.msra.mxu0 %v47_v1  ;;  %v37_v12 = vld [vmem:[%s363_s1 + $0x20] sm:$0xff]  ;;  %v36_v13 = vld [vmem:[%s363_s1 + $0x18] sm:$0xff]  ;;  %v35_v14 = vld [vmem:[%s363_s1 + $0x10] sm:$0xff] }
   0x6   :  { %218 = vmatprep.subr.mxu0 %v46_v2  ;;  %v34_v15 = vld [vmem:[%s363_s1 + $0x8] sm:$0xff]  ;;  %v33_v16 = vld [vmem:[%s363_s1] sm:$0xff] }
   0x7   :  { %219 = vmatpush3.msra.mxu0 %v46_v2  ;;  %v32_v17 = vld [vmem:[%s364_s0 + $0x8] sm:$0xff]  ;;  %v193_v19 = vld [vmem:[%s365_s2] ss:$0 sm:$0xff] }
   0x8   :  { %220 = vmatprep.subr.mxu0 %v45_v3  ;;  %v142_v21 = vld [vmem:[%s366_s3] sm:$0xff]  ;;  %v143_v25 = vld [vmem:[%s366_s3 + $0x8] sm:$0xff] }
   0x9   :  { %221 = vmatpush3.msra.mxu0 %v45_v3  ;;  %v194_v42 = vld [vmem:[%s367_s4] ss:$0 sm:$0xff] }
   0xa   :  { %222 = vmatprep.subr.mxu0 %v44_v5  ;;  %v195_v44 = vld [vmem:[%s368_s5] ss:$0 sm:$0xff] }
   0xb   :  { %223 = vmatpush3.msra.mxu0 %v44_v5 }
   0xc   :  { %224 = vmatprep.subr.mxu0 %v43_v6 }
   0xd   :  { %225 = vmatpush3.msra.mxu0 %v43_v6 }
   0xe   :  { %226 = vmatprep.subr.mxu0 %v42_v7 }
   0xf   :  { %227 = vmatpush3.msra.mxu0 %v42_v7 }
  0x10   :  { %228 = vmatprep.subr.mxu0 %v41_v8 }
  0x11   :  { %229 = vmatpush3.msra.mxu0 %v41_v8 }
  0x12   :  { %230 = vmatprep.subr.mxu0 %v40_v9 }
  0x13   :  { %231 = vmatpush3.msra.mxu0 %v40_v9 }
  0x14   :  { %232 = vmatprep.subr.mxu0 %v39_v10 }
  0x15   :  { %233 = vmatpush3.msra.mxu0 %v39_v10 }
  0x16   :  { %234 = vmatprep.subr.mxu0 %v38_v11 }
  0x17   :  { %235 = vmatpush3.msra.mxu0 %v38_v11 }
  0x18   :  { %236 = vmatprep.subr.mxu0 %v37_v12 }
  0x19   :  { %237 = vmatpush3.msra.mxu0 %v37_v12 }
  0x1a   :  { %238 = vmatprep.subr.mxu0 %v36_v13 }
  0x1b   :  { %239 = vmatpush3.msra.mxu0 %v36_v13 }
  0x1c   :  { %240 = vmatprep.subr.mxu0 %v35_v14 }
  0x1d   :  { %241 = vmatpush3.msra.mxu0 %v35_v14 }
  0x1e   :  { %242 = vmatprep.subr.mxu0 %v34_v15 }
  0x1f   :  { %243 = vmatpush3.msra.mxu0 %v34_v15 }
  0x20   :  { %244 = vmatprep.subr.mxu0 %v33_v16 }
  0x21   :  { %245 = vmatpush3.msra.mxu0 %v33_v16 }
  0x22   :  { %247 = vmatmul.mubr.f32.vlgmr.msra.gmra.mxu0 %v32_v17 }
  0xe2   :  { %v248_v18 = vpop.f32.mrf.mxu0 }
  0xe3   :  { %v141_v23 = vadd.f32 %v248_v18, %v193_v19 }
  0xe4   :  { %v115_v20 = vpop.f32.mrf.mxu0 }
  0xe5   :  { %v140_v22 = vadd.f32 %v193_v19, %v115_v20  ;;  %v145_v26 = vadd.f32 %v143_v25, %v141_v23 }
  0xe7   :  { %v144_v24 = vadd.f32 %v142_v21, %v140_v22 }
  0xe9   :  { %146 = vadd.xlane.f32.xlu0 %v144_v24 }
  0xed   :  { %148 = vadd.xlane.f32.xlu0 %v145_v26 }
 0x172   :  { %v147_v27 = vpop.xlane.xlu0 %146 }
 0x173   :  { %v151_v28 = vmul.f32 0.0078125, %v147_v27 }
 0x175   :  { %v153_v29 = vsub.f32 %v144_v24, %v151_v28 }
 0x176   :  { %v149_v30 = vpop.xlane.xlu0 %148 }
 0x177   :  { %v152_v31 = vmul.f32 0.0078125, %v149_v30  ;;  %v155_v32 = vmul.f32 %v153_v29, %v153_v29 }
 0x179   :  { %v154_v33 = vsub.f32 %v145_v26, %v152_v31  ;;  %157 = vadd.xlane.f32.xlu1 %v155_v32 }
 0x17b   :  { %v156_v34 = vmul.f32 %v154_v33, %v154_v33 }
 0x17d   :  { %159 = vadd.xlane.f32.xlu1 %v156_v34 }
 0x202   :  { %v158_v35 = vpop.xlane.xlu1 %157 }
 0x203   :  { %v161_v36 = vmul.f32 0.0078125, %v158_v35 }
 0x205   :  { %v163_v37 = vadd.f32 1e-05, %v161_v36 }
 0x206   :  { %v160_v38 = vpop.xlane.xlu1 %159 }
 0x207   :  { %249 = vrsqrt.f32 %v163_v37  ;;  %v162_v39 = vmul.f32 0.0078125, %v160_v38 }
 0x209   :  { %v164_v40 = vadd.f32 1e-05, %v162_v39 }
 0x20b   :  { %251 = vrsqrt.f32 %v164_v40 }
 0x214   :  { %v250_v41 = vpop.eup %249 }
 0x215   :  { %v167_v43 = vmul.f32 %v250_v41, %v153_v29 }
 0x217   :  { %v176_v45 = vmul.f32 %v194_v42, %v167_v43 }
 0x218   :  { %v252_v46 = vpop.eup %251 }
 0x219   :  { %v185_v47 = vadd.f32 %v195_v44, %v176_v45  ;;  %v168_v48 = vmul.f32 %v252_v46, %v154_v33 }
 0x21b   :  { %187 = vst [vmem:[%s369_s6] sm:$0xff] %v185_v47  ;;  %v177_v49 = vmul.f32 %v194_v42, %v168_v48 }
 0x21d   :  { %v186_v50 = vadd.f32 %v195_v44, %v177_v49 }
 0x21f   :  { %188 = vst [vmem:[%s369_s6 + $0x8] sm:$0xff] %v186_v50 }

// kernel: text_decoder_forward.24
= control target key start
LH: loop header
LB: loop body
LE: loop exit
PB: predicated region body
PF: predicated region fallthrough
CT: control target
= control target key end

     0   :  { %v251_v3 = vmov 0.0   ;;  %v188_v37 = vlaneseq  ;;  %s411_s1 = inlined_call_operand.vmem [shape: f32[128,256], index: 1, kind: input, shape index: {}]   ;;  %s412_s0 = inlined_call_operand.vmem [shape: f32[32,128], index: 0, kind: input, shape index: {}]   ;;  %s413_s2 = inlined_call_operand.vmem [shape: f32[1,256], index: 2, kind: input, shape index: {}]   ;;  %s414_s3 = inlined_call_operand.vmem [shape: f32[32,256], index: 3, kind: output, shape index: {}]  }
   0x1   :  { %v69_v0 = vld [vmem:[%s411_s1 + $0xf8] sm:$0xff]  ;;  %v68_v1 = vld [vmem:[%s411_s1 + $0xf0] sm:$0xff]  ;;  %v67_v2 = vld [vmem:[%s411_s1 + $0xe8] sm:$0xff]  ;;  %134 = vmatprep.mubr.f32.mxu0 %v251_v3  ;;  %146 = vmatprep.mubr.f32.mxu1 %v251_v3 }
   0x2   :  { %70 = vmatprep.subr.mxu0 %v69_v0  ;;  %218 = vmatprep.subr.mxu1 %v69_v0  ;;  %v66_v4 = vld [vmem:[%s411_s1 + $0xe0] sm:$0xff]  ;;  %v65_v5 = vld [vmem:[%s411_s1 + $0xd8] sm:$0xff]  ;;  %v64_v6 = vld [vmem:[%s411_s1 + $0xd0] sm:$0xff]  ;;  %v189_v38 = vshrl.u32 %v188_v37, 7 }
   0x3   :  { %71 = vmatpush1.msra.mxu0 %v68_v1  ;;  %234 = vmatpush1.msra.mxu1 %v68_v1  ;;  %v63_v7 = vld [vmem:[%s411_s1 + $0xc8] sm:$0xff]  ;;  %v62_v8 = vld [vmem:[%s411_s1 + $0xc0] sm:$0xff]  ;;  %v61_v9 = vld [vmem:[%s411_s1 + $0xb8] sm:$0xff] }
   0x4   :  { %72 = vmatprep.subr.mxu0 %v67_v2  ;;  %219 = vmatprep.subr.mxu1 %v67_v2  ;;  %v60_v10 = vld [vmem:[%s411_s1 + $0xb0] sm:$0xff]  ;;  %v59_v11 = vld [vmem:[%s411_s1 + $0xa8] sm:$0xff]  ;;  %v58_v12 = vld [vmem:[%s411_s1 + $0xa0] sm:$0xff]  ;;  %v190_v39 = vsub.s32 0, %v189_v38  ;;  %v194_v41 = vsub.s32 1, %v189_v38 }
   0x5   :  { %73 = vmatpush1.msra.mxu0 %v66_v4  ;;  %235 = vmatpush1.msra.mxu1 %v66_v4  ;;  %v57_v13 = vld [vmem:[%s411_s1 + $0x98] sm:$0xff]  ;;  %v56_v14 = vld [vmem:[%s411_s1 + $0x90] sm:$0xff]  ;;  %v55_v15 = vld [vmem:[%s411_s1 + $0x88] sm:$0xff] }
   0x6   :  { %74 = vmatprep.subr.mxu0 %v65_v5  ;;  %220 = vmatprep.subr.mxu1 %v65_v5  ;;  %v54_v16 = vld [vmem:[%s411_s1 + $0x80] sm:$0xff]  ;;  %v53_v17 = vld [vmem:[%s411_s1 + $0x78] sm:$0xff]  ;;  %v52_v18 = vld [vmem:[%s411_s1 + $0x70] sm:$0xff] }
   0x7   :  { %75 = vmatpush1.msra.mxu0 %v64_v6  ;;  %236 = vmatpush1.msra.mxu1 %v64_v6  ;;  %v51_v19 = vld [vmem:[%s411_s1 + $0x68] sm:$0xff]  ;;  %v50_v20 = vld [vmem:[%s411_s1 + $0x60] sm:$0xff]  ;;  %v49_v21 = vld [vmem:[%s411_s1 + $0x58] sm:$0xff] }
   0x8   :  { %76 = vmatprep.subr.mxu0 %v63_v7  ;;  %221 = vmatprep.subr.mxu1 %v63_v7  ;;  %v48_v22 = vld [vmem:[%s411_s1 + $0x50] sm:$0xff]  ;;  %v47_v23 = vld [vmem:[%s411_s1 + $0x48] sm:$0xff]  ;;  %v46_v24 = vld [vmem:[%s411_s1 + $0x40] sm:$0xff] }
   0x9   :  { %77 = vmatpush1.msra.mxu0 %v62_v8  ;;  %237 = vmatpush1.msra.mxu1 %v62_v8  ;;  %v45_v25 = vld [vmem:[%s411_s1 + $0x38] sm:$0xff]  ;;  %v44_v26 = vld [vmem:[%s411_s1 + $0x30] sm:$0xff]  ;;  %v43_v27 = vld [vmem:[%s411_s1 + $0x28] sm:$0xff] }
   0xa   :  { %78 = vmatprep.subr.mxu0 %v61_v9  ;;  %222 = vmatprep.subr.mxu1 %v61_v9  ;;  %v42_v28 = vld [vmem:[%s411_s1 + $0x20] sm:$0xff]  ;;  %v41_v29 = vld [vmem:[%s411_s1 + $0x18] sm:$0xff]  ;;  %v40_v30 = vld [vmem:[%s411_s1 + $0x10] sm:$0xff] }
   0xb   :  { %79 = vmatpush1.msra.mxu0 %v60_v10  ;;  %238 = vmatpush1.msra.mxu1 %v60_v10  ;;  %v39_v31 = vld [vmem:[%s411_s1 + $0x8] sm:$0xff]  ;;  %v38_v32 = vld [vmem:[%s411_s1] sm:$0xff]  ;;  %v36_v34 = vld [vmem:[%s412_s0 + $0x10] sm:$0xff] }
   0xc   :  { %80 = vmatprep.subr.mxu0 %v59_v11  ;;  %223 = vmatprep.subr.mxu1 %v59_v11  ;;  %v34_v33 = vld [vmem:[%s412_s0] sm:$0xff]  ;;  %v35_v35 = vld [vmem:[%s412_s0 + $0x8] sm:$0xff]  ;;  %v37_v36 = vld [vmem:[%s412_s0 + $0x18] sm:$0xff] }
   0xd   :  { %81 = vmatpush1.msra.mxu0 %v58_v12  ;;  %239 = vmatpush1.msra.mxu1 %v58_v12  ;;  %v186_v40 = vld [vmem:[%s413_s2] sm:$0x3] }
   0xe   :  { %82 = vmatprep.subr.mxu0 %v57_v13  ;;  %224 = vmatprep.subr.mxu1 %v57_v13  ;;  %v191_v42 = vrot.slane %v186_v40, %v190_v39  ;;  %v195_v43 = vrot.slane %v186_v40, %v194_v41 }
   0xf   :  { %83 = vmatpush1.msra.mxu0 %v56_v14  ;;  %240 = vmatpush1.msra.mxu1 %v56_v14 }
  0x10   :  { %84 = vmatprep.subr.mxu0 %v55_v15  ;;  %225 = vmatprep.subr.mxu1 %v55_v15 }
  0x11   :  { %85 = vmatpush1.msra.mxu0 %v54_v16  ;;  %241 = vmatpush1.msra.mxu1 %v54_v16 }
  0x12   :  { %86 = vmatprep.subr.mxu0 %v53_v17  ;;  %226 = vmatprep.subr.mxu1 %v53_v17 }
  0x13   :  { %87 = vmatpush1.msra.mxu0 %v52_v18  ;;  %242 = vmatpush1.msra.mxu1 %v52_v18 }
  0x14   :  { %88 = vmatprep.subr.mxu0 %v51_v19  ;;  %227 = vmatprep.subr.mxu1 %v51_v19 }
  0x15   :  { %89 = vmatpush1.msra.mxu0 %v50_v20  ;;  %243 = vmatpush1.msra.mxu1 %v50_v20 }
  0x16   :  { %90 = vmatprep.subr.mxu0 %v49_v21  ;;  %228 = vmatprep.subr.mxu1 %v49_v21 }
  0x17   :  { %91 = vmatpush1.msra.mxu0 %v48_v22  ;;  %244 = vmatpush1.msra.mxu1 %v48_v22 }
  0x18   :  { %92 = vmatprep.subr.mxu0 %v47_v23  ;;  %229 = vmatprep.subr.mxu1 %v47_v23 }
  0x19   :  { %93 = vmatpush1.msra.mxu0 %v46_v24  ;;  %245 = vmatpush1.msra.mxu1 %v46_v24 }
  0x1a   :  { %94 = vmatprep.subr.mxu0 %v45_v25  ;;  %230 = vmatprep.subr.mxu1 %v45_v25 }
  0x1b   :  { %95 = vmatpush1.msra.mxu0 %v44_v26  ;;  %246 = vmatpush1.msra.mxu1 %v44_v26 }
  0x1c   :  { %96 = vmatprep.subr.mxu0 %v43_v27  ;;  %231 = vmatprep.subr.mxu1 %v43_v27 }
  0x1d   :  { %97 = vmatpush1.msra.mxu0 %v42_v28  ;;  %247 = vmatpush1.msra.mxu1 %v42_v28 }
  0x1e   :  { %98 = vmatprep.subr.mxu0 %v41_v29  ;;  %232 = vmatprep.subr.mxu1 %v41_v29 }
  0x1f   :  { %99 = vmatpush1.msra.mxu0 %v40_v30  ;;  %248 = vmatpush1.msra.mxu1 %v40_v30 }
  0x20   :  { %100 = vmatprep.subr.mxu0 %v39_v31  ;;  %233 = vmatprep.subr.mxu1 %v39_v31 }
  0x21   :  { %101 = vmatpush1.msra.mxu0 %v38_v32  ;;  %249 = vmatpush1.msra.mxu1 %v38_v32 }
  0x22   :  { %135 = vmatmul.mubr.f32.vlgmr.msra.gmra.mxu0 %v34_v33  ;;  %147 = vmatmul.mubr.f32.vlgmr.msra.gmra.mxu1 %v36_v34 }
  0x23   :  { %140 = vmatprep.mubr.f32.mxu0 %v251_v3  ;;  %152 = vmatprep.mubr.f32.mxu1 %v251_v3 }
  0x26   :  { %141 = vmatmul.mubr.f32.gmra.mxu0 %v35_v35  ;;  %153 = vmatmul.mubr.f32.gmra.mxu1 %v37_v36 }
  0xe2   :  { %v136_v44 = vpop.f32.mrf.mxu0  ;;  %v148_v45 = vpop.f32.mrf.mxu1 }
  0xe3   :  { %v198_v46 = vadd.f32 %v191_v42, %v136_v44  ;;  %v202_v47 = vadd.f32 %v191_v42, %v148_v45 }
  0xe4   :  { %v138_v48 = vpop.f32.mrf.mxu0  ;;  %v150_v49 = vpop.f32.mrf.mxu1 }
  0xe5   :  { %206 = vst [vmem:[%s414_s3] sm:$0xff] %v198_v46  ;;  %210 = vst [vmem:[%s414_s3 + $0x20] sm:$0xff] %v202_v47  ;;  %v199_v50 = vadd.f32 %v195_v43, %v138_v48  ;;  %v203_v51 = vadd.f32 %v195_v43, %v150_v49 }
  0xe6   :  { %v142_v52 = vpop.f32.mrf.mxu0  ;;  %v154_v53 = vpop.f32.mrf.mxu1 }
  0xe7   :  { %207 = vst [vmem:[%s414_s3 + $0x8] sm:$0xff] %v199_v50  ;;  %211 = vst [vmem:[%s414_s3 + $0x28] sm:$0xff] %v203_v51  ;;  %v200_v54 = vadd.f32 %v191_v42, %v142_v52  ;;  %v204_v55 = vadd.f32 %v191_v42, %v154_v53 }
  0xe8   :  { %v144_v56 = vpop.f32.mrf.mxu0  ;;  %v156_v57 = vpop.f32.mrf.mxu1 }
  0xe9   :  { %208 = vst [vmem:[%s414_s3 + $0x10] sm:$0xff] %v200_v54  ;;  %212 = vst [vmem:[%s414_s3 + $0x30] sm:$0xff] %v204_v55  ;;  %v201_v58 = vadd.f32 %v195_v43, %v144_v56  ;;  %v205_v59 = vadd.f32 %v195_v43, %v156_v57 }
  0xeb   :  { %209 = vst [vmem:[%s414_s3 + $0x18] sm:$0xff] %v201_v58  ;;  %213 = vst [vmem:[%s414_s3 + $0x38] sm:$0xff] %v205_v59 }

// kernel: text_decoder_forward.29
= control target key start
LH: loop header
LB: loop body
LE: loop exit
PB: predicated region body
PF: predicated region fallthrough
CT: control target
= control target key end

     0   :  { %s822_s15 = smov 0   ;;  %s907_s0 = inlined_call_operand.vmem [shape: f32[2,2,8,64], index: 0, kind: input, shape index: {}]   ;;  %s908_s1 = inlined_call_operand.vmem [shape: f32[2,2,16,64], index: 1, kind: input, shape index: {}]   ;;  %s909_s2 = inlined_call_operand.vmem [shape: f32[2,2,16,64], index: 2, kind: input, shape index: {}]   ;;  %s910_s3 = inlined_call_operand.vmem [shape: f32[2,8,16], index: 3, kind: input, shape index: {}]   ;;  %s911_s4 = inlined_call_operand.vmem [shape: f32[2,2,8,64], index: 4, kind: output, shape index: {}]  }
   0x1 LB: > { %s695_s16 = sadd.s32 4294967295, %s793_s15   ;;  %p699_p0 = scmp.ge.s32.totalorder %s793_s15, 1  ;;  %s793_s15 = sphi %s822_s15, %s14_s15  }
   0x2   : > { %p191_p1 = scmp.lt.s32.totalorder %s793_s15, 3 }
   0x4   : > { %p192_p2 = pnand %p699_p0, %p191_p1 }
   0x5   : > { %p231_p3 = scmp.lt.s32.totalorder (!%p192_p2), %s695_s16, 1 }
   0x6   : > { %195 = sbr.rel (%p192_p2) target bundleno = 1243 (0x4db), region = 36 }
   0xb   : > { %v795_v0 = vmov 0.0   ;;  %vm796_vm0 = vmmov 0   ;;  %s913_s16 = smov (!%p231_p3, %s695_s16), 1  ;;  %vm261_vm1 = vcmask 523264   ;;  %vm343_vm2 = vcmask 130048  }
   0xc   : > { %741 = vmatprep.subr.mxu0 %v795_v0  ;;  %745 = vmatprep.mubr.msk.f32.mxu0 %vm796_vm0, %v795_v0  ;;  %s726_s17 = sshll.u32 %s913_s16, 5  ;;  %s725_s21 = sshll.u32 %s913_s16, 4 }
   0xd   : > { %748 = vmatprep.subr.mxu1 %v795_v0  ;;  %752 = vmatprep.mubr.msk.f32.mxu1 %vm796_vm0, %v795_v0  ;;  %s844_s20 = scalar_lea.vmem %s908_s1, %s726_s17  ;;  %s856_s24 = scalar_lea.vmem %s907_s0, %s725_s21 }
   0xe   : > { %v258_v1 = vld [vmem:[%s844_s20 + $0x8] sm:$0xff]  ;;  %v257_v2 = vld [vmem:[%s844_s20] sm:$0xff]  ;;  %s706_s25 = sshll.u32 %s913_s16, 3  ;;  %s875_s5 = scalar_lea.vmem %s909_s2, %s726_s17  ;;  %v715_v20 = vld [vmem:[%s844_s20 + $0x18] sm:$0xff] }
   0xf   : > { %742 = vmatpush3.xpose.msk.msra.mxu0 %vm261_vm1, %v258_v1  ;;  %v256_v3 = vld [vmem:[%s856_s24] sm:$0xff]  ;;  %s249_s28 = scalar_lea.vmem %s910_s3, %s706_s25  ;;  %v260_v15 = vld [vmem:[%s875_s5 + $0x8] sm:$0xff]  ;;  %v714_v21 = vld [vmem:[%s844_s20 + $0x10] sm:$0xff]  ;;  %s254_s8 = scalar_lea.vmem %s911_s4, %s725_s21 }
  0x10   : > { %743 = vmatprep.subr.mxu0 %v795_v0  ;;  %v255_v5 = vld [vmem:[%s249_s28] sm:$0xff]  ;;  %749 = vmatpush3.msra.mxu1 %v260_v15  ;;  %v713_v22 = vld [vmem:[%s856_s24 + $0x8] sm:$0xff]  ;;  %v717_v35 = vld [vmem:[%s875_s5 + $0x18] sm:$0xff] }
  0x11   : > { %v259_v16 = vld [vmem:[%s875_s5] sm:$0xff]  ;;  %750 = vmatprep.subr.mxu1 %v795_v0  ;;  %v716_v36 = vld [vmem:[%s875_s5 + $0x10] sm:$0xff] }
  0x12   : > { %751 = vmatpush3.msra.mxu1 %v259_v16 }
  0x13   : > { %744 = vmatpush3.xpose.msk.msra.mxu0 %vm261_vm1, %v257_v2  ;;  %755 = vmatprep.subr.mxu1 %v795_v0 }
  0x14   : > { %762 = vmatprep.subr.mxu0 %v795_v0 }
  0x16   : > { %746 = vmatmul.mubr.msk.f32.vlgmr.msra.gmra.mxu0 %vm261_vm1, %v256_v3 }
  0x17   : > { %766 = vmatprep.mubr.msk.f32.mxu0 %vm796_vm0, %v795_v0  ;;  %763 = vmatpush3.msra.mxu0 %v717_v35 }
  0x18   : > { %764 = vmatprep.subr.mxu0 %v795_v0 }
  0x19   : > { %765 = vmatpush3.msra.mxu0 %v716_v36 }
  0xd6   : > { %v337_v4 = vpop.f32.mrf.mxu0 }
  0xd7   : > { %v341_v6 = vmul.f32 0.125, %v337_v4 }
  0xd8   : > { %v747_v7 = vpop.f32.mrf.mxu0 }
  0xd9   : > { %v342_v8 = vadd.f32 %v341_v6, %v255_v5 }
  0xdb   : > { %v344_v9 = vsel %vm343_vm2, %v342_v8, -inf }
  0xdc   : > { %345 = vmax.xlane.f32.xlu0 %v344_v9 }
 0x165   : > { %v346_v10 = vpop.xlane.xlu0 %345 }
 0x166   : > { %v347_v11 = vsub.f32 %v342_v8, %v346_v10 }
 0x168   : > { %v348_v12 = vmul.f32 1.442695, %v347_v11 }
 0x16a   : > { %779 = vpow2.f32 %v348_v12 }
 0x177   : > { %v780_v13 = vpop.eup %779 }
 0x178   : > { %v350_v14 = vsel %vm343_vm2, %v780_v13, 0.0 }
 0x179   : > { %351 = vadd.xlane.f32.xlu0 %v350_v14 }
 0x202   : > { %v352_v17 = vpop.xlane.xlu0 %351 }
 0x203   : > { %781 = vrcp.f32 %v352_v17 }
 0x210   : > { %v782_v18 = vpop.eup %781 }
 0x211   : > { %v354_v19 = vmul.f32 %v782_v18, %v780_v13 }
 0x213   : > { %753 = vmatmul.mubr.msk.f32.vlgmr.msra.gmra.mxu1 %vm343_vm2, %v354_v19 }
 0x214   : > { %756 = vmatpush3.xpose.msk.msra.mxu1 %vm261_vm1, %v715_v20  ;;  %759 = vmatprep.mubr.msk.f32.mxu1 %vm796_vm0, %v795_v0 }
 0x215   : > { %757 = vmatprep.subr.mxu1 %v795_v0 }
 0x218   : > { %758 = vmatpush3.xpose.msk.msra.mxu1 %vm261_vm1, %v714_v21 }
 0x21b   : > { %760 = vmatmul.mubr.msk.f32.vlgmr.msra.gmra.mxu1 %vm261_vm1, %v713_v22 }
 0x2d3   : > { %v424_v23 = vpop.f32.mrf.mxu1 }
 0x2d4   : > { %428 = vst.msk [vmem:[%s254_s8] sm:$0xff] %vm261_vm1, %v424_v23 }
 0x2d5   : > { %v754_v24 = vpop.f32.mrf.mxu1 }
 0x2db   : > { %v512_v25 = vpop.f32.mrf.mxu1 }
 0x2dc   : > { %v516_v26 = vmul.f32 0.125, %v512_v25 }
 0x2dd   : > { %v761_v27 = vpop.f32.mrf.mxu1 }
 0x2de   : > { %v517_v28 = vadd.f32 %v516_v26, %v255_v5 }
 0x2e0   : > { %v518_v29 = vsel %vm343_vm2, %v517_v28, -inf }
 0x2e1   : > { %519 = vmax.xlane.f32.xlu1 %v518_v29 }
 0x36a   : > { %v520_v30 = vpop.xlane.xlu1 %519 }
 0x36b   : > { %v521_v31 = vsub.f32 %v517_v28, %v520_v30 }
 0x36d   : > { %v522_v32 = vmul.f32 1.442695, %v521_v31 }
 0x36f   : > { %783 = vpow2.f32 %v522_v32 }
 0x37c   : > { %v784_v33 = vpop.eup %783 }
 0x37d   : > { %v524_v34 = vsel %vm343_vm2, %v784_v33, 0.0 }
 0x37e   : > { %525 = vadd.xlane.f32.xlu1 %v524_v34 }
 0x407   : > { %v526_v37 = vpop.xlane.xlu1 %525 }
 0x408   : > { %785 = vrcp.f32 %v526_v37 }
 0x415   : > { %v786_v38 = vpop.eup %785 }
 0x416   : > { %v528_v39 = vmul.f32 %v786_v38, %v784_v33 }
 0x418   : > { %767 = vmatmul.mubr.msk.f32.vlgmr.msra.gmra.mxu0 %vm343_vm2, %v528_v39 }
 0x4d8   : > { %v598_v40 = vpop.f32.mrf.mxu0 }
 0x4d9   : > { %722 = vst.msk [vmem:[%s254_s8 + $0x8] sm:$0xff] %vm261_vm1, %v598_v40 }
 0x4da   : > { %v768_v41 = vpop.f32.mrf.mxu0 }
 0x4db PF: > { %s14_s15 = sadd.s32 1, %s793_s15  }
 0x4dc   : > { %p11_p4 = scmp.ge.s32.totalorder %s14_s15, 4  }
 0x4de   :  { %13 = sbr.rel (!%p11_p4) target bundleno = 1 (0x1), region = 79 }

// kernel: text_decoder_forward.28
= control target key start
LH: loop header
LB: loop body
LE: loop exit
PB: predicated region body
PF: predicated region fallthrough
CT: control target
= control target key end

     0   :  { %s276_s1 = inlined_call_operand.vmem [shape: f32[128,128], index: 1, kind: input, shape index: {}]   ;;  %s277_s0 = inlined_call_operand.vmem [shape: f32[16,128], index: 0, kind: input, shape index: {}]   ;;  %s278_s2 = inlined_call_operand.vmem [shape: f32[1,128], index: 2, kind: input, shape index: {}]   ;;  %s279_s3 = inlined_call_operand.vmem [shape: f32[16,128], index: 3, kind: output, shape index: {}]  }
   0x1   :  { %v39_v0 = vld [vmem:[%s276_s1 + $0x78] sm:$0xff]  ;;  %v38_v1 = vld [vmem:[%s276_s1 + $0x70] sm:$0xff]  ;;  %v37_v2 = vld [vmem:[%s276_s1 + $0x68] sm:$0xff] }
   0x2   :  { %158 = vmatprep.subr.mxu0 %v39_v0  ;;  %v36_v3 = vld [vmem:[%s276_s1 + $0x60] sm:$0xff]  ;;  %v35_v5 = vld [vmem:[%s276_s1 + $0x58] sm:$0xff]  ;;  %v34_v6 = vld [vmem:[%s276_s1 + $0x50] sm:$0xff] }
   0x3   :  { %159 = vmatpush3.msra.mxu0 %v39_v0  ;;  %v22_v4 = vld [vmem:[%s277_s0] sm:$0xff]  ;;  %v33_v7 = vld [vmem:[%s276_s1 + $0x48] sm:$0xff]  ;;  %v31_v9 = vld [vmem:[%s276_s1 + $0x38] sm:$0xff] }
   0x4   :  { %160 = vmatprep.subr.mxu0 %v38_v1  ;;  %190 = vmatprep.mubr.f32.mxu0 %v22_v4  ;;  %v32_v8 = vld [vmem:[%s276_s1 + $0x40] sm:$0xff]  ;;  %v30_v10 = vld [vmem:[%s276_s1 + $0x30] sm:$0xff]  ;;  %v29_v11 = vld [vmem:[%s276_s1 + $0x28] sm:$0xff] }
   0x5   :  { %161 = vmatpush3.msra.mxu0 %v38_v1  ;;  %v28_v12 = vld [vmem:[%s276_s1 + $0x20] sm:$0xff]  ;;  %v27_v13 = vld [vmem:[%s276_s1 + $0x18] sm:$0xff]  ;;  %v26_v14 = vld [vmem:[%s276_s1 + $0x10] sm:$0xff] }
   0x6   :  { %162 = vmatprep.subr.mxu0 %v37_v2  ;;  %v25_v15 = vld [vmem:[%s276_s1 + $0x8] sm:$0xff]  ;;  %v24_v16 = vld [vmem:[%s276_s1] sm:$0xff] }
   0x7   :  { %163 = vmatpush3.msra.mxu0 %v37_v2  ;;  %v23_v17 = vld [vmem:[%s277_s0 + $0x8] sm:$0xff]  ;;  %v139_v18 = vld [vmem:[%s278_s2] ss:$0 sm:$0xff] }
   0x8   :  { %164 = vmatprep.subr.mxu0 %v36_v3 }
   0x9   :  { %165 = vmatpush3.msra.mxu0 %v36_v3 }
   0xa   :  { %166 = vmatprep.subr.mxu0 %v35_v5 }
   0xb   :  { %167 = vmatpush3.msra.mxu0 %v35_v5 }
   0xc   :  { %168 = vmatprep.subr.mxu0 %v34_v6 }
   0xd   :  { %169 = vmatpush3.msra.mxu0 %v34_v6 }
   0xe   :  { %170 = vmatprep.subr.mxu0 %v33_v7 }
   0xf   :  { %171 = vmatpush3.msra.mxu0 %v33_v7 }
  0x10   :  { %172 = vmatprep.subr.mxu0 %v32_v8 }
  0x11   :  { %173 = vmatpush3.msra.mxu0 %v32_v8 }
  0x12   :  { %174 = vmatprep.subr.mxu0 %v31_v9 }
  0x13   :  { %175 = vmatpush3.msra.mxu0 %v31_v9 }
  0x14   :  { %176 = vmatprep.subr.mxu0 %v30_v10 }
  0x15   :  { %177 = vmatpush3.msra.mxu0 %v30_v10 }
  0x16   :  { %178 = vmatprep.subr.mxu0 %v29_v11 }
  0x17   :  { %179 = vmatpush3.msra.mxu0 %v29_v11 }
  0x18   :  { %180 = vmatprep.subr.mxu0 %v28_v12 }
  0x19   :  { %181 = vmatpush3.msra.mxu0 %v28_v12 }
  0x1a   :  { %182 = vmatprep.subr.mxu0 %v27_v13 }
  0x1b   :  { %183 = vmatpush3.msra.mxu0 %v27_v13 }
  0x1c   :  { %184 = vmatprep.subr.mxu0 %v26_v14 }
  0x1d   :  { %185 = vmatpush3.msra.mxu0 %v26_v14 }
  0x1e   :  { %186 = vmatprep.subr.mxu0 %v25_v15 }
  0x1f   :  { %187 = vmatpush3.msra.mxu0 %v25_v15 }
  0x20   :  { %188 = vmatprep.subr.mxu0 %v24_v16 }
  0x21   :  { %189 = vmatpush3.msra.mxu0 %v24_v16 }
  0x22   :  { %191 = vmatmul.mubr.f32.vlgmr.msra.gmra.mxu0 %v23_v17 }
  0xe2   :  { %v192_v19 = vpop.f32.mrf.mxu0 }
  0xe3   :  { %v132_v20 = vadd.f32 %v192_v19, %v139_v18 }
  0xe4   :  { %v106_v21 = vpop.f32.mrf.mxu0 }
  0xe5   :  { %134 = vst [vmem:[%s279_s3 + $0x8] sm:$0xff] %v132_v20  ;;  %v131_v22 = vadd.f32 %v139_v18, %v106_v21 }
  0xe7   :  { %133 = vst [vmem:[%s279_s3] sm:$0xff] %v131_v22 }

// kernel: text_decoder_forward.31
= control target key start
LH: loop header
LB: loop body
LE: loop exit
PB: predicated region body
PF: predicated region fallthrough
CT: control target
= control target key end

     0   :  { %v412_v3 = vmov 0.0   ;;  %s718_s1 = inlined_call_operand.vmem [shape: f32[128,512], index: 1, kind: input, shape index: {}]   ;;  %s719_s0 = inlined_call_operand.vmem [shape: f32[16,128], index: 0, kind: input, shape index: {}]   ;;  %s720_s2 = inlined_call_operand.vmem [shape: f32[1,512], index: 2, kind: input, shape index: {}]   ;;  %s721_s3 = inlined_call_operand.vmem [shape: f32[16,512], index: 3, kind: output, shape index: {}]  }
   0x1   :  { %v97_v0 = vld [vmem:[%s718_s1 + $0x1e8] sm:$0xff]  ;;  %v99_v1 = vld [vmem:[%s718_s1 + $0x1f8] sm:$0xff]  ;;  %v96_v2 = vld [vmem:[%s718_s1 + $0x1e0] sm:$0xff]  ;;  %164 = vmatprep.mubr.f32.mxu0 %v412_v3  ;;  %241 = vmatprep.mubr.f32.mxu1 %v412_v3 }
   0x2   :  { %100 = vmatprep.subr.mxu0 %v97_v0  ;;  %177 = vmatprep.subr.mxu1 %v99_v1  ;;  %v98_v4 = vld [vmem:[%s718_s1 + $0x1f0] sm:$0xff]  ;;  %v93_v5 = vld [vmem:[%s718_s1 + $0x1c8] sm:$0xff]  ;;  %v95_v6 = vld [vmem:[%s718_s1 + $0x1d8] sm:$0xff] }
   0x3   :  { %101 = vmatpush1.msra.mxu0 %v96_v2  ;;  %178 = vmatpush1.msra.mxu1 %v98_v4  ;;  %v92_v7 = vld [vmem:[%s718_s1 + $0x1c0] sm:$0xff]  ;;  %v94_v8 = vld [vmem:[%s718_s1 + $0x1d0] sm:$0xff]  ;;  %v89_v9 = vld [vmem:[%s718_s1 + $0x1a8] sm:$0xff]  ;;  %v283_v4 = vlaneseq }
   0x4   :  { %102 = vmatprep.subr.mxu0 %v93_v5  ;;  %179 = vmatprep.subr.mxu1 %v95_v6  ;;  %v91_v10 = vld [vmem:[%s718_s1 + $0x1b8] sm:$0xff]  ;;  %v88_v11 = vld [vmem:[%s718_s1 + $0x1a0] sm:$0xff]  ;;  %v90_v12 = vld [vmem:[%s718_s1 + $0x1b0] sm:$0xff] }
   0x5   :  { %103 = vmatpush1.msra.mxu0 %v92_v7  ;;  %180 = vmatpush1.msra.mxu1 %v94_v8  ;;  %v85_v13 = vld [vmem:[%s718_s1 + $0x188] sm:$0xff]  ;;  %v87_v14 = vld [vmem:[%s718_s1 + $0x198] sm:$0xff]  ;;  %v84_v15 = vld [vmem:[%s718_s1 + $0x180] sm:$0xff]  ;;  %v284_v5 = vshrl.u32 %v283_v4, 7 }
   0x6   :  { %104 = vmatprep.subr.mxu0 %v89_v9  ;;  %181 = vmatprep.subr.mxu1 %v91_v10  ;;  %v86_v16 = vld [vmem:[%s718_s1 + $0x190] sm:$0xff]  ;;  %v81_v17 = vld [vmem:[%s718_s1 + $0x168] sm:$0xff]  ;;  %v83_v18 = vld [vmem:[%s718_s1 + $0x178] sm:$0xff] }
   0x7   :  { %105 = vmatpush1.msra.mxu0 %v88_v11  ;;  %182 = vmatpush1.msra.mxu1 %v90_v12  ;;  %v80_v19 = vld [vmem:[%s718_s1 + $0x160] sm:$0xff]  ;;  %v82_v20 = vld [vmem:[%s718_s1 + $0x170] sm:$0xff]  ;;  %v77_v21 = vld [vmem:[%s718_s1 + $0x148] sm:$0xff]  ;;  %v285_v6 = vsub.s32 0, %v284_v5  ;;  %v293_v7 = vsub.s32 2, %v284_v5  ;;  %v289_v9 = vsub.s32 1, %v284_v5 }
   0x8   :  { %106 = vmatprep.subr.mxu0 %v85_v13  ;;  %183 = vmatprep.subr.mxu1 %v87_v14  ;;  %v79_v22 = vld [vmem:[%s718_s1 + $0x158] sm:$0xff]  ;;  %v76_v23 = vld [vmem:[%s718_s1 + $0x140] sm:$0xff]  ;;  %v78_v24 = vld [vmem:[%s718_s1 + $0x150] sm:$0xff]  ;;  %v297_v10 = vsub.s32 3, %v284_v5 }
   0x9   :  { %107 = vmatpush1.msra.mxu0 %v84_v15  ;;  %184 = vmatpush1.msra.mxu1 %v86_v16  ;;  %v73_v25 = vld [vmem:[%s718_s1 + $0x128] sm:$0xff]  ;;  %v75_v26 = vld [vmem:[%s718_s1 + $0x138] sm:$0xff]  ;;  %v72_v27 = vld [vmem:[%s718_s1 + $0x120] sm:$0xff] }
   0xa   :  { %108 = vmatprep.subr.mxu0 %v81_v17  ;;  %185 = vmatprep.subr.mxu1 %v83_v18  ;;  %v74_v28 = vld [vmem:[%s718_s1 + $0x130] sm:$0xff]  ;;  %v69_v29 = vld [vmem:[%s718_s1 + $0x108] sm:$0xff]  ;;  %v71_v30 = vld [vmem:[%s718_s1 + $0x118] sm:$0xff] }
   0xb   :  { %109 = vmatpush1.msra.mxu0 %v80_v19  ;;  %186 = vmatpush1.msra.mxu1 %v82_v20  ;;  %v68_v31 = vld [vmem:[%s718_s1 + $0x100] sm:$0xff]  ;;  %v70_v32 = vld [vmem:[%s718_s1 + $0x110] sm:$0xff]  ;;  %v65_v33 = vld [vmem:[%s718_s1 + $0xe8] sm:$0xff] }
   0xc   :  { %110 = vmatprep.subr.mxu0 %v77_v21  ;;  %187 = vmatprep.subr.mxu1 %v79_v22  ;;  %v67_v34 = vld [vmem:[%s718_s1 + $0xf8] sm:$0xff]  ;;  %v64_v35 = vld [vmem:[%s718_s1 + $0xe0] sm:$0xff]  ;;  %v66_v36 = vld [vmem:[%s718_s1 + $0xf0] sm:$0xff] }
   0xd   :  { %111 = vmatpush1.msra.mxu0 %v76_v23  ;;  %188 = vmatpush1.msra.mxu1 %v78_v24  ;;  %v61_v37 = vld [vmem:[%s718_s1 + $0xc8] sm:$0xff]  ;;  %v63_v38 = vld [vmem:[%s718_s1 + $0xd8] sm:$0xff]  ;;  %v60_v39 = vld [vmem:[%s718_s1 + $0xc0] sm:$0xff] }
   0xe   :  { %112 = vmatprep.subr.mxu0 %v73_v25  ;;  %189 = vmatprep.subr.mxu1 %v75_v26  ;;  %v62_v40 = vld [vmem:[%s718_s1 + $0xd0] sm:$0xff]  ;;  %v57_v41 = vld [vmem:[%s718_s1 + $0xa8] sm:$0xff]  ;;  %v59_v42 = vld [vmem:[%s718_s1 + $0xb8] sm:$0xff] }
   0xf   :  { %113 = vmatpush1.msra.mxu0 %v72_v27  ;;  %190 = vmatpush1.msra.mxu1 %v74_v28  ;;  %v56_v43 = vld [vmem:[%s718_s1 + $0xa0] sm:$0xff]  ;;  %v58_v44 = vld [vmem:[%s718_s1 + $0xb0] sm:$0xff]  ;;  %v53_v45 = vld [vmem:[%s718_s1 + $0x88] sm:$0xff] }
  0x10   :  { %114 = vmatprep.subr.mxu0 %v69_v29  ;;  %191 = vmatprep.subr.mxu1 %v71_v30  ;;  %v55_v46 = vld [vmem:[%s718_s1 + $0x98] sm:$0xff]  ;;  %v52_v47 = vld [vmem:[%s718_s1 + $0x80] sm:$0xff]  ;;  %v54_v48 = vld [vmem:[%s718_s1 + $0x90] sm:$0xff] }
  0x11   :  { %115 = vmatpush1.msra.mxu0 %v68_v31  ;;  %192 = vmatpush1.msra.mxu1 %v70_v32  ;;  %v49_v49 = vld [vmem:[%s718_s1 + $0x68] sm:$0xff]  ;;  %v51_v50 = vld [vmem:[%s718_s1 + $0x78] sm:$0xff]  ;;  %v48_v51 = vld [vmem:[%s718_s1 + $0x60] sm:$0xff] }
  0x12   :  { %116 = vmatprep.subr.mxu0 %v65_v33  ;;  %193 = vmatprep.subr.mxu1 %v67_v34  ;;  %v50_v52 = vld [vmem:[%s718_s1 + $0x70] sm:$0xff]  ;;  %v45_v53 = vld [vmem:[%s718_s1 + $0x48] sm:$0xff]  ;;  %v47_v54 = vld [vmem:[%s718_s1 + $0x58] sm:$0xff] }
  0x13   :  { %117 = vmatpush1.msra.mxu0 %v64_v35  ;;  %194 = vmatpush1.msra.mxu1 %v66_v36  ;;  %v44_v55 = vld [vmem:[%s718_s1 + $0x40] sm:$0xff]  ;;  %v46_v56 = vld [vmem:[%s718_s1 + $0x50] sm:$0xff]  ;;  %v41_v57 = vld [vmem:[%s718_s1 + $0x28] sm:$0xff] }
  0x14   :  { %118 = vmatprep.subr.mxu0 %v61_v37  ;;  %195 = vmatprep.subr.mxu1 %v63_v38  ;;  %v43_v58 = vld [vmem:[%s718_s1 + $0x38] sm:$0xff]  ;;  %v40_v59 = vld [vmem:[%s718_s1 + $0x20] sm:$0xff]  ;;  %v42_v60 = vld [vmem:[%s718_s1 + $0x30] sm:$0xff] }
  0x15   :  { %119 = vmatpush1.msra.mxu0 %v60_v39  ;;  %196 = vmatpush1.msra.mxu1 %v62_v40  ;;  %v37_v61 = vld [vmem:[%s718_s1 + $0x8] sm:$0xff]  ;;  %v39_v62 = vld [vmem:[%s718_s1 + $0x18] sm:$0xff]  ;;  %v36_v63 = vld [vmem:[%s718_s1] sm:$0xff] }
  0x16   :  { %120 = vmatprep.subr.mxu0 %v57_v41  ;;  %197 = vmatprep.subr.mxu1 %v59_v42  ;;  %v38_v0 = vld [vmem:[%s718_s1 + $0x10] sm:$0xff]  ;;  %v34_v1 = vld [vmem:[%s719_s0] sm:$0xff]  ;;  %v35_v2 = vld [vmem:[%s719_s0 + $0x8] sm:$0xff] }
  0x17   :  { %121 = vmatpush1.msra.mxu0 %v56_v43  ;;  %198 = vmatpush1.msra.mxu1 %v58_v44  ;;  %v281_v8 = vld [vmem:[%s720_s2] sm:$0xf] }
  0x18   :  { %122 = vmatprep.subr.mxu0 %v53_v45  ;;  %199 = vmatprep.subr.mxu1 %v55_v46  ;;  %v286_v11 = vrot.slane %v281_v8, %v285_v6  ;;  %v294_v12 = vrot.slane %v281_v8, %v293_v7  ;;  %v290_v13 = vrot.slane %v281_v8, %v289_v9 }
  0x19   :  { %123 = vmatpush1.msra.mxu0 %v52_v47  ;;  %200 = vmatpush1.msra.mxu1 %v54_v48 }
  0x1a   :  { %124 = vmatprep.subr.mxu0 %v49_v49  ;;  %201 = vmatprep.subr.mxu1 %v51_v50 }
  0x1b   :  { %125 = vmatpush1.msra.mxu0 %v48_v51  ;;  %202 = vmatpush1.msra.mxu1 %v50_v52 }
  0x1c   :  { %126 = vmatprep.subr.mxu0 %v45_v53  ;;  %203 = vmatprep.subr.mxu1 %v47_v54 }
  0x1d   :  { %127 = vmatpush1.msra.mxu0 %v44_v55  ;;  %204 = vmatpush1.msra.mxu1 %v46_v56 }
  0x1e   :  { %128 = vmatprep.subr.mxu0 %v41_v57  ;;  %205 = vmatprep.subr.mxu1 %v43_v58 }
  0x1f   :  { %129 = vmatpush1.msra.mxu0 %v40_v59  ;;  %206 = vmatpush1.msra.mxu1 %v42_v60 }
  0x20   :  { %130 = vmatprep.subr.mxu0 %v37_v61  ;;  %207 = vmatprep.subr.mxu1 %v39_v62 }
  0x21   :  { %131 = vmatpush1.msra.mxu0 %v36_v63  ;;  %208 = vmatpush1.msra.mxu1 %v38_v0 }
  0x22   :  { %165 = vmatmul.mubr.f32.vlgmr.msra.gmra.mxu0 %v34_v1  ;;  %242 = vmatmul.mubr.f32.vlgmr.msra.gmra.mxu1 %v34_v1 }
  0x23   :  { %170 = vmatprep.mubr.f32.mxu0 %v412_v3  ;;  %247 = vmatprep.mubr.f32.mxu1 %v412_v3  ;;  %v298_v3 = vrot.slane %v281_v8, %v297_v10 }
  0x26   :  { %171 = vmatmul.mubr.f32.gmra.mxu0 %v35_v2  ;;  %248 = vmatmul.mubr.f32.gmra.mxu1 %v35_v2 }
  0xe2   :  { %v166_v14 = vpop.f32.mrf.mxu0  ;;  %v243_v15 = vpop.f32.mrf.mxu1 }
  0xe3   :  { %v638_v16 = vadd.f32 %v286_v11, %v166_v14  ;;  %v640_v17 = vadd.f32 %v294_v12, %v243_v15 }
  0xe4   :  { %v168_v18 = vpop.f32.mrf.mxu0  ;;  %v245_v19 = vpop.f32.mrf.mxu1 }
  0xe5   :  { %v311_v20 = vmul.f32 %v638_v16, %v638_v16  ;;  %v313_v21 = vmul.f32 %v640_v17, %v640_v17  ;;  %v646_v22 = vadd.f32 %v290_v13, %v168_v18  ;;  %v648_v23 = vadd.f32 %v298_v3, %v245_v19 }
  0xe6   :  { %v172_v24 = vpop.f32.mrf.mxu0  ;;  %v249_v25 = vpop.f32.mrf.mxu1 }
  0xe7   :  { %v319_v26 = vmul.f32 %v311_v20, %v638_v16  ;;  %v321_v27 = vmul.f32 %v313_v21, %v640_v17  ;;  %v312_v28 = vmul.f32 %v646_v22, %v646_v22  ;;  %v314_v29 = vmul.f32 %v648_v23, %v648_v23 }
  0xe8   :  { %v656_v30 = vadd.f32 %v286_v11, %v172_v24  ;;  %v658_v31 = vadd.f32 %v294_v12, %v249_v25  ;;  %v174_v32 = vpop.f32.mrf.mxu0  ;;  %v251_v33 = vpop.f32.mrf.mxu1 }
  0xe9   :  { %v327_v34 = vmul.f32 0.044715, %v319_v26  ;;  %v329_v35 = vmul.f32 0.044715, %v321_v27  ;;  %v320_v36 = vmul.f32 %v312_v28, %v646_v22  ;;  %v322_v37 = vmul.f32 %v314_v29, %v648_v23 }
  0xea   :  { %v315_v38 = vmul.f32 %v656_v30, %v656_v30  ;;  %v317_v39 = vmul.f32 %v658_v31, %v658_v31  ;;  %v666_v40 = vadd.f32 %v290_v13, %v174_v32  ;;  %v668_v41 = vadd.f32 %v298_v3, %v251_v33 }
  0xeb   :  { %v335_v42 = vadd.f32 %v327_v34, %v638_v16  ;;  %v337_v43 = vadd.f32 %v329_v35, %v640_v17  ;;  %v328_v44 = vmul.f32 0.044715, %v320_v36  ;;  %v330_v45 = vmul.f32 0.044715, %v322_v37 }
  0xec   :  { %v323_v46 = vmul.f32 %v315_v38, %v656_v30  ;;  %v325_v47 = vmul.f32 %v317_v39, %v658_v31  ;;  %v316_v48 = vmul.f32 %v666_v40, %v666_v40  ;;  %v318_v49 = vmul.f32 %v668_v41, %v668_v41 }
  0xed   :  { %v343_v50 = vmul.f32 0.7978846, %v335_v42  ;;  %v345_v51 = vmul.f32 0.7978846, %v337_v43  ;;  %v336_v52 = vadd.f32 %v328_v44, %v646_v22  ;;  %v338_v53 = vadd.f32 %v330_v45, %v648_v23 }
  0xee   :  { %v331_v54 = vmul.f32 0.044715, %v323_v46  ;;  %v333_v55 = vmul.f32 0.044715, %v325_v47  ;;  %v324_v56 = vmul.f32 %v316_v48, %v666_v40  ;;  %v326_v57 = vmul.f32 %v318_v49, %v668_v41 }
  0xef   :  { %396 = vtanh.f32 %v343_v50  ;;  %v344_v58 = vmul.f32 0.7978846, %v336_v52  ;;  %v346_v59 = vmul.f32 0.7978846, %v338_v53 }
  0xf0   :  { %398 = vtanh.f32 %v345_v51  ;;  %v339_v60 = vadd.f32 %v331_v54, %v656_v30  ;;  %v341_v61 = vadd.f32 %v333_v55, %v658_v31  ;;  %v332_v62 = vmul.f32 0.044715, %v324_v56 }
  0xf1   :  { %400 = vtanh.f32 %v344_v58  ;;  %v334_v63 = vmul.f32 0.044715, %v326_v57 }
  0xf2   :  { %402 = vtanh.f32 %v346_v59  ;;  %v347_v0 = vmul.f32 0.7978846, %v339_v60  ;;  %v349_v1 = vmul.f32 0.7978846, %v341_v61  ;;  %v340_v2 = vadd.f32 %v332_v62, %v666_v40 }
  0xf3   :  { %v342_v4 = vadd.f32 %v334_v63, %v668_v41 }
  0xf4   :  { %404 = vtanh.f32 %v347_v0  ;;  %v348_v5 = vmul.f32 0.7978846, %v340_v2 }
  0xf5   :  { %406 = vtanh.f32 %v349_v1  ;;  %v350_v6 = vmul.f32 0.7978846, %v342_v4 }
  0xf6   :  { %408 = vtanh.f32 %v348_v5 }
  0xf7   :  { %410 = vtanh.f32 %v350_v6 }
  0xfc   :  { %v397_v7 = vpop.eup %396 }
  0xfd   :  { %v399_v8 = vpop.eup %398  ;;  %v359_v9 = vadd.f32 1.0, %v397_v7 }
  0xfe   :  { %v401_v10 = vpop.eup %400  ;;  %v361_v11 = vadd.f32 1.0, %v399_v8 }
  0xff   :  { %v403_v12 = vpop.eup %402  ;;  %v367_v13 = vmul.f32 0.5, %v359_v9  ;;  %v360_v3 = vadd.f32 1.0, %v401_v10 }
 0x100   :  { %v369_v14 = vmul.f32 0.5, %v361_v11  ;;  %v362_v15 = vadd.f32 1.0, %v403_v12 }
 0x101   :  { %v405_v18 = vpop.eup %404  ;;  %v375_v19 = vmul.f32 %v367_v13, %v638_v16  ;;  %v368_v20 = vmul.f32 0.5, %v360_v3 }
 0x102   :  { %v407_v21 = vpop.eup %406  ;;  %v377_v24 = vmul.f32 %v369_v14, %v640_v17  ;;  %v370_v25 = vmul.f32 0.5, %v362_v15  ;;  %v363_v26 = vadd.f32 1.0, %v405_v18 }
 0x103   :  { %v409_v27 = vpop.eup %408  ;;  %383 = vst [vmem:[%s721_s3] sm:$0xff] %v375_v19  ;;  %v376_v28 = vmul.f32 %v368_v20, %v646_v22  ;;  %v365_v29 = vadd.f32 1.0, %v407_v21 }
 0x104   :  { %v411_v32 = vpop.eup %410  ;;  %385 = vst [vmem:[%s721_s3 + $0x10] sm:$0xff] %v377_v24  ;;  %v378_v16 = vmul.f32 %v370_v25, %v648_v23  ;;  %v371_v33 = vmul.f32 0.5, %v363_v26  ;;  %v364_v34 = vadd.f32 1.0, %v409_v27 }
 0x105   :  { %384 = vst [vmem:[%s721_s3 + $0x8] sm:$0xff] %v376_v28  ;;  %v373_v17 = vmul.f32 0.5, %v365_v29  ;;  %v366_v35 = vadd.f32 1.0, %v411_v32 }
 0x106   :  { %386 = vst [vmem:[%s721_s3 + $0x18] sm:$0xff] %v378_v16  ;;  %v379_v22 = vmul.f32 %v371_v33, %v656_v30  ;;  %v372_v36 = vmul.f32 0.5, %v364_v34 }
 0x107   :  { %v381_v37 = vmul.f32 %v373_v17, %v658_v31  ;;  %v374_v38 = vmul.f32 0.5, %v366_v35 }
 0x108   :  { %387 = vst [vmem:[%s721_s3 + $0x20] sm:$0xff] %v379_v22  ;;  %v380_v23 = vmul.f32 %v372_v36, %v666_v40 }
 0x109   :  { %389 = vst [vmem:[%s721_s3 + $0x30] sm:$0xff] %v381_v37  ;;  %v382_v39 = vmul.f32 %v374_v38, %v668_v41 }
 0x10a   :  { %388 = vst [vmem:[%s721_s3 + $0x28] sm:$0xff] %v380_v23 }
 0x10b   :  { %390 = vst [vmem:[%s721_s3 + $0x38] sm:$0xff] %v382_v39 }

// kernel: text_decoder_forward.43
= control target key start
LH: loop header
LB: loop body
LE: loop exit
PB: predicated region body
PF: predicated region fallthrough
CT: control target
= control target key end

     0   :  { %s107_s0 = inlined_call_operand.vmem [shape: f32[16,128], index: 0, kind: input, shape index: {}]   ;;  %s108_s1 = inlined_call_operand.vmem [shape: f32[1,128], index: 1, kind: input, shape index: {}]   ;;  %s109_s2 = inlined_call_operand.vmem [shape: f32[1,128], index: 2, kind: input, shape index: {}]   ;;  %s110_s3 = inlined_call_operand.vmem [shape: f32[16,128], index: 3, kind: output, shape index: {}]  }
   0x1   :  { %v14_v0 = vld [vmem:[%s107_s0] sm:$0xff]  ;;  %v15_v1 = vld [vmem:[%s107_s0 + $0x8] sm:$0xff] }
   0x2   :  { %16 = vadd.xlane.f32.xlu0 %v14_v0  ;;  %v63_v17 = vld [vmem:[%s108_s1] ss:$0 sm:$0xff] }
   0x3   :  { %v64_v19 = vld [vmem:[%s109_s2] ss:$0 sm:$0xff] }
   0x6   :  { %18 = vadd.xlane.f32.xlu0 %v15_v1 }
  0x8b   :  { %v17_v2 = vpop.xlane.xlu0 %16 }
  0x8c   :  { %v21_v3 = vmul.f32 0.0078125, %v17_v2 }
  0x8e   :  { %v23_v4 = vsub.f32 %v14_v0, %v21_v3 }
  0x8f   :  { %v19_v5 = vpop.xlane.xlu0 %18 }
  0x90   :  { %v22_v6 = vmul.f32 0.0078125, %v19_v5  ;;  %v25_v7 = vmul.f32 %v23_v4, %v23_v4 }
  0x92   :  { %v24_v8 = vsub.f32 %v15_v1, %v22_v6  ;;  %27 = vadd.xlane.f32.xlu1 %v25_v7 }
  0x94   :  { %v26_v9 = vmul.f32 %v24_v8, %v24_v8 }
  0x96   :  { %29 = vadd.xlane.f32.xlu1 %v26_v9 }
 0x11b   :  { %v28_v10 = vpop.xlane.xlu1 %27 }
 0x11c   :  { %v31_v11 = vmul.f32 0.0078125, %v28_v10 }
 0x11e   :  { %v33_v12 = vadd.f32 1e-05, %v31_v11 }
 0x11f   :  { %v30_v13 = vpop.xlane.xlu1 %29 }
 0x120   :  { %65 = vrsqrt.f32 %v33_v12  ;;  %v32_v14 = vmul.f32 0.0078125, %v30_v13 }
 0x122   :  { %v34_v15 = vadd.f32 1e-05, %v32_v14 }
 0x124   :  { %67 = vrsqrt.f32 %v34_v15 }
 0x12d   :  { %v66_v16 = vpop.eup %65 }
 0x12e   :  { %v37_v18 = vmul.f32 %v66_v16, %v23_v4 }
 0x130   :  { %v46_v20 = vmul.f32 %v63_v17, %v37_v18 }
 0x131   :  { %v68_v21 = vpop.eup %67 }
 0x132   :  { %v55_v22 = vadd.f32 %v64_v19, %v46_v20  ;;  %v38_v23 = vmul.f32 %v68_v21, %v24_v8 }
 0x134   :  { %57 = vst [vmem:[%s110_s3] sm:$0xff] %v55_v22  ;;  %v47_v24 = vmul.f32 %v63_v17, %v38_v23 }
 0x136   :  { %v56_v25 = vadd.f32 %v64_v19, %v47_v24 }
 0x138   :  { %58 = vst [vmem:[%s110_s3 + $0x8] sm:$0xff] %v56_v25 }

// kernel: text_decoder_forward.42
= control target key start
LH: loop header
LB: loop body
LE: loop exit
PB: predicated region body
PF: predicated region fallthrough
CT: control target
= control target key end

     0   :  { %s298_s1 = inlined_call_operand.vmem [shape: f32[128,128], index: 1, kind: input, shape index: {}]   ;;  %s299_s0 = inlined_call_operand.vmem [shape: f32[16,128], index: 0, kind: input, shape index: {}]   ;;  %s300_s2 = inlined_call_operand.vmem [shape: f32[1,128], index: 2, kind: input, shape index: {}]   ;;  %s301_s3 = inlined_call_operand.vmem [shape: f32[16,128], index: 3, kind: output, shape index: {}]  }
   0x1   :  { %v39_v0 = vld [vmem:[%s298_s1 + $0x78] sm:$0xff]  ;;  %v38_v1 = vld [vmem:[%s298_s1 + $0x70] sm:$0xff]  ;;  %v37_v2 = vld [vmem:[%s298_s1 + $0x68] sm:$0xff] }
   0x2   :  { %176 = vmatprep.subr.mxu0 %v39_v0  ;;  %v36_v3 = vld [vmem:[%s298_s1 + $0x60] sm:$0xff]  ;;  %v35_v5 = vld [vmem:[%s298_s1 + $0x58] sm:$0xff]  ;;  %v34_v6 = vld [vmem:[%s298_s1 + $0x50] sm:$0xff] }
   0x3   :  { %177 = vmatpush3.msra.mxu0 %v39_v0  ;;  %v22_v4 = vld [vmem:[%s299_s0] sm:$0xff]  ;;  %v33_v7 = vld [vmem:[%s298_s1 + $0x48] sm:$0xff]  ;;  %v31_v9 = vld [vmem:[%s298_s1 + $0x38] sm:$0xff] }
   0x4   :  { %178 = vmatprep.subr.mxu0 %v38_v1  ;;  %208 = vmatprep.mubr.f32.mxu0 %v22_v4  ;;  %v32_v8 = vld [vmem:[%s298_s1 + $0x40] sm:$0xff]  ;;  %v30_v10 = vld [vmem:[%s298_s1 + $0x30] sm:$0xff]  ;;  %v29_v11 = vld [vmem:[%s298_s1 + $0x28] sm:$0xff] }
   0x5   :  { %179 = vmatpush3.msra.mxu0 %v38_v1  ;;  %v28_v12 = vld [vmem:[%s298_s1 + $0x20] sm:$0xff]  ;;  %v27_v13 = vld [vmem:[%s298_s1 + $0x18] sm:$0xff]  ;;  %v26_v14 = vld [vmem:[%s298_s1 + $0x10] sm:$0xff] }
   0x6   :  { %180 = vmatprep.subr.mxu0 %v37_v2  ;;  %v25_v15 = vld [vmem:[%s298_s1 + $0x8] sm:$0xff]  ;;  %v24_v16 = vld [vmem:[%s298_s1] sm:$0xff] }
   0x7   :  { %181 = vmatpush3.msra.mxu0 %v37_v2  ;;  %v23_v17 = vld [vmem:[%s299_s0 + $0x8] sm:$0xff]  ;;  %v157_v18 = vld [vmem:[%s300_s2] ss:$0 sm:$0xff] }
   0x8   :  { %182 = vmatprep.subr.mxu0 %v36_v3 }
   0x9   :  { %183 = vmatpush3.msra.mxu0 %v36_v3 }
   0xa   :  { %184 = vmatprep.subr.mxu0 %v35_v5 }
   0xb   :  { %185 = vmatpush3.msra.mxu0 %v35_v5 }
   0xc   :  { %186 = vmatprep.subr.mxu0 %v34_v6 }
   0xd   :  { %187 = vmatpush3.msra.mxu0 %v34_v6 }
   0xe   :  { %188 = vmatprep.subr.mxu0 %v33_v7 }
   0xf   :  { %189 = vmatpush3.msra.mxu0 %v33_v7 }
  0x10   :  { %190 = vmatprep.subr.mxu0 %v32_v8 }
  0x11   :  { %191 = vmatpush3.msra.mxu0 %v32_v8 }
  0x12   :  { %192 = vmatprep.subr.mxu0 %v31_v9 }
  0x13   :  { %193 = vmatpush3.msra.mxu0 %v31_v9 }
  0x14   :  { %194 = vmatprep.subr.mxu0 %v30_v10 }
  0x15   :  { %195 = vmatpush3.msra.mxu0 %v30_v10 }
  0x16   :  { %196 = vmatprep.subr.mxu0 %v29_v11 }
  0x17   :  { %197 = vmatpush3.msra.mxu0 %v29_v11 }
  0x18   :  { %198 = vmatprep.subr.mxu0 %v28_v12 }
  0x19   :  { %199 = vmatpush3.msra.mxu0 %v28_v12 }
  0x1a   :  { %200 = vmatprep.subr.mxu0 %v27_v13 }
  0x1b   :  { %201 = vmatpush3.msra.mxu0 %v27_v13 }
  0x1c   :  { %202 = vmatprep.subr.mxu0 %v26_v14 }
  0x1d   :  { %203 = vmatpush3.msra.mxu0 %v26_v14 }
  0x1e   :  { %204 = vmatprep.subr.mxu0 %v25_v15 }
  0x1f   :  { %205 = vmatpush3.msra.mxu0 %v25_v15 }
  0x20   :  { %206 = vmatprep.subr.mxu0 %v24_v16 }
  0x21   :  { %207 = vmatpush3.msra.mxu0 %v24_v16 }
  0x22   :  { %209 = vmatmul.mubr.f32.vlgmr.msra.gmra.mxu0 %v23_v17 }
  0xe2   :  { %v210_v19 = vpop.f32.mrf.mxu0 }
  0xe3   :  { %v132_v20 = vadd.f32 %v210_v19, %v157_v18 }
  0xe4   :  { %v106_v21 = vpop.f32.mrf.mxu0 }
  0xe5   :  { %v134_v22 = vmul.f32 %v132_v20, %v132_v20  ;;  %v131_v23 = vadd.f32 %v157_v18, %v106_v21 }
  0xe7   :  { %v136_v24 = vmul.f32 %v134_v22, %v132_v20  ;;  %v133_v25 = vmul.f32 %v131_v23, %v131_v23 }
  0xe9   :  { %v138_v26 = vmul.f32 0.044715, %v136_v24  ;;  %v135_v27 = vmul.f32 %v133_v25, %v131_v23 }
  0xeb   :  { %v140_v28 = vadd.f32 %v138_v26, %v132_v20  ;;  %v137_v29 = vmul.f32 0.044715, %v135_v27 }
  0xed   :  { %v142_v30 = vmul.f32 0.7978846, %v140_v28  ;;  %v139_v31 = vadd.f32 %v137_v29, %v131_v23 }
  0xef   :  { %211 = vtanh.f32 %v142_v30  ;;  %v141_v32 = vmul.f32 0.7978846, %v139_v31 }
  0xf1   :  { %213 = vtanh.f32 %v141_v32 }
  0xfc   :  { %v212_v33 = vpop.eup %211 }
  0xfd   :  { %v146_v34 = vadd.f32 1.0, %v212_v33 }
  0xfe   :  { %v214_v35 = vpop.eup %213 }
  0xff   :  { %v148_v36 = vmul.f32 0.5, %v146_v34  ;;  %v145_v37 = vadd.f32 1.0, %v214_v35 }
 0x101   :  { %v150_v38 = vmul.f32 %v148_v36, %v132_v20  ;;  %v147_v39 = vmul.f32 0.5, %v145_v37 }
 0x103   :  { %152 = vst [vmem:[%s301_s3 + $0x8] sm:$0xff] %v150_v38  ;;  %v149_v40 = vmul.f32 %v147_v39, %v131_v23 }
 0x105   :  { %151 = vst [vmem:[%s301_s3] sm:$0xff] %v149_v40 }

// kernel: text_decoder_forward.32
= control target key start
LH: loop header
LB: loop body
LE: loop exit
PB: predicated region body
PF: predicated region fallthrough
CT: control target
= control target key end

     0   :  { %s677_s1 = inlined_call_operand.vmem [shape: f32[512,128], index: 1, kind: input, shape index: {}]   ;;  %s678_s0 = inlined_call_operand.vmem [shape: f32[16,512], index: 0, kind: input, shape index: {}]   ;;  %s679_s2 = inlined_call_operand.vmem [shape: f32[1,128], index: 2, kind: input, shape index: {}]   ;;  %s680_s3 = inlined_call_operand.vmem [shape: f32[16,128], index: 3, kind: input, shape index: {}]   ;;  %s681_s4 = inlined_call_operand.vmem [shape: f32[1,128], index: 4, kind: input, shape index: {}]   ;;  %s682_s5 = inlined_call_operand.vmem [shape: f32[1,128], index: 5, kind: input, shape index: {}]   ;;  %s683_s6 = inlined_call_operand.vmem [shape: f32[16,128], index: 6, kind: output, shape index: {}]  }
   0x1   :  { %v70_v0 = vld [vmem:[%s677_s1 + $0xf8] sm:$0xff]  ;;  %v69_v4 = vld [vmem:[%s677_s1 + $0xf0] sm:$0xff]  ;;  %v68_v8 = vld [vmem:[%s677_s1 + $0xe8] sm:$0xff] }
   0x2   :  { %v102_v1 = vld [vmem:[%s677_s1 + $0x1f8] sm:$0xff]  ;;  %325 = vmatprep.subr.mxu0 %v70_v0  ;;  %v101_v5 = vld [vmem:[%s677_s1 + $0x1f0] sm:$0xff]  ;;  %v100_v9 = vld [vmem:[%s677_s1 + $0x1e8] sm:$0xff] }
   0x3   :  { %v54_v2 = vld [vmem:[%s677_s1 + $0x78] sm:$0xff]  ;;  %363 = vmatprep.subr.mxu1 %v102_v1  ;;  %v53_v6 = vld [vmem:[%s677_s1 + $0x70] sm:$0xff]  ;;  %v52_v10 = vld [vmem:[%s677_s1 + $0x68] sm:$0xff] }
   0x4   :  { %v86_v3 = vld [vmem:[%s677_s1 + $0x178] sm:$0xff]  ;;  %326 = vmatpush3.msra.mxu0 %v54_v2  ;;  %v85_v7 = vld [vmem:[%s677_s1 + $0x170] sm:$0xff]  ;;  %v84_v11 = vld [vmem:[%s677_s1 + $0x168] sm:$0xff] }
   0x5   :  { %364 = vmatpush3.msra.mxu1 %v86_v3  ;;  %327 = vmatprep.subr.mxu0 %v69_v4  ;;  %v67_v12 = vld [vmem:[%s677_s1 + $0xe0] sm:$0xff]  ;;  %v66_v16 = vld [vmem:[%s677_s1 + $0xd8] sm:$0xff]  ;;  %v65_v20 = vld [vmem:[%s677_s1 + $0xd0] sm:$0xff] }
   0x6   :  { %365 = vmatprep.subr.mxu1 %v101_v5  ;;  %328 = vmatpush3.msra.mxu0 %v53_v6  ;;  %v99_v13 = vld [vmem:[%s677_s1 + $0x1e0] sm:$0xff]  ;;  %v98_v17 = vld [vmem:[%s677_s1 + $0x1d8] sm:$0xff]  ;;  %v97_v21 = vld [vmem:[%s677_s1 + $0x1d0] sm:$0xff] }
   0x7   :  { %366 = vmatpush3.msra.mxu1 %v85_v7  ;;  %329 = vmatprep.subr.mxu0 %v68_v8  ;;  %v51_v14 = vld [vmem:[%s677_s1 + $0x60] sm:$0xff]  ;;  %v50_v18 = vld [vmem:[%s677_s1 + $0x58] sm:$0xff]  ;;  %v49_v22 = vld [vmem:[%s677_s1 + $0x50] sm:$0xff] }
   0x8   :  { %367 = vmatprep.subr.mxu1 %v100_v9  ;;  %v83_v15 = vld [vmem:[%s677_s1 + $0x160] sm:$0xff]  ;;  %330 = vmatpush3.msra.mxu0 %v52_v10  ;;  %v82_v19 = vld [vmem:[%s677_s1 + $0x158] sm:$0xff]  ;;  %v81_v23 = vld [vmem:[%s677_s1 + $0x150] sm:$0xff] }
   0x9   :  { %368 = vmatpush3.msra.mxu1 %v84_v11  ;;  %331 = vmatprep.subr.mxu0 %v67_v12  ;;  %v64_v24 = vld [vmem:[%s677_s1 + $0xc8] sm:$0xff]  ;;  %v63_v28 = vld [vmem:[%s677_s1 + $0xc0] sm:$0xff]  ;;  %v62_v32 = vld [vmem:[%s677_s1 + $0xb8] sm:$0xff] }
   0xa   :  { %369 = vmatprep.subr.mxu1 %v99_v13  ;;  %332 = vmatpush3.msra.mxu0 %v51_v14  ;;  %v96_v25 = vld [vmem:[%s677_s1 + $0x1c8] sm:$0xff]  ;;  %v95_v29 = vld [vmem:[%s677_s1 + $0x1c0] sm:$0xff]  ;;  %v94_v33 = vld [vmem:[%s677_s1 + $0x1b8] sm:$0xff] }
   0xb   :  { %370 = vmatpush3.msra.mxu1 %v83_v15  ;;  %333 = vmatprep.subr.mxu0 %v66_v16  ;;  %v48_v26 = vld [vmem:[%s677_s1 + $0x48] sm:$0xff]  ;;  %v47_v30 = vld [vmem:[%s677_s1 + $0x40] sm:$0xff]  ;;  %v46_v34 = vld [vmem:[%s677_s1 + $0x38] sm:$0xff] }
   0xc   :  { %371 = vmatprep.subr.mxu1 %v98_v17  ;;  %334 = vmatpush3.msra.mxu0 %v50_v18  ;;  %v80_v27 = vld [vmem:[%s677_s1 + $0x148] sm:$0xff]  ;;  %v79_v31 = vld [vmem:[%s677_s1 + $0x140] sm:$0xff]  ;;  %v78_v35 = vld [vmem:[%s677_s1 + $0x138] sm:$0xff] }
   0xd   :  { %372 = vmatpush3.msra.mxu1 %v82_v19  ;;  %335 = vmatprep.subr.mxu0 %v65_v20  ;;  %v61_v36 = vld [vmem:[%s677_s1 + $0xb0] sm:$0xff]  ;;  %v60_v40 = vld [vmem:[%s677_s1 + $0xa8] sm:$0xff]  ;;  %v59_v44 = vld [vmem:[%s677_s1 + $0xa0] sm:$0xff] }
   0xe   :  { %373 = vmatprep.subr.mxu1 %v97_v21  ;;  %336 = vmatpush3.msra.mxu0 %v49_v22  ;;  %v93_v37 = vld [vmem:[%s677_s1 + $0x1b0] sm:$0xff]  ;;  %v92_v41 = vld [vmem:[%s677_s1 + $0x1a8] sm:$0xff]  ;;  %v91_v45 = vld [vmem:[%s677_s1 + $0x1a0] sm:$0xff] }
   0xf   :  { %374 = vmatpush3.msra.mxu1 %v81_v23  ;;  %337 = vmatprep.subr.mxu0 %v64_v24  ;;  %v45_v38 = vld [vmem:[%s677_s1 + $0x30] sm:$0xff]  ;;  %v44_v42 = vld [vmem:[%s677_s1 + $0x28] sm:$0xff]  ;;  %v43_v46 = vld [vmem:[%s677_s1 + $0x20] sm:$0xff] }
  0x10   :  { %375 = vmatprep.subr.mxu1 %v96_v25  ;;  %338 = vmatpush3.msra.mxu0 %v48_v26  ;;  %v77_v39 = vld [vmem:[%s677_s1 + $0x130] sm:$0xff]  ;;  %v76_v43 = vld [vmem:[%s677_s1 + $0x128] sm:$0xff]  ;;  %v75_v47 = vld [vmem:[%s677_s1 + $0x120] sm:$0xff] }
  0x11   :  { %376 = vmatpush3.msra.mxu1 %v80_v27  ;;  %339 = vmatprep.subr.mxu0 %v63_v28  ;;  %v58_v48 = vld [vmem:[%s677_s1 + $0x98] sm:$0xff]  ;;  %v57_v52 = vld [vmem:[%s677_s1 + $0x90] sm:$0xff]  ;;  %v56_v56 = vld [vmem:[%s677_s1 + $0x88] sm:$0xff] }
  0x12   :  { %377 = vmatprep.subr.mxu1 %v95_v29  ;;  %340 = vmatpush3.msra.mxu0 %v47_v30  ;;  %v90_v49 = vld [vmem:[%s677_s1 + $0x198] sm:$0xff]  ;;  %v89_v53 = vld [vmem:[%s677_s1 + $0x190] sm:$0xff]  ;;  %v88_v57 = vld [vmem:[%s677_s1 + $0x188] sm:$0xff] }
  0x13   :  { %378 = vmatpush3.msra.mxu1 %v79_v31  ;;  %341 = vmatprep.subr.mxu0 %v62_v32  ;;  %v42_v50 = vld [vmem:[%s677_s1 + $0x18] sm:$0xff]  ;;  %v41_v54 = vld [vmem:[%s677_s1 + $0x10] sm:$0xff]  ;;  %v40_v58 = vld [vmem:[%s677_s1 + $0x8] sm:$0xff] }
  0x14   :  { %379 = vmatprep.subr.mxu1 %v94_v33  ;;  %342 = vmatpush3.msra.mxu0 %v46_v34  ;;  %v74_v51 = vld [vmem:[%s677_s1 + $0x118] sm:$0xff]  ;;  %v73_v55 = vld [vmem:[%s677_s1 + $0x110] sm:$0xff]  ;;  %v72_v59 = vld [vmem:[%s677_s1 + $0x108] sm:$0xff] }
  0x15   :  { %380 = vmatpush3.msra.mxu1 %v78_v35  ;;  %343 = vmatprep.subr.mxu0 %v61_v36  ;;  %v55_v60 = vld [vmem:[%s677_s1 + $0x80] sm:$0xff]  ;;  %v32_v63 = vld [vmem:[%s678_s0 + $0x8] sm:$0xff]  ;;  %v34_v1 = vld [vmem:[%s678_s0 + $0x18] sm:$0xff] }
  0x16   :  { %381 = vmatprep.subr.mxu1 %v93_v37  ;;  %344 = vmatpush3.msra.mxu0 %v45_v38  ;;  %v87_v61 = vld [vmem:[%s677_s1 + $0x180] sm:$0xff]  ;;  %v33_v3 = vld [vmem:[%s678_s0 + $0x10] sm:$0xff]  ;;  %v36_v4 = vld [vmem:[%s678_s0 + $0x28] sm:$0xff] }
  0x17   :  { %382 = vmatpush3.msra.mxu1 %v77_v39  ;;  %345 = vmatprep.subr.mxu0 %v60_v40  ;;  %v39_v62 = vld [vmem:[%s677_s1] sm:$0xff]  ;;  %v38_v5 = vld [vmem:[%s678_s0 + $0x38] sm:$0xff]  ;;  %v37_v7 = vld [vmem:[%s678_s0 + $0x30] sm:$0xff] }
  0x18   :  { %383 = vmatprep.subr.mxu1 %v92_v41  ;;  %346 = vmatpush3.msra.mxu0 %v44_v42  ;;  %v71_v0 = vld [vmem:[%s677_s1 + $0x100] sm:$0xff]  ;;  %v272_v26 = vld [vmem:[%s680_s3 + $0x8] sm:$0xff] }
  0x19   :  { %384 = vmatpush3.msra.mxu1 %v76_v43  ;;  %347 = vmatprep.subr.mxu0 %v59_v44  ;;  %v31_v2 = vld [vmem:[%s678_s0] sm:$0xff] }
  0x1a   :  { %385 = vmatprep.subr.mxu1 %v91_v45  ;;  %348 = vmatpush3.msra.mxu0 %v43_v46  ;;  %v35_v6 = vld [vmem:[%s678_s0 + $0x20] sm:$0xff] }
  0x1b   :  { %386 = vmatpush3.msra.mxu1 %v75_v47  ;;  %349 = vmatprep.subr.mxu0 %v58_v48  ;;  %v322_v16 = vld [vmem:[%s679_s2] ss:$0 sm:$0xff] }
  0x1c   :  { %387 = vmatprep.subr.mxu1 %v90_v49  ;;  %350 = vmatpush3.msra.mxu0 %v42_v50  ;;  %v271_v20 = vld [vmem:[%s680_s3] sm:$0xff] }
  0x1d   :  { %388 = vmatpush3.msra.mxu1 %v74_v51  ;;  %351 = vmatprep.subr.mxu0 %v57_v52  ;;  %v323_v44 = vld [vmem:[%s681_s4] ss:$0 sm:$0xff] }
  0x1e   :  { %389 = vmatprep.subr.mxu1 %v89_v53  ;;  %352 = vmatpush3.msra.mxu0 %v41_v54  ;;  %v324_v46 = vld [vmem:[%s682_s5] ss:$0 sm:$0xff] }
  0x1f   :  { %390 = vmatpush3.msra.mxu1 %v73_v55  ;;  %353 = vmatprep.subr.mxu0 %v56_v56 }
  0x20   :  { %391 = vmatprep.subr.mxu1 %v88_v57  ;;  %354 = vmatpush3.msra.mxu0 %v40_v58 }
  0x21   :  { %392 = vmatpush3.msra.mxu1 %v72_v59  ;;  %355 = vmatprep.subr.mxu0 %v55_v60 }
  0x22   :  { %393 = vmatprep.subr.mxu1 %v87_v61  ;;  %356 = vmatpush3.msra.mxu0 %v39_v62 }
  0x23   :  { %167 = vmatprep.mubr.f32.mxu0 %v32_v63  ;;  %394 = vmatpush3.msra.mxu1 %v71_v0 }
  0x24   :  { %242 = vmatprep.mubr.f32.mxu1 %v34_v1  ;;  %168 = vmatmul.mubr.f32.vlgmr.msra.gmra.mxu0 %v31_v2 }
  0x25   :  { %243 = vmatmul.mubr.f32.vlgmr.msra.gmra.mxu1 %v33_v3  ;;  %172 = vmatprep.mubr.f32.mxu0 %v36_v4 }
  0x26   :  { %247 = vmatprep.mubr.f32.mxu1 %v38_v5 }
  0x28   :  { %173 = vmatmul.mubr.f32.gmra.mxu0 %v35_v6 }
  0x29   :  { %248 = vmatmul.mubr.f32.gmra.mxu1 %v37_v7 }
  0xe4   :  { %v357_v8 = vpop.f32.mrf.mxu0 }
  0xe5   :  { %v395_v9 = vpop.f32.mrf.mxu1 }
  0xe6   :  { %v358_v10 = vpop.f32.mrf.mxu0 }
  0xe7   :  { %v396_v11 = vpop.f32.mrf.mxu1  ;;  %v359_v12 = vadd.f32 %v358_v10, %v357_v8 }
  0xe8   :  { %v397_v13 = vadd.f32 %v396_v11, %v395_v9  ;;  %v360_v14 = vpop.f32.mrf.mxu0 }
  0xe9   :  { %v398_v15 = vpop.f32.mrf.mxu1 }
  0xea   :  { %v245_v17 = vadd.f32 %v397_v13, %v359_v12  ;;  %v361_v18 = vpop.f32.mrf.mxu0 }
  0xeb   :  { %v399_v19 = vpop.f32.mrf.mxu1  ;;  %v362_v21 = vadd.f32 %v361_v18, %v360_v14 }
  0xec   :  { %v400_v22 = vadd.f32 %v399_v19, %v398_v15  ;;  %v269_v23 = vadd.f32 %v322_v16, %v245_v17 }
  0xee   :  { %v250_v24 = vadd.f32 %v400_v22, %v362_v21  ;;  %v273_v25 = vadd.f32 %v271_v20, %v269_v23 }
  0xf0   :  { %275 = vadd.xlane.f32.xlu0 %v273_v25  ;;  %v270_v27 = vadd.f32 %v322_v16, %v250_v24 }
  0xf2   :  { %v274_v28 = vadd.f32 %v272_v26, %v270_v27 }
  0xf4   :  { %277 = vadd.xlane.f32.xlu0 %v274_v28 }
 0x179   :  { %v276_v29 = vpop.xlane.xlu0 %275 }
 0x17a   :  { %v280_v30 = vmul.f32 0.0078125, %v276_v29 }
 0x17c   :  { %v282_v31 = vsub.f32 %v273_v25, %v280_v30 }
 0x17d   :  { %v278_v32 = vpop.xlane.xlu0 %277 }
 0x17e   :  { %v281_v33 = vmul.f32 0.0078125, %v278_v32  ;;  %v284_v34 = vmul.f32 %v282_v31, %v282_v31 }
 0x180   :  { %v283_v35 = vsub.f32 %v274_v28, %v281_v33  ;;  %286 = vadd.xlane.f32.xlu1 %v284_v34 }
 0x182   :  { %v285_v36 = vmul.f32 %v283_v35, %v283_v35 }
 0x184   :  { %288 = vadd.xlane.f32.xlu1 %v285_v36 }
 0x209   :  { %v287_v37 = vpop.xlane.xlu1 %286 }
 0x20a   :  { %v290_v38 = vmul.f32 0.0078125, %v287_v37 }
 0x20c   :  { %v292_v39 = vadd.f32 1e-05, %v290_v38 }
 0x20d   :  { %v289_v40 = vpop.xlane.xlu1 %288 }
 0x20e   :  { %401 = vrsqrt.f32 %v292_v39  ;;  %v291_v41 = vmul.f32 0.0078125, %v289_v40 }
 0x210   :  { %v293_v42 = vadd.f32 1e-05, %v291_v41 }
 0x212   :  { %403 = vrsqrt.f32 %v293_v42 }
 0x21b   :  { %v402_v43 = vpop.eup %401 }
 0x21c   :  { %v296_v45 = vmul.f32 %v402_v43, %v282_v31 }
 0x21e   :  { %v305_v47 = vmul.f32 %v323_v44, %v296_v45 }
 0x21f   :  { %v404_v48 = vpop.eup %403 }
 0x220   :  { %v314_v49 = vadd.f32 %v324_v46, %v305_v47  ;;  %v297_v50 = vmul.f32 %v404_v48, %v283_v35 }
 0x222   :  { %316 = vst [vmem:[%s683_s6] sm:$0xff] %v314_v49  ;;  %v306_v51 = vmul.f32 %v323_v44, %v297_v50 }
 0x224   :  { %v315_v52 = vadd.f32 %v324_v46, %v306_v51 }
 0x226   :  { %317 = vst [vmem:[%s683_s6 + $0x8] sm:$0xff] %v315_v52 }

// kernel: text_decoder_forward.44
= control target key start
LH: loop header
LB: loop body
LE: loop exit
PB: predicated region body
PF: predicated region fallthrough
CT: control target
= control target key end

     0   :  { %v324_v3 = vmov 0.0   ;;  %s574_s1 = inlined_call_operand.vmem [shape: f32[128,512], index: 1, kind: input, shape index: {}]   ;;  %s575_s0 = inlined_call_operand.vmem [shape: f32[16,128], index: 0, kind: input, shape index: {}]   ;;  %s576_s2 = inlined_call_operand.vmem [shape: f32[1,512], index: 2, kind: input, shape index: {}]   ;;  %s577_s3 = inlined_call_operand.vmem [shape: f32[16,512], index: 3, kind: output, shape index: {}]  }
   0x1   :  { %v97_v0 = vld [vmem:[%s574_s1 + $0x1e8] sm:$0xff]  ;;  %v99_v1 = vld [vmem:[%s574_s1 + $0x1f8] sm:$0xff]  ;;  %v96_v2 = vld [vmem:[%s574_s1 + $0x1e0] sm:$0xff]  ;;  %164 = vmatprep.mubr.f32.mxu0 %v324_v3  ;;  %241 = vmatprep.mubr.f32.mxu1 %v324_v3 }
   0x2   :  { %100 = vmatprep.subr.mxu0 %v97_v0  ;;  %177 = vmatprep.subr.mxu1 %v99_v1  ;;  %v98_v4 = vld [vmem:[%s574_s1 + $0x1f0] sm:$0xff]  ;;  %v93_v5 = vld [vmem:[%s574_s1 + $0x1c8] sm:$0xff]  ;;  %v95_v6 = vld [vmem:[%s574_s1 + $0x1d8] sm:$0xff] }
   0x3   :  { %101 = vmatpush1.msra.mxu0 %v96_v2  ;;  %178 = vmatpush1.msra.mxu1 %v98_v4  ;;  %v92_v7 = vld [vmem:[%s574_s1 + $0x1c0] sm:$0xff]  ;;  %v94_v8 = vld [vmem:[%s574_s1 + $0x1d0] sm:$0xff]  ;;  %v89_v9 = vld [vmem:[%s574_s1 + $0x1a8] sm:$0xff]  ;;  %v283_v4 = vlaneseq }
   0x4   :  { %102 = vmatprep.subr.mxu0 %v93_v5  ;;  %179 = vmatprep.subr.mxu1 %v95_v6  ;;  %v91_v10 = vld [vmem:[%s574_s1 + $0x1b8] sm:$0xff]  ;;  %v88_v11 = vld [vmem:[%s574_s1 + $0x1a0] sm:$0xff]  ;;  %v90_v12 = vld [vmem:[%s574_s1 + $0x1b0] sm:$0xff] }
   0x5   :  { %103 = vmatpush1.msra.mxu0 %v92_v7  ;;  %180 = vmatpush1.msra.mxu1 %v94_v8  ;;  %v85_v13 = vld [vmem:[%s574_s1 + $0x188] sm:$0xff]  ;;  %v87_v14 = vld [vmem:[%s574_s1 + $0x198] sm:$0xff]  ;;  %v84_v15 = vld [vmem:[%s574_s1 + $0x180] sm:$0xff]  ;;  %v284_v5 = vshrl.u32 %v283_v4, 7 }
   0x6   :  { %104 = vmatprep.subr.mxu0 %v89_v9  ;;  %181 = vmatprep.subr.mxu1 %v91_v10  ;;  %v86_v16 = vld [vmem:[%s574_s1 + $0x190] sm:$0xff]  ;;  %v81_v17 = vld [vmem:[%s574_s1 + $0x168] sm:$0xff]  ;;  %v83_v18 = vld [vmem:[%s574_s1 + $0x178] sm:$0xff] }
   0x7   :  { %105 = vmatpush1.msra.mxu0 %v88_v11  ;;  %182 = vmatpush1.msra.mxu1 %v90_v12  ;;  %v80_v19 = vld [vmem:[%s574_s1 + $0x160] sm:$0xff]  ;;  %v82_v20 = vld [vmem:[%s574_s1 + $0x170] sm:$0xff]  ;;  %v77_v21 = vld [vmem:[%s574_s1 + $0x148] sm:$0xff]  ;;  %v285_v6 = vsub.s32 0, %v284_v5  ;;  %v293_v7 = vsub.s32 2, %v284_v5  ;;  %v289_v9 = vsub.s32 1, %v284_v5 }
   0x8   :  { %106 = vmatprep.subr.mxu0 %v85_v13  ;;  %183 = vmatprep.subr.mxu1 %v87_v14  ;;  %v79_v22 = vld [vmem:[%s574_s1 + $0x158] sm:$0xff]  ;;  %v76_v23 = vld [vmem:[%s574_s1 + $0x140] sm:$0xff]  ;;  %v78_v24 = vld [vmem:[%s574_s1 + $0x150] sm:$0xff]  ;;  %v297_v10 = vsub.s32 3, %v284_v5 }
   0x9   :  { %107 = vmatpush1.msra.mxu0 %v84_v15  ;;  %184 = vmatpush1.msra.mxu1 %v86_v16  ;;  %v73_v25 = vld [vmem:[%s574_s1 + $0x128] sm:$0xff]  ;;  %v75_v26 = vld [vmem:[%s574_s1 + $0x138] sm:$0xff]  ;;  %v72_v27 = vld [vmem:[%s574_s1 + $0x120] sm:$0xff] }
   0xa   :  { %108 = vmatprep.subr.mxu0 %v81_v17  ;;  %185 = vmatprep.subr.mxu1 %v83_v18  ;;  %v74_v28 = vld [vmem:[%s574_s1 + $0x130] sm:$0xff]  ;;  %v69_v29 = vld [vmem:[%s574_s1 + $0x108] sm:$0xff]  ;;  %v71_v30 = vld [vmem:[%s574_s1 + $0x118] sm:$0xff] }
   0xb   :  { %109 = vmatpush1.msra.mxu0 %v80_v19  ;;  %186 = vmatpush1.msra.mxu1 %v82_v20  ;;  %v68_v31 = vld [vmem:[%s574_s1 + $0x100] sm:$0xff]  ;;  %v70_v32 = vld [vmem:[%s574_s1 + $0x110] sm:$0xff]  ;;  %v65_v33 = vld [vmem:[%s574_s1 + $0xe8] sm:$0xff] }
   0xc   :  { %110 = vmatprep.subr.mxu0 %v77_v21  ;;  %187 = vmatprep.subr.mxu1 %v79_v22  ;;  %v67_v34 = vld [vmem:[%s574_s1 + $0xf8] sm:$0xff]  ;;  %v64_v35 = vld [vmem:[%s574_s1 + $0xe0] sm:$0xff]  ;;  %v66_v36 = vld [vmem:[%s574_s1 + $0xf0] sm:$0xff] }
   0xd   :  { %111 = vmatpush1.msra.mxu0 %v76_v23  ;;  %188 = vmatpush1.msra.mxu1 %v78_v24  ;;  %v61_v37 = vld [vmem:[%s574_s1 + $0xc8] sm:$0xff]  ;;  %v63_v38 = vld [vmem:[%s574_s1 + $0xd8] sm:$0xff]  ;;  %v60_v39 = vld [vmem:[%s574_s1 + $0xc0] sm:$0xff] }
   0xe   :  { %112 = vmatprep.subr.mxu0 %v73_v25  ;;  %189 = vmatprep.subr.mxu1 %v75_v26  ;;  %v62_v40 = vld [vmem:[%s574_s1 + $0xd0] sm:$0xff]  ;;  %v57_v41 = vld [vmem:[%s574_s1 + $0xa8] sm:$0xff]  ;;  %v59_v42 = vld [vmem:[%s574_s1 + $0xb8] sm:$0xff] }
   0xf   :  { %113 = vmatpush1.msra.mxu0 %v72_v27  ;;  %190 = vmatpush1.msra.mxu1 %v74_v28  ;;  %v56_v43 = vld [vmem:[%s574_s1 + $0xa0] sm:$0xff]  ;;  %v58_v44 = vld [vmem:[%s574_s1 + $0xb0] sm:$0xff]  ;;  %v53_v45 = vld [vmem:[%s574_s1 + $0x88] sm:$0xff] }
  0x10   :  { %114 = vmatprep.subr.mxu0 %v69_v29  ;;  %191 = vmatprep.subr.mxu1 %v71_v30  ;;  %v55_v46 = vld [vmem:[%s574_s1 + $0x98] sm:$0xff]  ;;  %v52_v47 = vld [vmem:[%s574_s1 + $0x80] sm:$0xff]  ;;  %v54_v48 = vld [vmem:[%s574_s1 + $0x90] sm:$0xff] }
  0x11   :  { %115 = vmatpush1.msra.mxu0 %v68_v31  ;;  %192 = vmatpush1.msra.mxu1 %v70_v32  ;;  %v49_v49 = vld [vmem:[%s574_s1 + $0x68] sm:$0xff]  ;;  %v51_v50 = vld [vmem:[%s574_s1 + $0x78] sm:$0xff]  ;;  %v48_v51 = vld [vmem:[%s574_s1 + $0x60] sm:$0xff] }
  0x12   :  { %116 = vmatprep.subr.mxu0 %v65_v33  ;;  %193 = vmatprep.subr.mxu1 %v67_v34  ;;  %v50_v52 = vld [vmem:[%s574_s1 + $0x70] sm:$0xff]  ;;  %v45_v53 = vld [vmem:[%s574_s1 + $0x48] sm:$0xff]  ;;  %v47_v54 = vld [vmem:[%s574_s1 + $0x58] sm:$0xff] }
  0x13   :  { %117 = vmatpush1.msra.mxu0 %v64_v35  ;;  %194 = vmatpush1.msra.mxu1 %v66_v36  ;;  %v44_v55 = vld [vmem:[%s574_s1 + $0x40] sm:$0xff]  ;;  %v46_v56 = vld [vmem:[%s574_s1 + $0x50] sm:$0xff]  ;;  %v41_v57 = vld [vmem:[%s574_s1 + $0x28] sm:$0xff] }
  0x14   :  { %118 = vmatprep.subr.mxu0 %v61_v37  ;;  %195 = vmatprep.subr.mxu1 %v63_v38  ;;  %v43_v58 = vld [vmem:[%s574_s1 + $0x38] sm:$0xff]  ;;  %v40_v59 = vld [vmem:[%s574_s1 + $0x20] sm:$0xff]  ;;  %v42_v60 = vld [vmem:[%s574_s1 + $0x30] sm:$0xff] }
  0x15   :  { %119 = vmatpush1.msra.mxu0 %v60_v39  ;;  %196 = vmatpush1.msra.mxu1 %v62_v40  ;;  %v37_v61 = vld [vmem:[%s574_s1 + $0x8] sm:$0xff]  ;;  %v39_v62 = vld [vmem:[%s574_s1 + $0x18] sm:$0xff]  ;;  %v36_v63 = vld [vmem:[%s574_s1] sm:$0xff] }
  0x16   :  { %120 = vmatprep.subr.mxu0 %v57_v41  ;;  %197 = vmatprep.subr.mxu1 %v59_v42  ;;  %v38_v0 = vld [vmem:[%s574_s1 + $0x10] sm:$0xff]  ;;  %v34_v1 = vld [vmem:[%s575_s0] sm:$0xff]  ;;  %v35_v2 = vld [vmem:[%s575_s0 + $0x8] sm:$0xff] }
  0x17   :  { %121 = vmatpush1.msra.mxu0 %v56_v43  ;;  %198 = vmatpush1.msra.mxu1 %v58_v44  ;;  %v281_v8 = vld [vmem:[%s576_s2] sm:$0xf] }
  0x18   :  { %122 = vmatprep.subr.mxu0 %v53_v45  ;;  %199 = vmatprep.subr.mxu1 %v55_v46  ;;  %v286_v11 = vrot.slane %v281_v8, %v285_v6  ;;  %v294_v12 = vrot.slane %v281_v8, %v293_v7  ;;  %v290_v13 = vrot.slane %v281_v8, %v289_v9 }
  0x19   :  { %123 = vmatpush1.msra.mxu0 %v52_v47  ;;  %200 = vmatpush1.msra.mxu1 %v54_v48 }
  0x1a   :  { %124 = vmatprep.subr.mxu0 %v49_v49  ;;  %201 = vmatprep.subr.mxu1 %v51_v50 }
  0x1b   :  { %125 = vmatpush1.msra.mxu0 %v48_v51  ;;  %202 = vmatpush1.msra.mxu1 %v50_v52 }
  0x1c   :  { %126 = vmatprep.subr.mxu0 %v45_v53  ;;  %203 = vmatprep.subr.mxu1 %v47_v54 }
  0x1d   :  { %127 = vmatpush1.msra.mxu0 %v44_v55  ;;  %204 = vmatpush1.msra.mxu1 %v46_v56 }
  0x1e   :  { %128 = vmatprep.subr.mxu0 %v41_v57  ;;  %205 = vmatprep.subr.mxu1 %v43_v58 }
  0x1f   :  { %129 = vmatpush1.msra.mxu0 %v40_v59  ;;  %206 = vmatpush1.msra.mxu1 %v42_v60 }
  0x20   :  { %130 = vmatprep.subr.mxu0 %v37_v61  ;;  %207 = vmatprep.subr.mxu1 %v39_v62 }
  0x21   :  { %131 = vmatpush1.msra.mxu0 %v36_v63  ;;  %208 = vmatpush1.msra.mxu1 %v38_v0 }
  0x22   :  { %165 = vmatmul.mubr.f32.vlgmr.msra.gmra.mxu0 %v34_v1  ;;  %242 = vmatmul.mubr.f32.vlgmr.msra.gmra.mxu1 %v34_v1 }
  0x23   :  { %170 = vmatprep.mubr.f32.mxu0 %v324_v3  ;;  %247 = vmatprep.mubr.f32.mxu1 %v324_v3  ;;  %v298_v3 = vrot.slane %v281_v8, %v297_v10 }
  0x26   :  { %171 = vmatmul.mubr.f32.gmra.mxu0 %v35_v2  ;;  %248 = vmatmul.mubr.f32.gmra.mxu1 %v35_v2 }
  0xe2   :  { %v166_v14 = vpop.f32.mrf.mxu0  ;;  %v243_v15 = vpop.f32.mrf.mxu1 }
  0xe3   :  { %v303_v16 = vadd.f32 %v286_v11, %v166_v14  ;;  %v305_v17 = vadd.f32 %v294_v12, %v243_v15 }
  0xe4   :  { %v168_v18 = vpop.f32.mrf.mxu0  ;;  %v245_v19 = vpop.f32.mrf.mxu1 }
  0xe5   :  { %311 = vst [vmem:[%s577_s3] sm:$0xff] %v303_v16  ;;  %313 = vst [vmem:[%s577_s3 + $0x10] sm:$0xff] %v305_v17  ;;  %v304_v20 = vadd.f32 %v290_v13, %v168_v18  ;;  %v306_v21 = vadd.f32 %v298_v3, %v245_v19 }
  0xe6   :  { %v172_v22 = vpop.f32.mrf.mxu0  ;;  %v249_v23 = vpop.f32.mrf.mxu1 }
  0xe7   :  { %312 = vst [vmem:[%s577_s3 + $0x8] sm:$0xff] %v304_v20  ;;  %314 = vst [vmem:[%s577_s3 + $0x18] sm:$0xff] %v306_v21  ;;  %v307_v24 = vadd.f32 %v286_v11, %v172_v22  ;;  %v309_v25 = vadd.f32 %v294_v12, %v249_v23 }
  0xe8   :  { %v174_v26 = vpop.f32.mrf.mxu0  ;;  %v251_v27 = vpop.f32.mrf.mxu1 }
  0xe9   :  { %315 = vst [vmem:[%s577_s3 + $0x20] sm:$0xff] %v307_v24  ;;  %317 = vst [vmem:[%s577_s3 + $0x30] sm:$0xff] %v309_v25  ;;  %v308_v28 = vadd.f32 %v290_v13, %v174_v26  ;;  %v310_v29 = vadd.f32 %v298_v3, %v251_v27 }
  0xeb   :  { %316 = vst [vmem:[%s577_s3 + $0x28] sm:$0xff] %v308_v28  ;;  %318 = vst [vmem:[%s577_s3 + $0x38] sm:$0xff] %v310_v29 }

// kernel: text_decoder_forward.45
= control target key start
LH: loop header
LB: loop body
LE: loop exit
PB: predicated region body
PF: predicated region fallthrough
CT: control target
= control target key end

     0   :  { %v175_v3 = vmov 0   ;;  %v71_v17 = vlaneseq  ;;  %v176_v42 = vmov 0.0   ;;  %vm134_vm10 = vcmask 7168   ;;  %s300_s0 = inlined_call_operand.vmem [shape: f32[16,512], index: 0, kind: input, shape index: {}]   ;;  %s301_s1 = inlined_call_operand.vmem [shape: s32[16,1], index: 1, kind: input, shape index: {}]   ;;  %s302_s2 = inlined_call_operand.vmem [shape: f32[16,1], index: 2, kind: output, shape index: {}]  }
   0x1   :  { %v195_v0 = vld [vmem:[%s300_s0] sm:$0xff]  ;;  %v200_v1 = vld [vmem:[%s300_s0 + $0x8] sm:$0xff]  ;;  %v205_v2 = vld [vmem:[%s300_s0 + $0x10] sm:$0xff]  ;;  %153 = vset.pattern.permute.xlu1 %v175_v3  ;;  %154 = vset.pattern.permute.xlu0 %v175_v3 }
   0x2   :  { %v210_v4 = vld [vmem:[%s300_s0 + $0x18] sm:$0xff]  ;;  %v21_v5 = vmax.f32 %v195_v0, %v205_v2  ;;  %v217_v6 = vld [vmem:[%s300_s0 + $0x20] sm:$0xff]  ;;  %v222_v7 = vld [vmem:[%s300_s0 + $0x28] sm:$0xff]  ;;  %v72_v19 = vand.u32 127, %v71_v17 }
   0x3   :  { %v22_v8 = vmax.f32 %v200_v1, %v210_v4  ;;  %v229_v9 = vld [vmem:[%s300_s0 + $0x30] sm:$0xff]  ;;  %v234_v10 = vld [vmem:[%s300_s0 + $0x38] sm:$0xff]  ;;  %v239_v11 = vld [vmem:[%s301_s1] sm:$0xff] }
   0x4   :  { %v26_v12 = vmax.f32 %v217_v6, %v229_v9  ;;  %v27_v13 = vmax.f32 %v222_v7, %v234_v10  ;;  %77 = vperm.xlu1 %153, %v239_v11   ;;  %v249_v15 = vld [vmem:[%s301_s1 + $0x8] sm:$0xff]  ;;  %v73_v30 = vadd.s32 128, %v72_v19  ;;  %v74_v37 = vadd.s32 256, %v72_v19 }
   0x5   :  { %v23_v14 = vmax.f32 %v21_v5, %v22_v8  ;;  %v75_v41 = vadd.s32 384, %v72_v19  ;;  %vm124_vm8 = vcmp.ne.s32.totalorder %v239_v11, 4294967196  ;;  %vm125_vm9 = vcmp.ne.s32.totalorder %v249_v15, 4294967196 }
   0x6   :  { %v28_v16 = vmax.f32 %v26_v12, %v27_v13 }
   0x7   :  { %24 = vmax.xlane.f32.xlu0 %v23_v14 }
   0x8   :  { %80 = vperm.xlu1 %153, %v249_v15  }
   0xb   :  { %29 = vmax.xlane.f32.xlu0 %v28_v16 }
  0x7f   :  { %v78_v27 = vpop.permute.xlu1 %77 }
  0x80   :  { %vm82_vm0 = vcmp.eq.s32.totalorder %v72_v19, %v78_v27  ;;  %vm83_vm1 = vcmp.eq.s32.totalorder %v73_v30, %v78_v27  ;;  %vm84_vm2 = vcmp.eq.s32.totalorder %v74_v37, %v78_v27  ;;  %vm85_vm5 = vcmp.eq.s32.totalorder %v75_v41, %v78_v27 }
  0x81   :  { %v141_v43 = vsel %vm82_vm0, 1.0, %v176_v42  ;;  %v142_v44 = vsel %vm83_vm1, 1.0, %v176_v42  ;;  %v143_v49 = vsel %vm84_vm2, 1.0, %v176_v42  ;;  %v144_v50 = vsel %vm85_vm5, 1.0, %v176_v42 }
  0x82   :  { %v106_v45 = vmul.f32 %v141_v43, %v195_v0  ;;  %v107_v46 = vmul.f32 %v142_v44, %v200_v1  ;;  %v108_v52 = vmul.f32 %v143_v49, %v205_v2  ;;  %v109_v61 = vmul.f32 %v144_v50, %v210_v4 }
  0x83   :  { %v81_v39 = vpop.permute.xlu1 %80 }
  0x84   :  { %vm86_vm3 = vcmp.eq.s32.totalorder %v72_v19, %v81_v39  ;;  %vm87_vm4 = vcmp.eq.s32.totalorder %v73_v30, %v81_v39  ;;  %vm88_vm6 = vcmp.eq.s32.totalorder %v74_v37, %v81_v39  ;;  %v114_v53 = vadd.f32 %v107_v46, %v106_v45 }
  0x85   :  { %v145_v47 = vsel %vm86_vm3, 1.0, %v176_v42  ;;  %v146_v48 = vsel %vm87_vm4, 1.0, %v176_v42  ;;  %v147_v57 = vsel %vm88_vm6, 1.0, %v176_v42  ;;  %vm89_vm7 = vcmp.eq.s32.totalorder %v75_v41, %v81_v39 }
  0x86   :  { %v110_v54 = vmul.f32 %v145_v47, %v217_v6  ;;  %v111_v55 = vmul.f32 %v146_v48, %v222_v7  ;;  %v148_v5 = vsel %vm89_vm7, 1.0, %v176_v42 }
  0x87   :  { %v113_v14 = vmul.f32 %v148_v5, %v234_v10 }
  0x90   :  { %v252_v18 = vpop.xlane.xlu0 %24 }
  0x91   :  { %v31_v20 = vsub.f32 %v195_v0, %v252_v18  ;;  %v32_v21 = vsub.f32 %v200_v1, %v252_v18  ;;  %v33_v22 = vsub.f32 %v205_v2, %v252_v18  ;;  %v34_v23 = vsub.f32 %v210_v4, %v252_v18 }
  0x92   :  { %v115_v0 = vadd.f32 %v114_v53, %v108_v52  ;;  %v112_v1 = vmul.f32 %v147_v57, %v229_v9  ;;  %v119_v2 = vadd.f32 %v111_v55, %v110_v54 }
  0x93   :  { %v39_v24 = vmul.f32 1.442695, %v31_v20  ;;  %v41_v25 = vmul.f32 1.442695, %v32_v21  ;;  %v43_v26 = vmul.f32 1.442695, %v33_v22 }
  0x94   :  { %v45_v28 = vmul.f32 1.442695, %v34_v23  ;;  %v262_v29 = vpop.xlane.xlu0 %29  ;;  %v116_v13 = vadd.f32 %v115_v0, %v109_v61  ;;  %v120_v16 = vadd.f32 %v119_v2, %v112_v1 }
  0x95   :  { %155 = vpow2.f32 %v39_v24  ;;  %v35_v31 = vsub.f32 %v217_v6, %v262_v29  ;;  %v36_v32 = vsub.f32 %v222_v7, %v262_v29  ;;  %v37_v33 = vsub.f32 %v229_v9, %v262_v29 }
  0x96   :  { %157 = vpow2.f32 %v41_v25  ;;  %v38_v34 = vsub.f32 %v234_v10, %v262_v29  ;;  %v121_v19 = vadd.f32 %v120_v16, %v113_v14  ;;  %v149_v10 = vsel %vm124_vm8, 1.0, %v176_v42 }
  0x97   :  { %159 = vpow2.f32 %v43_v26  ;;  %v47_v35 = vmul.f32 1.442695, %v35_v31  ;;  %v49_v36 = vmul.f32 1.442695, %v36_v32  ;;  %v51_v38 = vmul.f32 1.442695, %v37_v33 }
  0x98   :  { %161 = vpow2.f32 %v45_v28  ;;  %v53_v40 = vmul.f32 1.442695, %v38_v34  ;;  %v150_v31 = vsel %vm125_vm9, 1.0, %v176_v42 }
  0x99   :  { %163 = vpow2.f32 %v47_v35 }
  0x9a   :  { %165 = vpow2.f32 %v49_v36 }
  0x9b   :  { %167 = vpow2.f32 %v51_v38 }
  0x9c   :  { %169 = vpow2.f32 %v53_v40 }
  0xa2   :  { %v156_v51 = vpop.eup %155 }
  0xa3   :  { %v158_v56 = vpop.eup %157 }
  0xa4   :  { %v160_v58 = vpop.eup %159  ;;  %v55_v59 = vadd.f32 %v158_v56, %v156_v51 }
  0xa5   :  { %v162_v60 = vpop.eup %161 }
  0xa6   :  { %v164_v62 = vpop.eup %163  ;;  %v56_v63 = vadd.f32 %v160_v58, %v55_v59 }
  0xa7   :  { %v166_v3 = vpop.eup %165 }
  0xa8   :  { %v57_v6 = vadd.f32 %v162_v60, %v56_v63  ;;  %v60_v7 = vadd.f32 %v166_v3, %v164_v62  ;;  %v168_v8 = vpop.eup %167 }
  0xa9   :  { %v170_v17 = vpop.eup %169 }
  0xaa   :  { %58 = vadd.xlane.f32.xlu0 %v57_v6  ;;  %v61_v12 = vadd.f32 %v168_v8, %v60_v7 }
  0xac   :  { %v62_v4 = vadd.f32 %v170_v17, %v61_v12 }
  0xae   :  { %63 = vadd.xlane.f32.xlu1 %v62_v4  ;;  %117 = vadd.xlane.f32.xlu0 %v116_v13 }
  0xb2   :  { %122 = vadd.xlane.f32.xlu0 %v121_v19 }
 0x133   :  { %v59_v9 = vpop.xlane.xlu0 %58 }
 0x134   :  { %171 = vlog2.f32 %v59_v9 }
 0x137   :  { %v64_v20 = vpop.xlane.xlu1 %63  ;;  %v118_v23 = vpop.xlane.xlu0 %117 }
 0x138   :  { %173 = vlog2.f32 %v64_v20 }
 0x13b   :  { %v123_v32 = vpop.xlane.xlu0 %122 }
 0x141   :  { %v172_v21 = vpop.eup %171 }
 0x142   :  { %v66_v22 = vmul.f32 0.6931472, %v172_v21 }
 0x144   :  { %v69_v24 = vadd.f32 %v66_v22, %v252_v18 }
 0x145   :  { %v174_v25 = vpop.eup %173 }
 0x146   :  { %v68_v26 = vmul.f32 0.6931472, %v174_v25  ;;  %v130_v27 = vsub.f32 %v69_v24, %v118_v23 }
 0x148   :  { %v132_v28 = vmul.f32 %v149_v10, %v130_v27  ;;  %v70_v30 = vadd.f32 %v68_v26, %v262_v29 }
 0x14a   :  { %135 = vst.msk [vmem:[%s302_s2] sm:$0xff] %vm134_vm10, %v132_v28  ;;  %v131_v11 = vsub.f32 %v70_v30, %v123_v32 }
 0x14c   :  { %v133_v18 = vmul.f32 %v150_v31, %v131_v11 }
 0x14e   :  { %136 = vst.msk [vmem:[%s302_s2 + $0x8] sm:$0xff] %vm134_vm10, %v133_v18 }

</bundles_post_ra>
